<compile_context>
chip_gen: v7x
topology: tpu7x:2x2x1
jax: 0.10.0
libtpu: 0.0.40
codegen_flags: <defaults>
</compile_context>

<pallas_src>
import math
from functools import partial

import jax
import jax.numpy as jnp
from jax.experimental import pallas as pl
from jax.experimental.pallas import tpu as pltpu

_LN_EPS = 1e-5
_INV_SQRT2 = 1.0 / math.sqrt(2.0)


# ---------------------------------------------------------------------------
# In-kernel helpers (f32 elementwise math, bf16 MXU matmuls with f32 accum)
# ---------------------------------------------------------------------------

def _gelu(x):
    # exact (erf) GELU, matching PyTorch F.gelu default
    return 0.5 * x * (1.0 + jax.lax.erf(x * _INV_SQRT2))


def _layernorm(x, g, b, eps=_LN_EPS):
    mu = jnp.mean(x, axis=-1, keepdims=True)
    xc = x - mu
    var = jnp.mean(xc * xc, axis=-1, keepdims=True)
    return xc * jax.lax.rsqrt(var + eps) * g + b


def _add_layernorm(x, r, g, b):
    return _layernorm(x + r, g, b)


def _mm(x, w):
    # cast activation to the (bf16) weight dtype; MXU matmul with f32 accumulation
    return jnp.dot(x.astype(w.dtype), w, preferred_element_type=jnp.float32)


def _attend(q, k, v, H):
    """q: (Sq, E), k/v: (Sk, E) f32, scale already folded into q.  Returns (Sq, E) f32."""
    Sq, E = q.shape
    Sk = k.shape[0]
    Dh = E // H
    # head-batched layout (H, S, Dh): one batched contraction per matmul, no per-head loop
    qh = jnp.swapaxes(q.reshape(Sq, H, Dh), 0, 1).astype(jnp.bfloat16)
    kh = jnp.swapaxes(k.reshape(Sk, H, Dh), 0, 1).astype(jnp.bfloat16)
    vh = jnp.swapaxes(v.reshape(Sk, H, Dh), 0, 1).astype(jnp.bfloat16)
    s = jnp.einsum("hqd,hkd->hqk", qh, kh, preferred_element_type=jnp.float32)
    s = s - jnp.max(s, axis=-1, keepdims=True)
    p = jnp.exp(s)
    p = p * pl.reciprocal(jnp.sum(p, axis=-1, keepdims=True), approx=True)
    o = jnp.einsum("hqk,hkd->hqd", p.astype(jnp.bfloat16), vh,
                   preferred_element_type=jnp.float32)            # (H, Sq, Dh)
    return jnp.swapaxes(o, 0, 1).reshape(Sq, E)                   # contiguous head "concat"


def _self_attention(x, w_in, b_in, w_out, b_out, H):
    Sq, E = x.shape
    scale = 1.0 / math.sqrt(E // H)
    qkv = _mm(x, w_in) + b_in                 # fused QKV: one (Sq,E)x(E,3E) matmul
    q = qkv[:, :E] * scale                    # aligned lane slices (E % 128 == 0)
    k = qkv[:, E:2 * E]
    v = qkv[:, 2 * E:]
    o = _attend(q, k, v, H)
    return _mm(o, w_out) + b_out              # single full-E output projection


def _cross_attention(y, mem, w_q, b_q, w_kv, b_kv, w_out, b_out, H):
    T, E = y.shape
    scale = 1.0 / math.sqrt(E // H)
    q = (_mm(y, w_q) + b_q) * scale
    kv = _mm(mem, w_kv) + b_kv                # fused KV projection of the memory
    o = _attend(q, kv[:, :E], kv[:, E:], H)
    return _mm(o, w_out) + b_out


# ---------------------------------------------------------------------------
# Stack kernels: grid = (batch, layer), activation carried in the output block
# ---------------------------------------------------------------------------

def _encoder_stack_kernel(x_ref, w_in_ref, w_out_ref, w1_ref, w2_ref, sm_ref, fn_ref,
                          o_ref, *, E, F, H, n_layers):
    l = pl.program_id(1)

    @pl.when(l == 0)
    def _():                                  # load stack input into the carried block
        o_ref[...] = x_ref[...]

    x = o_ref[...].astype(jnp.float32)        # activation resident across the layer axis
    sm = sm_ref[...]                          # packed biases / LN params for this layer

    sa = _self_attention(x, w_in_ref[...], sm[0:1, :3 * E],
                         w_out_ref[...], sm[1:2, :E], H)
    x = _add_layernorm(x, sa, sm[2:3, :E], sm[3:4, :E])
    h = _gelu(_mm(x, w1_ref[...]) + sm[4:5, :F])
    h = _mm(h, w2_ref[...]) + sm[5:6, :E]
    x = _add_layernorm(x, h, sm[6:7, :E], sm[7:8, :E])

    o_ref[...] = x.astype(o_ref.dtype)

    @pl.when(l == n_layers - 1)               # final encoder LayerNorm, fused in
    def _():
        o_ref[...] = _layernorm(x, fn_ref[0:1, :], fn_ref[1:2, :]).astype(o_ref.dtype)


def _decoder_stack_kernel(y_ref, mem_ref, sa_w_in_ref, sa_w_out_ref,
                          ca_w_q_ref, ca_w_kv_ref, ca_w_out_ref,
                          w1_ref, w2_ref, sm_ref, fn_ref, o_ref,
                          *, E, F, H, n_layers):
    l = pl.program_id(1)

    @pl.when(l == 0)
    def _():
        o_ref[...] = y_ref[...]

    y = o_ref[...].astype(jnp.float32)
    mem = mem_ref[...].astype(jnp.float32)
    sm = sm_ref[...]

    sa = _self_attention(y, sa_w_in_ref[...], sm[0:1, :3 * E],
                         sa_w_out_ref[...], sm[1:2, :E], H)
    y = _add_layernorm(y, sa, sm[2:3, :E], sm[3:4, :E])
    ca = _cross_attention(y, mem,
                          ca_w_q_ref[...], sm[4:5, :E],
                          ca_w_kv_ref[...], sm[5:6, :2 * E],
                          ca_w_out_ref[...], sm[6:7, :E], H)
    y = _add_layernorm(y, ca, sm[7:8, :E], sm[8:9, :E])
    h = _gelu(_mm(y, w1_ref[...]) + sm[9:10, :F])
    h = _mm(h, w2_ref[...]) + sm[10:11, :E]
    y = _add_layernorm(y, h, sm[11:12, :E], sm[12:13, :E])

    o_ref[...] = y.astype(o_ref.dtype)

    @pl.when(l == n_layers - 1)               # final decoder LayerNorm, fused in
    def _():
        o_ref[...] = _layernorm(y, fn_ref[0:1, :], fn_ref[1:2, :]).astype(o_ref.dtype)


# ---------------------------------------------------------------------------
# pallas_call wrappers
# ---------------------------------------------------------------------------

def _vmem_budget(per_layer_weight_bytes, act_bytes):
    # 2x weights (double-buffered) + activations + margin; capped below v7x's 64 MiB/TC
    need = 2 * per_layer_weight_bytes + act_bytes + (2 << 20)
    return int(min(48 << 20, max(8 << 20, need)))


def encoder_stack(x, p, nhead):
    N, S, E = x.shape
    L = p["w_in"].shape[0]
    F = p["w1"].shape[2]
    R, W = p["small"].shape[1:]

    wmap = lambda b, l: (l, 0, 0)             # per-layer stacked weights
    amap = lambda b, l: (b, 0, 0)             # per-batch activations (resident across l)
    cmap = lambda b, l: (0, 0)                # constants

    wbytes = (p["w_in"].nbytes + p["w_out"].nbytes + p["w1"].nbytes
              + p["w2"].nbytes + p["small"].nbytes) // L
    flops = L * N * (2 * S * E * 3 * E + 4 * S * S * E + 2 * S * E * E + 4 * S * E * F)
    trans = L * N * (nhead * S * S + S * F + 4 * S)
    cost = pl.CostEstimate(flops=int(flops), transcendentals=int(trans),
                           bytes_accessed=int(N * L * wbytes + 2 * x.nbytes))

    return pl.pallas_call(
        partial(_encoder_stack_kernel, E=E, F=F, H=nhead, n_layers=L),
        out_shape=jax.ShapeDtypeStruct((N, S, E), jnp.float32),
        grid=(N, L),
        in_specs=[
            pl.BlockSpec((None, S, E), amap),        # x (read at layer 0 only)
            pl.BlockSpec((None, E, 3 * E), wmap),    # fused QKV weight
            pl.BlockSpec((None, E, E), wmap),        # attn out proj
            pl.BlockSpec((None, E, F), wmap),        # ffn w1
            pl.BlockSpec((None, F, E), wmap),        # ffn w2
            pl.BlockSpec((None, R, W), wmap),        # packed biases / LN params
            pl.BlockSpec((2, E), cmap),              # final norm (gamma; beta)
        ],
        out_specs=pl.BlockSpec((None, S, E), amap),  # revisited across the layer axis
        compiler_params=pltpu.CompilerParams(
            dimension_semantics=("parallel", "arbitrary"),
            vmem_limit_bytes=_vmem_budget(wbytes, 4 * S * E * 4)),
        cost_estimate=cost,
    )(x, p["w_in"], p["w_out"], p["w1"], p["w2"], p["small"], p["final_norm"])


def decoder_stack(y, mem, p, nhead):
    N, T, E = y.shape
    S = mem.shape[1]
    L = p["sa_w_in"].shape[0]
    F = p["w1"].shape[2]
    R, W = p["small"].shape[1:]

    wmap = lambda b, l: (l, 0, 0)
    amap = lambda b, l: (b, 0, 0)
    cmap = lambda b, l: (0, 0)

    wbytes = (p["sa_w_in"].nbytes + p["sa_w_out"].nbytes + p["ca_w_q"].nbytes
              + p["ca_w_kv"].nbytes + p["ca_w_out"].nbytes + p["w1"].nbytes
              + p["w2"].nbytes + p["small"].nbytes) // L
    flops = L * N * (2 * T * E * 3 * E + 4 * T * T * E + 2 * T * E * E        # self-attn
                     + 2 * T * E * E + 4 * S * E * E + 4 * T * S * E + 2 * T * E * E  # cross
                     + 4 * T * E * F)                                          # FFN
    trans = L * N * (nhead * (T * T + T * S) + T * F + 6 * T)
    cost = pl.CostEstimate(flops=int(flops), transcendentals=int(trans),
                           bytes_accessed=int(N * L * wbytes + 2 * y.nbytes + N * mem.nbytes))

    return pl.pallas_call(
        partial(_decoder_stack_kernel, E=E, F=F, H=nhead, n_layers=L),
        out_shape=jax.ShapeDtypeStruct((N, T, E), jnp.float32),
        grid=(N, L),
        in_specs=[
            pl.BlockSpec((None, T, E), amap),        # y (read at layer 0 only)
            pl.BlockSpec((None, S, E), amap),        # encoder memory
            pl.BlockSpec((None, E, 3 * E), wmap),    # self-attn fused QKV
            pl.BlockSpec((None, E, E), wmap),        # self-attn out proj
            pl.BlockSpec((None, E, E), wmap),        # cross-attn Q proj
            pl.BlockSpec((None, E, 2 * E), wmap),    # cross-attn fused KV proj
            pl.BlockSpec((None, E, E), wmap),        # cross-attn out proj
            pl.BlockSpec((None, E, F), wmap),        # ffn w1
            pl.BlockSpec((None, F, E), wmap),        # ffn w2
            pl.BlockSpec((None, R, W), wmap),        # packed biases / LN params
            pl.BlockSpec((2, E), cmap),              # final norm (gamma; beta)
        ],
        out_specs=pl.BlockSpec((None, T, E), amap),
        compiler_params=pltpu.CompilerParams(
            dimension_semantics=("parallel", "arbitrary"),
            vmem_limit_bytes=_vmem_budget(wbytes, 4 * (T + S) * E * 4)),
        cost_estimate=cost,
    )(y, mem, p["sa_w_in"], p["sa_w_out"], p["ca_w_q"], p["ca_w_kv"], p["ca_w_out"],
      p["w1"], p["w2"], p["small"], p["final_norm"])


# ---------------------------------------------------------------------------
# Forward pass (PyTorch layout: src (S, N, E), prev/tgt (T, N, E))
# ---------------------------------------------------------------------------

def transformer_adapter_forward(params, src, prev, nhead):
    x = jnp.transpose(src, (1, 0, 2))                   # one layout change outside kernels
    mem = encoder_stack(x, params["encoder"], nhead)
    y = jnp.transpose(prev, (1, 0, 2))
    out = decoder_stack(y, mem, params["decoder"], nhead)
    return jnp.transpose(out, (1, 0, 2))


# ---------------------------------------------------------------------------
# Deterministic parameter init (layer-stacked, bf16 weights, packed small params)
# ---------------------------------------------------------------------------

def _pack_small(vecs, width, n_rows):
    rows = [jnp.pad(v.astype(jnp.float32), (0, width - v.shape[0])) for v in vecs]
    rows += [jnp.zeros((width,), jnp.float32)] * (n_rows - len(vecs))
    return jnp.stack(rows, 0)


def init_params(key, E, F, n_enc, n_dec, wdtype=jnp.bfloat16):
    # lane-dense layouts: E, F multiples of 128 keep all slices (8,128)-tile aligned
    assert E % 128 == 0 and F % 128 == 0
    W = max(3 * E, F)
    k = jax.random.split(key, 11)

    def w(kk, shape):
        return (jax.random.normal(kk, shape, jnp.float32) * 0.02).astype(wdtype)

    one = jnp.ones((E,), jnp.float32)
    zE = jnp.zeros((E,), jnp.float32)
    z2E = jnp.zeros((2 * E,), jnp.float32)
    z3E = jnp.zeros((3 * E,), jnp.float32)
    zF = jnp.zeros((F,), jnp.float32)

    # row order must match the kernels' slicing
    enc_small = _pack_small([z3E, zE, one, zE, zF, zE, one, zE], W, 8)
    dec_small = _pack_small([z3E, zE, one, zE, zE, z2E, zE, one, zE, zF, zE, one, zE], W, 16)

    encoder = {
        "w_in": w(k[0], (n_enc, E, 3 * E)),
        "w_out": w(k[1], (n_enc, E, E)),
        "w1": w(k[2], (n_enc, E, F)),
        "w2": w(k[3], (n_enc, F, E)),
        "small": jnp.tile(enc_small[None], (n_enc, 1, 1)),
        "final_norm": jnp.stack([one, zE]),
    }
    decoder = {
        "sa_w_in": w(k[4], (n_dec, E, 3 * E)),
        "sa_w_out": w(k[5], (n_dec, E, E)),
        "ca_w_q": w(k[6], (n_dec, E, E)),
        "ca_w_kv": w(k[7], (n_dec, E, 2 * E)),
        "ca_w_out": w(k[8], (n_dec, E, E)),
        "w1": w(k[9], (n_dec, E, F)),
        "w2": w(k[10], (n_dec, F, E)),
        "small": jnp.tile(dec_small[None], (n_dec, 1, 1)),
        "final_norm": jnp.stack([one, zE]),
    }
    return {"encoder": encoder, "decoder": decoder}


# ---------------------------------------------------------------------------
# Main
# ---------------------------------------------------------------------------

if __name__ == "__main__":
    # Small shapes consistent with the module (d_model scaled down but kept lane-dense;
    # nhead=8 and 4+4 layers as in nn.Transformer defaults).
    S, T, N = 8, 8, 2                 # src seq, tgt seq, batch
    d_model, nhead, dim_ff = 128, 8, 256

    key = jax.random.PRNGKey(0)
    kp, ks, kt = jax.random.split(key, 3)
    params = init_params(kp, d_model, dim_ff, n_enc=4, n_dec=4)

    src = jax.random.normal(ks, (S, N, d_model), jnp.float32)
    prev = jax.random.normal(kt, (T, N, d_model), jnp.float32)

    fwd = jax.jit(transformer_adapter_forward, static_argnums=(3,))
    out = jax.block_until_ready(fwd(params, src, prev, nhead))
    assert out.shape == (T, N, d_model)
    assert bool(jnp.all(jnp.isfinite(out)))
    print("KERNEL_OK")
</pallas_src>

<mosaic_0001>
module attributes {stable_mosaic.version = 11 : i64} {
  func.func @_encoder_stack_kernel(%arg0: i32, %arg1: i32, %arg2: memref<1x8x128xf32, #tpu.memory_space<vmem>>, %arg3: memref<1x128x384xbf16, #tpu.memory_space<vmem>>, %arg4: memref<1x128x128xbf16, #tpu.memory_space<vmem>>, %arg5: memref<1x128x256xbf16, #tpu.memory_space<vmem>>, %arg6: memref<1x256x128xbf16, #tpu.memory_space<vmem>>, %arg7: memref<1x8x384xf32, #tpu.memory_space<vmem>>, %arg8: memref<2x128xf32, #tpu.memory_space<vmem>>, %arg9: memref<1x8x128xf32, #tpu.memory_space<vmem>>) attributes {dimension_semantics = [#tpu.dimension_semantics<parallel>, #tpu.dimension_semantics<arbitrary>], iteration_bounds = array<i64: 2, 4>, scalar_prefetch = 0 : i64, scratch_operands = 0 : i64, tpu.core_type = #tpu.core_type<tc>, window_params = [{transform_indices = @transform_0, window_bounds = array<i64: 1, 8, 128>}, {transform_indices = @transform_1, window_bounds = array<i64: 1, 128, 384>}, {transform_indices = @transform_2, window_bounds = array<i64: 1, 128, 128>}, {transform_indices = @transform_3, window_bounds = array<i64: 1, 128, 256>}, {transform_indices = @transform_4, window_bounds = array<i64: 1, 256, 128>}, {transform_indices = @transform_5, window_bounds = array<i64: 1, 8, 384>}, {pipeline_mode = #tpu.pipeline_mode<synchronous>, transform_indices = @transform_6, window_bounds = array<i64: 2, 128>}, {transform_indices = @transform_7, window_bounds = array<i64: 1, 8, 128>}]} {
    %c0_i32 = arith.constant 0 : i32
    %0 = arith.cmpi eq, %arg1, %c0_i32 : i32
    %1 = arith.extui %0 : i1 to i32
    %c0_i32_0 = arith.constant 0 : i32
    %2 = arith.cmpi ne, %1, %c0_i32_0 : i32
    scf.if %2 {
      %c0_43 = arith.constant 0 : index
      %c0_44 = arith.constant 0 : index
      %c0_45 = arith.constant 0 : index
      %124 = vector.load %arg2[%c0_43, %c0_44, %c0_45] : memref<1x8x128xf32, #tpu.memory_space<vmem>>, vector<1x8x128xf32>
      %125 = vector.shape_cast %124 : vector<1x8x128xf32> to vector<8x128xf32>
      %c0_46 = arith.constant 0 : index
      %c0_47 = arith.constant 0 : index
      %c0_48 = arith.constant 0 : index
      %126 = vector.load %arg9[%c0_46, %c0_47, %c0_48] : memref<1x8x128xf32, #tpu.memory_space<vmem>>, vector<1x8x128xf32>
      %127 = vector.shape_cast %126 : vector<1x8x128xf32> to vector<8x128xf32>
      %128 = vector.shape_cast %125 : vector<8x128xf32> to vector<1x8x128xf32>
      tpu.vector_store %arg9[%c0_46, %c0_47, %c0_48], %128 {strides = array<i32>} : memref<1x8x128xf32, #tpu.memory_space<vmem>>, vector<1x8x128xf32>,
    } else {
    }
    %c0 = arith.constant 0 : index
    %c0_1 = arith.constant 0 : index
    %c0_2 = arith.constant 0 : index
    %3 = vector.load %arg9[%c0, %c0_1, %c0_2] : memref<1x8x128xf32, #tpu.memory_space<vmem>>, vector<1x8x128xf32>
    %4 = vector.shape_cast %3 : vector<1x8x128xf32> to vector<8x128xf32>
    %c0_3 = arith.constant 0 : index
    %c0_4 = arith.constant 0 : index
    %c0_5 = arith.constant 0 : index
    %5 = vector.load %arg7[%c0_3, %c0_4, %c0_5] : memref<1x8x384xf32, #tpu.memory_space<vmem>>, vector<1x8x384xf32>
    %6 = vector.shape_cast %5 : vector<1x8x384xf32> to vector<8x384xf32>
    %c0_6 = arith.constant 0 : index
    %c0_7 = arith.constant 0 : index
    %c0_8 = arith.constant 0 : index
    %7 = vector.load %arg3[%c0_6, %c0_7, %c0_8] : memref<1x128x384xbf16, #tpu.memory_space<vmem>>, vector<1x128x384xbf16>
    %8 = vector.shape_cast %7 : vector<1x128x384xbf16> to vector<128x384xbf16>
    %9 = vector.extract_strided_slice %6 {offsets = [0, 0], sizes = [1, 384], strides = [1, 1]} : vector<8x384xf32> to vector<1x384xf32>
    %c0_9 = arith.constant 0 : index
    %c0_10 = arith.constant 0 : index
    %c0_11 = arith.constant 0 : index
    %10 = vector.load %arg4[%c0_9, %c0_10, %c0_11] : memref<1x128x128xbf16, #tpu.memory_space<vmem>>, vector<1x128x128xbf16>
    %11 = vector.shape_cast %10 : vector<1x128x128xbf16> to vector<128x128xbf16>
    %12 = vector.extract_strided_slice %6 {offsets = [1, 0], sizes = [1, 128], strides = [1, 1]} : vector<8x384xf32> to vector<1x128xf32>
    %13 = arith.truncf %4 : vector<8x128xf32> to vector<8x128xbf16>
    %cst = arith.constant dense<0.000000e+00> : vector<8x384xf32>
    %14 = tpu.matmul %13, %8, %cst {dimension_numbers = #tpu.dot_dimension_numbers<[1], [0], [0], [1], [0, 0, 1, 1], [], []>} : vector<8x128xbf16>, vector<128x384xbf16>, vector<8x384xf32> -> vector<8x384xf32>
    %15 = vector.broadcast %9 : vector<1x384xf32> to vector<8x384xf32>
    %16 = arith.addf %14, %15 : vector<8x384xf32>
    %17 = vector.extract_strided_slice %16 {offsets = [0, 0], sizes = [8, 128], strides = [1, 1]} : vector<8x384xf32> to vector<8x128xf32>
    %cst_12 = arith.constant 2.500000e-01 : f32
    %18 = vector.broadcast %cst_12 : f32 to vector<8x128xf32>
    %19 = arith.mulf %17, %18 : vector<8x128xf32>
    %20 = vector.extract_strided_slice %16 {offsets = [0, 128], sizes = [8, 128], strides = [1, 1]} : vector<8x384xf32> to vector<8x128xf32>
    %21 = vector.extract_strided_slice %16 {offsets = [0, 256], sizes = [8, 128], strides = [1, 1]} : vector<8x384xf32> to vector<8x128xf32>
    %22 = vector.shape_cast %19 : vector<8x128xf32> to vector<8x8x16xf32>
    %23 = tpu.transpose %22, [1, 0, 2] : vector<8x8x16xf32> -> vector<8x8x16xf32>
    %24 = arith.truncf %23 : vector<8x8x16xf32> to vector<8x8x16xbf16>
    %25 = vector.shape_cast %20 : vector<8x128xf32> to vector<8x8x16xf32>
    %26 = tpu.transpose %25, [1, 0, 2] : vector<8x8x16xf32> -> vector<8x8x16xf32>
    %27 = arith.truncf %26 : vector<8x8x16xf32> to vector<8x8x16xbf16>
    %28 = vector.shape_cast %21 : vector<8x128xf32> to vector<8x8x16xf32>
    %29 = tpu.transpose %28, [1, 0, 2] : vector<8x8x16xf32> -> vector<8x8x16xf32>
    %30 = arith.truncf %29 : vector<8x8x16xf32> to vector<8x8x16xbf16>
    "tpu.trace_start"() <{level = 10 : i32, message = "hqd,hkd->hqk"}> : () -> ()
    %cst_13 = arith.constant dense<0.000000e+00> : vector<8x8x8xf32>
    %31 = tpu.matmul %24, %27, %cst_13 {dimension_numbers = #tpu.dot_dimension_numbers<[2], [2], [1], [1], [0, 0, 0, 1, 1, 1], [0], [0]>} : vector<8x8x16xbf16>, vector<8x8x16xbf16>, vector<8x8x8xf32> -> vector<8x8x8xf32>
    "tpu.trace_stop"() : () -> ()
    %cst_14 = arith.constant dense<0xFF800000> : vector<8x8xf32>
    %32 = vector.multi_reduction <maximumf>, %31, %cst_14 [2] : vector<8x8x8xf32> to vector<8x8xf32>
    %33 = vector.shape_cast %32 : vector<8x8xf32> to vector<8x8x1xf32>
    %34 = vector.broadcast %33 : vector<8x8x1xf32> to vector<8x8x8xf32>
    %35 = arith.subf %31, %34 : vector<8x8x8xf32>
    %36 = math.exp %35 : vector<8x8x8xf32>
    %cst_15 = arith.constant dense<0.000000e+00> : vector<8x8xf32>
    %37 = vector.multi_reduction <add>, %36, %cst_15 [2] : vector<8x8x8xf32> to vector<8x8xf32>
    %38 = vector.shape_cast %37 : vector<8x8xf32> to vector<8x8x1xf32>
    %39 = tpu.reciprocal %38 {approx = true} : vector<8x8x1xf32> -> vector<8x8x1xf32>
    %40 = vector.broadcast %39 : vector<8x8x1xf32> to vector<8x8x8xf32>
    %41 = arith.mulf %36, %40 : vector<8x8x8xf32>
    %42 = arith.truncf %41 : vector<8x8x8xf32> to vector<8x8x8xbf16>
    "tpu.trace_start"() <{level = 10 : i32, message = "hqk,hkd->hqd"}> : () -> ()
    %cst_16 = arith.constant dense<0.000000e+00> : vector<8x8x16xf32>
    %43 = tpu.matmul %42, %30, %cst_16 {dimension_numbers = #tpu.dot_dimension_numbers<[2], [1], [1], [2], [0, 0, 0, 1, 1, 2], [0], [0]>} : vector<8x8x8xbf16>, vector<8x8x16xbf16>, vector<8x8x16xf32> -> vector<8x8x16xf32>
    "tpu.trace_stop"() : () -> ()
    %44 = tpu.transpose %43, [1, 0, 2] : vector<8x8x16xf32> -> vector<8x8x16xf32>
    %45 = vector.shape_cast %44 : vector<8x8x16xf32> to vector<8x128xf32>
    %46 = arith.truncf %45 : vector<8x128xf32> to vector<8x128xbf16>
    %cst_17 = arith.constant dense<0.000000e+00> : vector<8x128xf32>
    %47 = tpu.matmul %46, %11, %cst_17 {dimension_numbers = #tpu.dot_dimension_numbers<[1], [0], [0], [1], [0, 0, 1, 1], [], []>} : vector<8x128xbf16>, vector<128x128xbf16>, vector<8x128xf32> -> vector<8x128xf32>
    %48 = vector.broadcast %12 : vector<1x128xf32> to vector<8x128xf32>
    %49 = arith.addf %47, %48 : vector<8x128xf32>
    %50 = vector.extract_strided_slice %6 {offsets = [2, 0], sizes = [1, 128], strides = [1, 1]} : vector<8x384xf32> to vector<1x128xf32>
    %51 = vector.extract_strided_slice %6 {offsets = [3, 0], sizes = [1, 128], strides = [1, 1]} : vector<8x384xf32> to vector<1x128xf32>
    %52 = arith.addf %4, %49 : vector<8x128xf32>
    %cst_18 = arith.constant dense<0.000000e+00> : vector<8xf32>
    %53 = vector.multi_reduction <add>, %52, %cst_18 [1] : vector<8x128xf32> to vector<8xf32>
    %54 = vector.shape_cast %53 : vector<8xf32> to vector<8x1xf32>
    %cst_19 = arith.constant 1.280000e+02 : f32
    %55 = vector.broadcast %cst_19 : f32 to vector<8x1xf32>
    %56 = arith.divf %54, %55 : vector<8x1xf32>
    %57 = vector.broadcast %56 : vector<8x1xf32> to vector<8x128xf32>
    %58 = arith.subf %52, %57 : vector<8x128xf32>
    %59 = arith.mulf %58, %58 : vector<8x128xf32>
    %cst_20 = arith.constant dense<0.000000e+00> : vector<8xf32>
    %60 = vector.multi_reduction <add>, %59, %cst_20 [1] : vector<8x128xf32> to vector<8xf32>
    %61 = vector.shape_cast %60 : vector<8xf32> to vector<8x1xf32>
    %cst_21 = arith.constant 1.280000e+02 : f32
    %62 = vector.broadcast %cst_21 : f32 to vector<8x1xf32>
    %63 = arith.divf %61, %62 : vector<8x1xf32>
    %cst_22 = arith.constant 9.99999974E-6 : f32
    %64 = vector.broadcast %cst_22 : f32 to vector<8x1xf32>
    %65 = arith.addf %63, %64 : vector<8x1xf32>
    %66 = math.rsqrt %65 : vector<8x1xf32>
    %67 = vector.broadcast %66 : vector<8x1xf32> to vector<8x128xf32>
    %68 = arith.mulf %58, %67 : vector<8x128xf32>
    %69 = vector.broadcast %50 : vector<1x128xf32> to vector<8x128xf32>
    %70 = arith.mulf %68, %69 : vector<8x128xf32>
    %71 = vector.broadcast %51 : vector<1x128xf32> to vector<8x128xf32>
    %72 = arith.addf %70, %71 : vector<8x128xf32>
    %c0_23 = arith.constant 0 : index
    %c0_24 = arith.constant 0 : index
    %c0_25 = arith.constant 0 : index
    %73 = vector.load %arg5[%c0_23, %c0_24, %c0_25] : memref<1x128x256xbf16, #tpu.memory_space<vmem>>, vector<1x128x256xbf16>
    %74 = vector.shape_cast %73 : vector<1x128x256xbf16> to vector<128x256xbf16>
    %75 = arith.truncf %72 : vector<8x128xf32> to vector<8x128xbf16>
    %cst_26 = arith.constant dense<0.000000e+00> : vector<8x256xf32>
    %76 = tpu.matmul %75, %74, %cst_26 {dimension_numbers = #tpu.dot_dimension_numbers<[1], [0], [0], [1], [0, 0, 1, 1], [], []>} : vector<8x128xbf16>, vector<128x256xbf16>, vector<8x256xf32> -> vector<8x256xf32>
    %77 = vector.extract_strided_slice %6 {offsets = [4, 0], sizes = [1, 256], strides = [1, 1]} : vector<8x384xf32> to vector<1x256xf32>
    %78 = vector.broadcast %77 : vector<1x256xf32> to vector<8x256xf32>
    %79 = arith.addf %76, %78 : vector<8x256xf32>
    %cst_27 = arith.constant 5.000000e-01 : f32
    %80 = vector.broadcast %cst_27 : f32 to vector<8x256xf32>
    %81 = arith.mulf %80, %79 : vector<8x256xf32>
    %cst_28 = arith.constant 0.707106769 : f32
    %82 = vector.broadcast %cst_28 : f32 to vector<8x256xf32>
    %83 = arith.mulf %79, %82 : vector<8x256xf32>
    %84 = math.erf %83 : vector<8x256xf32>
    %cst_29 = arith.constant 1.000000e+00 : f32
    %85 = vector.broadcast %cst_29 : f32 to vector<8x256xf32>
    %86 = arith.addf %85, %84 : vector<8x256xf32>
    %87 = arith.mulf %81, %86 : vector<8x256xf32>
    %c0_30 = arith.constant 0 : index
    %c0_31 = arith.constant 0 : index
    %c0_32 = arith.constant 0 : index
    %88 = vector.load %arg6[%c0_30, %c0_31, %c0_32] : memref<1x256x128xbf16, #tpu.memory_space<vmem>>, vector<1x256x128xbf16>
    %89 = vector.shape_cast %88 : vector<1x256x128xbf16> to vector<256x128xbf16>
    %90 = arith.truncf %87 : vector<8x256xf32> to vector<8x256xbf16>
    %cst_33 = arith.constant dense<0.000000e+00> : vector<8x128xf32>
    %91 = tpu.matmul %90, %89, %cst_33 {dimension_numbers = #tpu.dot_dimension_numbers<[1], [0], [0], [1], [0, 0, 1, 1], [], []>} : vector<8x256xbf16>, vector<256x128xbf16>, vector<8x128xf32> -> vector<8x128xf32>
    %92 = vector.extract_strided_slice %6 {offsets = [5, 0], sizes = [1, 128], strides = [1, 1]} : vector<8x384xf32> to vector<1x128xf32>
    %93 = vector.broadcast %92 : vector<1x128xf32> to vector<8x128xf32>
    %94 = arith.addf %91, %93 : vector<8x128xf32>
    %95 = vector.extract_strided_slice %6 {offsets = [6, 0], sizes = [1, 128], strides = [1, 1]} : vector<8x384xf32> to vector<1x128xf32>
    %96 = vector.extract_strided_slice %6 {offsets = [7, 0], sizes = [1, 128], strides = [1, 1]} : vector<8x384xf32> to vector<1x128xf32>
    %97 = arith.addf %72, %94 : vector<8x128xf32>
    %cst_34 = arith.constant dense<0.000000e+00> : vector<8xf32>
    %98 = vector.multi_reduction <add>, %97, %cst_34 [1] : vector<8x128xf32> to vector<8xf32>
    %99 = vector.shape_cast %98 : vector<8xf32> to vector<8x1xf32>
    %cst_35 = arith.constant 1.280000e+02 : f32
    %100 = vector.broadcast %cst_35 : f32 to vector<8x1xf32>
    %101 = arith.divf %99, %100 : vector<8x1xf32>
    %102 = vector.broadcast %101 : vector<8x1xf32> to vector<8x128xf32>
    %103 = arith.subf %97, %102 : vector<8x128xf32>
    %104 = arith.mulf %103, %103 : vector<8x128xf32>
    %cst_36 = arith.constant dense<0.000000e+00> : vector<8xf32>
    %105 = vector.multi_reduction <add>, %104, %cst_36 [1] : vector<8x128xf32> to vector<8xf32>
    %106 = vector.shape_cast %105 : vector<8xf32> to vector<8x1xf32>
    %cst_37 = arith.constant 1.280000e+02 : f32
    %107 = vector.broadcast %cst_37 : f32 to vector<8x1xf32>
    %108 = arith.divf %106, %107 : vector<8x1xf32>
    %cst_38 = arith.constant 9.99999974E-6 : f32
    %109 = vector.broadcast %cst_38 : f32 to vector<8x1xf32>
    %110 = arith.addf %108, %109 : vector<8x1xf32>
    %111 = math.rsqrt %110 : vector<8x1xf32>
    %112 = vector.broadcast %111 : vector<8x1xf32> to vector<8x128xf32>
    %113 = arith.mulf %103, %112 : vector<8x128xf32>
    %114 = vector.broadcast %95 : vector<1x128xf32> to vector<8x128xf32>
    %115 = arith.mulf %113, %114 : vector<8x128xf32>
    %116 = vector.broadcast %96 : vector<1x128xf32> to vector<8x128xf32>
    %117 = arith.addf %115, %116 : vector<8x128xf32>
    %c0_39 = arith.constant 0 : index
    %c0_40 = arith.constant 0 : index
    %c0_41 = arith.constant 0 : index
    %118 = vector.load %arg9[%c0_39, %c0_40, %c0_41] : memref<1x8x128xf32, #tpu.memory_space<vmem>>, vector<1x8x128xf32>
    %119 = vector.shape_cast %118 : vector<1x8x128xf32> to vector<8x128xf32>
    %120 = vector.shape_cast %117 : vector<8x128xf32> to vector<1x8x128xf32>
    tpu.vector_store %arg9[%c0_39, %c0_40, %c0_41], %120 {strides = array<i32>} : memref<1x8x128xf32, #tpu.memory_space<vmem>>, vector<1x8x128xf32>,
    %c3_i32 = arith.constant 3 : i32
    %121 = arith.cmpi eq, %arg1, %c3_i32 : i32
    %122 = arith.extui %121 : i1 to i32
    %c0_i32_42 = arith.constant 0 : i32
    %123 = arith.cmpi ne, %122, %c0_i32_42 : i32
    scf.if %123 {
      %c0_43 = arith.constant 0 : index
      %c0_44 = arith.constant 0 : index
      %124 = vector.load %arg8[%c0_43, %c0_44] : memref<2x128xf32, #tpu.memory_space<vmem>>, vector<1x128xf32>
      %c1 = arith.constant 1 : index
      %c0_45 = arith.constant 0 : index
      %125 = vector.load %arg8[%c1, %c0_45] : memref<2x128xf32, #tpu.memory_space<vmem>>, vector<1x128xf32>
      %cst_46 = arith.constant dense<0.000000e+00> : vector<8xf32>
      %126 = vector.multi_reduction <add>, %117, %cst_46 [1] : vector<8x128xf32> to vector<8xf32>
      %127 = vector.shape_cast %126 : vector<8xf32> to vector<8x1xf32>
      %cst_47 = arith.constant 1.280000e+02 : f32
      %128 = vector.broadcast %cst_47 : f32 to vector<8x1xf32>
      %129 = arith.divf %127, %128 : vector<8x1xf32>
      %130 = vector.broadcast %129 : vector<8x1xf32> to vector<8x128xf32>
      %131 = arith.subf %117, %130 : vector<8x128xf32>
      %132 = arith.mulf %131, %131 : vector<8x128xf32>
      %cst_48 = arith.constant dense<0.000000e+00> : vector<8xf32>
      %133 = vector.multi_reduction <add>, %132, %cst_48 [1] : vector<8x128xf32> to vector<8xf32>
      %134 = vector.shape_cast %133 : vector<8xf32> to vector<8x1xf32>
      %cst_49 = arith.constant 1.280000e+02 : f32
      %135 = vector.broadcast %cst_49 : f32 to vector<8x1xf32>
      %136 = arith.divf %134, %135 : vector<8x1xf32>
      %cst_50 = arith.constant 9.99999974E-6 : f32
      %137 = vector.broadcast %cst_50 : f32 to vector<8x1xf32>
      %138 = arith.addf %136, %137 : vector<8x1xf32>
      %139 = math.rsqrt %138 : vector<8x1xf32>
      %140 = vector.broadcast %139 : vector<8x1xf32> to vector<8x128xf32>
      %141 = arith.mulf %131, %140 : vector<8x128xf32>
      %142 = vector.broadcast %124 : vector<1x128xf32> to vector<8x128xf32>
      %143 = arith.mulf %141, %142 : vector<8x128xf32>
      %144 = vector.broadcast %125 : vector<1x128xf32> to vector<8x128xf32>
      %145 = arith.addf %143, %144 : vector<8x128xf32>
      %c0_51 = arith.constant 0 : index
      %c0_52 = arith.constant 0 : index
      %c0_53 = arith.constant 0 : index
      %146 = vector.load %arg9[%c0_51, %c0_52, %c0_53] : memref<1x8x128xf32, #tpu.memory_space<vmem>>, vector<1x8x128xf32>
      %147 = vector.shape_cast %146 : vector<1x8x128xf32> to vector<8x128xf32>
      %148 = vector.shape_cast %145 : vector<8x128xf32> to vector<1x8x128xf32>
      tpu.vector_store %arg9[%c0_51, %c0_52, %c0_53], %148 {strides = array<i32>} : memref<1x8x128xf32, #tpu.memory_space<vmem>>, vector<1x8x128xf32>,
    } else {
    }
    return
  }
  func.func @transform_0(%arg0: i32, %arg1: i32) -> (i32, i32, i32) {
    %c0_i32 = arith.constant 0 : i32
    %c0_i32_0 = arith.constant 0 : i32
    %c0_i32_1 = arith.constant 0 : i32
    return %arg0, %c0_i32, %c0_i32_0 : i32, i32, i32
  }
  func.func @transform_1(%arg0: i32, %arg1: i32) -> (i32, i32, i32) {
    %c0_i32 = arith.constant 0 : i32
    %c0_i32_0 = arith.constant 0 : i32
    %c0_i32_1 = arith.constant 0 : i32
    return %arg1, %c0_i32, %c0_i32_0 : i32, i32, i32
  }
  func.func @transform_2(%arg0: i32, %arg1: i32) -> (i32, i32, i32) {
    %c0_i32 = arith.constant 0 : i32
    %c0_i32_0 = arith.constant 0 : i32
    %c0_i32_1 = arith.constant 0 : i32
    return %arg1, %c0_i32, %c0_i32_0 : i32, i32, i32
  }
  func.func @transform_3(%arg0: i32, %arg1: i32) -> (i32, i32, i32) {
    %c0_i32 = arith.constant 0 : i32
    %c0_i32_0 = arith.constant 0 : i32
    %c0_i32_1 = arith.constant 0 : i32
    return %arg1, %c0_i32, %c0_i32_0 : i32, i32, i32
  }
  func.func @transform_4(%arg0: i32, %arg1: i32) -> (i32, i32, i32) {
    %c0_i32 = arith.constant 0 : i32
    %c0_i32_0 = arith.constant 0 : i32
    %c0_i32_1 = arith.constant 0 : i32
    return %arg1, %c0_i32, %c0_i32_0 : i32, i32, i32
  }
  func.func @transform_5(%arg0: i32, %arg1: i32) -> (i32, i32, i32) {
    %c0_i32 = arith.constant 0 : i32
    %c0_i32_0 = arith.constant 0 : i32
    %c0_i32_1 = arith.constant 0 : i32
    return %arg1, %c0_i32, %c0_i32_0 : i32, i32, i32
  }
  func.func @transform_6(%arg0: i32, %arg1: i32) -> (i32, i32) {
    %c0_i32 = arith.constant 0 : i32
    %c0_i32_0 = arith.constant 0 : i32
    %c0_i32_1 = arith.constant 0 : i32
    return %c0_i32, %c0_i32_0 : i32, i32
  }
  func.func @transform_7(%arg0: i32, %arg1: i32) -> (i32, i32, i32) {
    %c0_i32 = arith.constant 0 : i32
    %c0_i32_0 = arith.constant 0 : i32
    %c0_i32_1 = arith.constant 0 : i32
    return %arg0, %c0_i32, %c0_i32_0 : i32, i32, i32
  }
}

module attributes {stable_mosaic.version = 11 : i64} {
  func.func @_decoder_stack_kernel(%arg0: i32, %arg1: i32, %arg2: memref<1x8x128xf32, #tpu.memory_space<vmem>>, %arg3: memref<1x8x128xf32, #tpu.memory_space<vmem>>, %arg4: memref<1x128x384xbf16, #tpu.memory_space<vmem>>, %arg5: memref<1x128x128xbf16, #tpu.memory_space<vmem>>, %arg6: memref<1x128x128xbf16, #tpu.memory_space<vmem>>, %arg7: memref<1x128x256xbf16, #tpu.memory_space<vmem>>, %arg8: memref<1x128x128xbf16, #tpu.memory_space<vmem>>, %arg9: memref<1x128x256xbf16, #tpu.memory_space<vmem>>, %arg10: memref<1x256x128xbf16, #tpu.memory_space<vmem>>, %arg11: memref<1x16x384xf32, #tpu.memory_space<vmem>>, %arg12: memref<2x128xf32, #tpu.memory_space<vmem>>, %arg13: memref<1x8x128xf32, #tpu.memory_space<vmem>>) attributes {dimension_semantics = [#tpu.dimension_semantics<parallel>, #tpu.dimension_semantics<arbitrary>], iteration_bounds = array<i64: 2, 4>, scalar_prefetch = 0 : i64, scratch_operands = 0 : i64, tpu.core_type = #tpu.core_type<tc>, window_params = [{transform_indices = @transform_0, window_bounds = array<i64: 1, 8, 128>}, {transform_indices = @transform_1, window_bounds = array<i64: 1, 8, 128>}, {transform_indices = @transform_2, window_bounds = array<i64: 1, 128, 384>}, {transform_indices = @transform_3, window_bounds = array<i64: 1, 128, 128>}, {transform_indices = @transform_4, window_bounds = array<i64: 1, 128, 128>}, {transform_indices = @transform_5, window_bounds = array<i64: 1, 128, 256>}, {transform_indices = @transform_6, window_bounds = array<i64: 1, 128, 128>}, {transform_indices = @transform_7, window_bounds = array<i64: 1, 128, 256>}, {transform_indices = @transform_8, window_bounds = array<i64: 1, 256, 128>}, {transform_indices = @transform_9, window_bounds = array<i64: 1, 16, 384>}, {pipeline_mode = #tpu.pipeline_mode<synchronous>, transform_indices = @transform_10, window_bounds = array<i64: 2, 128>}, {transform_indices = @transform_11, window_bounds = array<i64: 1, 8, 128>}]} {
    %c0_i32 = arith.constant 0 : i32
    %0 = arith.cmpi eq, %arg1, %c0_i32 : i32
    %1 = arith.extui %0 : i1 to i32
    %c0_i32_0 = arith.constant 0 : i32
    %2 = arith.cmpi ne, %1, %c0_i32_0 : i32
    scf.if %2 {
      %c0_68 = arith.constant 0 : index
      %c0_69 = arith.constant 0 : index
      %c0_70 = arith.constant 0 : index
      %198 = vector.load %arg2[%c0_68, %c0_69, %c0_70] : memref<1x8x128xf32, #tpu.memory_space<vmem>>, vector<1x8x128xf32>
      %199 = vector.shape_cast %198 : vector<1x8x128xf32> to vector<8x128xf32>
      %c0_71 = arith.constant 0 : index
      %c0_72 = arith.constant 0 : index
      %c0_73 = arith.constant 0 : index
      %200 = vector.load %arg13[%c0_71, %c0_72, %c0_73] : memref<1x8x128xf32, #tpu.memory_space<vmem>>, vector<1x8x128xf32>
      %201 = vector.shape_cast %200 : vector<1x8x128xf32> to vector<8x128xf32>
      %202 = vector.shape_cast %199 : vector<8x128xf32> to vector<1x8x128xf32>
      tpu.vector_store %arg13[%c0_71, %c0_72, %c0_73], %202 {strides = array<i32>} : memref<1x8x128xf32, #tpu.memory_space<vmem>>, vector<1x8x128xf32>,
    } else {
    }
    %c0 = arith.constant 0 : index
    %c0_1 = arith.constant 0 : index
    %c0_2 = arith.constant 0 : index
    %3 = vector.load %arg13[%c0, %c0_1, %c0_2] : memref<1x8x128xf32, #tpu.memory_space<vmem>>, vector<1x8x128xf32>
    %4 = vector.shape_cast %3 : vector<1x8x128xf32> to vector<8x128xf32>
    %c0_3 = arith.constant 0 : index
    %c0_4 = arith.constant 0 : index
    %c0_5 = arith.constant 0 : index
    %5 = vector.load %arg3[%c0_3, %c0_4, %c0_5] : memref<1x8x128xf32, #tpu.memory_space<vmem>>, vector<1x8x128xf32>
    %6 = vector.shape_cast %5 : vector<1x8x128xf32> to vector<8x128xf32>
    %c0_6 = arith.constant 0 : index
    %c0_7 = arith.constant 0 : index
    %c0_8 = arith.constant 0 : index
    %7 = vector.load %arg11[%c0_6, %c0_7, %c0_8] : memref<1x16x384xf32, #tpu.memory_space<vmem>>, vector<1x16x384xf32>
    %8 = vector.shape_cast %7 : vector<1x16x384xf32> to vector<16x384xf32>
    %c0_9 = arith.constant 0 : index
    %c0_10 = arith.constant 0 : index
    %c0_11 = arith.constant 0 : index
    %9 = vector.load %arg4[%c0_9, %c0_10, %c0_11] : memref<1x128x384xbf16, #tpu.memory_space<vmem>>, vector<1x128x384xbf16>
    %10 = vector.shape_cast %9 : vector<1x128x384xbf16> to vector<128x384xbf16>
    %11 = vector.extract_strided_slice %8 {offsets = [0, 0], sizes = [1, 384], strides = [1, 1]} : vector<16x384xf32> to vector<1x384xf32>
    %c0_12 = arith.constant 0 : index
    %c0_13 = arith.constant 0 : index
    %c0_14 = arith.constant 0 : index
    %12 = vector.load %arg5[%c0_12, %c0_13, %c0_14] : memref<1x128x128xbf16, #tpu.memory_space<vmem>>, vector<1x128x128xbf16>
    %13 = vector.shape_cast %12 : vector<1x128x128xbf16> to vector<128x128xbf16>
    %14 = vector.extract_strided_slice %8 {offsets = [1, 0], sizes = [1, 128], strides = [1, 1]} : vector<16x384xf32> to vector<1x128xf32>
    %15 = arith.truncf %4 : vector<8x128xf32> to vector<8x128xbf16>
    %cst = arith.constant dense<0.000000e+00> : vector<8x384xf32>
    %16 = tpu.matmul %15, %10, %cst {dimension_numbers = #tpu.dot_dimension_numbers<[1], [0], [0], [1], [0, 0, 1, 1], [], []>} : vector<8x128xbf16>, vector<128x384xbf16>, vector<8x384xf32> -> vector<8x384xf32>
    %17 = vector.broadcast %11 : vector<1x384xf32> to vector<8x384xf32>
    %18 = arith.addf %16, %17 : vector<8x384xf32>
    %19 = vector.extract_strided_slice %18 {offsets = [0, 0], sizes = [8, 128], strides = [1, 1]} : vector<8x384xf32> to vector<8x128xf32>
    %cst_15 = arith.constant 2.500000e-01 : f32
    %20 = vector.broadcast %cst_15 : f32 to vector<8x128xf32>
    %21 = arith.mulf %19, %20 : vector<8x128xf32>
    %22 = vector.extract_strided_slice %18 {offsets = [0, 128], sizes = [8, 128], strides = [1, 1]} : vector<8x384xf32> to vector<8x128xf32>
    %23 = vector.extract_strided_slice %18 {offsets = [0, 256], sizes = [8, 128], strides = [1, 1]} : vector<8x384xf32> to vector<8x128xf32>
    %24 = vector.shape_cast %21 : vector<8x128xf32> to vector<8x8x16xf32>
    %25 = tpu.transpose %24, [1, 0, 2] : vector<8x8x16xf32> -> vector<8x8x16xf32>
    %26 = arith.truncf %25 : vector<8x8x16xf32> to vector<8x8x16xbf16>
    %27 = vector.shape_cast %22 : vector<8x128xf32> to vector<8x8x16xf32>
    %28 = tpu.transpose %27, [1, 0, 2] : vector<8x8x16xf32> -> vector<8x8x16xf32>
    %29 = arith.truncf %28 : vector<8x8x16xf32> to vector<8x8x16xbf16>
    %30 = vector.shape_cast %23 : vector<8x128xf32> to vector<8x8x16xf32>
    %31 = tpu.transpose %30, [1, 0, 2] : vector<8x8x16xf32> -> vector<8x8x16xf32>
    %32 = arith.truncf %31 : vector<8x8x16xf32> to vector<8x8x16xbf16>
    "tpu.trace_start"() <{level = 10 : i32, message = "hqd,hkd->hqk"}> : () -> ()
    %cst_16 = arith.constant dense<0.000000e+00> : vector<8x8x8xf32>
    %33 = tpu.matmul %26, %29, %cst_16 {dimension_numbers = #tpu.dot_dimension_numbers<[2], [2], [1], [1], [0, 0, 0, 1, 1, 1], [0], [0]>} : vector<8x8x16xbf16>, vector<8x8x16xbf16>, vector<8x8x8xf32> -> vector<8x8x8xf32>
    "tpu.trace_stop"() : () -> ()
    %cst_17 = arith.constant dense<0xFF800000> : vector<8x8xf32>
    %34 = vector.multi_reduction <maximumf>, %33, %cst_17 [2] : vector<8x8x8xf32> to vector<8x8xf32>
    %35 = vector.shape_cast %34 : vector<8x8xf32> to vector<8x8x1xf32>
    %36 = vector.broadcast %35 : vector<8x8x1xf32> to vector<8x8x8xf32>
    %37 = arith.subf %33, %36 : vector<8x8x8xf32>
    %38 = math.exp %37 : vector<8x8x8xf32>
    %cst_18 = arith.constant dense<0.000000e+00> : vector<8x8xf32>
    %39 = vector.multi_reduction <add>, %38, %cst_18 [2] : vector<8x8x8xf32> to vector<8x8xf32>
    %40 = vector.shape_cast %39 : vector<8x8xf32> to vector<8x8x1xf32>
    %41 = tpu.reciprocal %40 {approx = true} : vector<8x8x1xf32> -> vector<8x8x1xf32>
    %42 = vector.broadcast %41 : vector<8x8x1xf32> to vector<8x8x8xf32>
    %43 = arith.mulf %38, %42 : vector<8x8x8xf32>
    %44 = arith.truncf %43 : vector<8x8x8xf32> to vector<8x8x8xbf16>
    "tpu.trace_start"() <{level = 10 : i32, message = "hqk,hkd->hqd"}> : () -> ()
    %cst_19 = arith.constant dense<0.000000e+00> : vector<8x8x16xf32>
    %45 = tpu.matmul %44, %32, %cst_19 {dimension_numbers = #tpu.dot_dimension_numbers<[2], [1], [1], [2], [0, 0, 0, 1, 1, 2], [0], [0]>} : vector<8x8x8xbf16>, vector<8x8x16xbf16>, vector<8x8x16xf32> -> vector<8x8x16xf32>
    "tpu.trace_stop"() : () -> ()
    %46 = tpu.transpose %45, [1, 0, 2] : vector<8x8x16xf32> -> vector<8x8x16xf32>
    %47 = vector.shape_cast %46 : vector<8x8x16xf32> to vector<8x128xf32>
    %48 = arith.truncf %47 : vector<8x128xf32> to vector<8x128xbf16>
    %cst_20 = arith.constant dense<0.000000e+00> : vector<8x128xf32>
    %49 = tpu.matmul %48, %13, %cst_20 {dimension_numbers = #tpu.dot_dimension_numbers<[1], [0], [0], [1], [0, 0, 1, 1], [], []>} : vector<8x128xbf16>, vector<128x128xbf16>, vector<8x128xf32> -> vector<8x128xf32>
    %50 = vector.broadcast %14 : vector<1x128xf32> to vector<8x128xf32>
    %51 = arith.addf %49, %50 : vector<8x128xf32>
    %52 = vector.extract_strided_slice %8 {offsets = [2, 0], sizes = [1, 128], strides = [1, 1]} : vector<16x384xf32> to vector<1x128xf32>
    %53 = vector.extract_strided_slice %8 {offsets = [3, 0], sizes = [1, 128], strides = [1, 1]} : vector<16x384xf32> to vector<1x128xf32>
    %54 = arith.addf %4, %51 : vector<8x128xf32>
    %cst_21 = arith.constant dense<0.000000e+00> : vector<8xf32>
    %55 = vector.multi_reduction <add>, %54, %cst_21 [1] : vector<8x128xf32> to vector<8xf32>
    %56 = vector.shape_cast %55 : vector<8xf32> to vector<8x1xf32>
    %cst_22 = arith.constant 1.280000e+02 : f32
    %57 = vector.broadcast %cst_22 : f32 to vector<8x1xf32>
    %58 = arith.divf %56, %57 : vector<8x1xf32>
    %59 = vector.broadcast %58 : vector<8x1xf32> to vector<8x128xf32>
    %60 = arith.subf %54, %59 : vector<8x128xf32>
    %61 = arith.mulf %60, %60 : vector<8x128xf32>
    %cst_23 = arith.constant dense<0.000000e+00> : vector<8xf32>
    %62 = vector.multi_reduction <add>, %61, %cst_23 [1] : vector<8x128xf32> to vector<8xf32>
    %63 = vector.shape_cast %62 : vector<8xf32> to vector<8x1xf32>
    %cst_24 = arith.constant 1.280000e+02 : f32
    %64 = vector.broadcast %cst_24 : f32 to vector<8x1xf32>
    %65 = arith.divf %63, %64 : vector<8x1xf32>
    %cst_25 = arith.constant 9.99999974E-6 : f32
    %66 = vector.broadcast %cst_25 : f32 to vector<8x1xf32>
    %67 = arith.addf %65, %66 : vector<8x1xf32>
    %68 = math.rsqrt %67 : vector<8x1xf32>
    %69 = vector.broadcast %68 : vector<8x1xf32> to vector<8x128xf32>
    %70 = arith.mulf %60, %69 : vector<8x128xf32>
    %71 = vector.broadcast %52 : vector<1x128xf32> to vector<8x128xf32>
    %72 = arith.mulf %70, %71 : vector<8x128xf32>
    %73 = vector.broadcast %53 : vector<1x128xf32> to vector<8x128xf32>
    %74 = arith.addf %72, %73 : vector<8x128xf32>
    %c0_26 = arith.constant 0 : index
    %c0_27 = arith.constant 0 : index
    %c0_28 = arith.constant 0 : index
    %75 = vector.load %arg6[%c0_26, %c0_27, %c0_28] : memref<1x128x128xbf16, #tpu.memory_space<vmem>>, vector<1x128x128xbf16>
    %76 = vector.shape_cast %75 : vector<1x128x128xbf16> to vector<128x128xbf16>
    %77 = vector.extract_strided_slice %8 {offsets = [4, 0], sizes = [1, 128], strides = [1, 1]} : vector<16x384xf32> to vector<1x128xf32>
    %c0_29 = arith.constant 0 : index
    %c0_30 = arith.constant 0 : index
    %c0_31 = arith.constant 0 : index
    %78 = vector.load %arg7[%c0_29, %c0_30, %c0_31] : memref<1x128x256xbf16, #tpu.memory_space<vmem>>, vector<1x128x256xbf16>
    %79 = vector.shape_cast %78 : vector<1x128x256xbf16> to vector<128x256xbf16>
    %80 = vector.extract_strided_slice %8 {offsets = [5, 0], sizes = [1, 256], strides = [1, 1]} : vector<16x384xf32> to vector<1x256xf32>
    %c0_32 = arith.constant 0 : index
    %c0_33 = arith.constant 0 : index
    %c0_34 = arith.constant 0 : index
    %81 = vector.load %arg8[%c0_32, %c0_33, %c0_34] : memref<1x128x128xbf16, #tpu.memory_space<vmem>>, vector<1x128x128xbf16>
    %82 = vector.shape_cast %81 : vector<1x128x128xbf16> to vector<128x128xbf16>
    %83 = vector.extract_strided_slice %8 {offsets = [6, 0], sizes = [1, 128], strides = [1, 1]} : vector<16x384xf32> to vector<1x128xf32>
    %84 = arith.truncf %74 : vector<8x128xf32> to vector<8x128xbf16>
    %cst_35 = arith.constant dense<0.000000e+00> : vector<8x128xf32>
    %85 = tpu.matmul %84, %76, %cst_35 {dimension_numbers = #tpu.dot_dimension_numbers<[1], [0], [0], [1], [0, 0, 1, 1], [], []>} : vector<8x128xbf16>, vector<128x128xbf16>, vector<8x128xf32> -> vector<8x128xf32>
    %86 = vector.broadcast %77 : vector<1x128xf32> to vector<8x128xf32>
    %87 = arith.addf %85, %86 : vector<8x128xf32>
    %cst_36 = arith.constant 2.500000e-01 : f32
    %88 = vector.broadcast %cst_36 : f32 to vector<8x128xf32>
    %89 = arith.mulf %87, %88 : vector<8x128xf32>
    %90 = arith.truncf %6 : vector<8x128xf32> to vector<8x128xbf16>
    %cst_37 = arith.constant dense<0.000000e+00> : vector<8x256xf32>
    %91 = tpu.matmul %90, %79, %cst_37 {dimension_numbers = #tpu.dot_dimension_numbers<[1], [0], [0], [1], [0, 0, 1, 1], [], []>} : vector<8x128xbf16>, vector<128x256xbf16>, vector<8x256xf32> -> vector<8x256xf32>
    %92 = vector.broadcast %80 : vector<1x256xf32> to vector<8x256xf32>
    %93 = arith.addf %91, %92 : vector<8x256xf32>
    %94 = vector.extract_strided_slice %93 {offsets = [0, 0], sizes = [8, 128], strides = [1, 1]} : vector<8x256xf32> to vector<8x128xf32>
    %95 = vector.extract_strided_slice %93 {offsets = [0, 128], sizes = [8, 128], strides = [1, 1]} : vector<8x256xf32> to vector<8x128xf32>
    %96 = vector.shape_cast %89 : vector<8x128xf32> to vector<8x8x16xf32>
    %97 = tpu.transpose %96, [1, 0, 2] : vector<8x8x16xf32> -> vector<8x8x16xf32>
    %98 = arith.truncf %97 : vector<8x8x16xf32> to vector<8x8x16xbf16>
    %99 = vector.shape_cast %94 : vector<8x128xf32> to vector<8x8x16xf32>
    %100 = tpu.transpose %99, [1, 0, 2] : vector<8x8x16xf32> -> vector<8x8x16xf32>
    %101 = arith.truncf %100 : vector<8x8x16xf32> to vector<8x8x16xbf16>
    %102 = vector.shape_cast %95 : vector<8x128xf32> to vector<8x8x16xf32>
    %103 = tpu.transpose %102, [1, 0, 2] : vector<8x8x16xf32> -> vector<8x8x16xf32>
    %104 = arith.truncf %103 : vector<8x8x16xf32> to vector<8x8x16xbf16>
    "tpu.trace_start"() <{level = 10 : i32, message = "hqd,hkd->hqk"}> : () -> ()
    %cst_38 = arith.constant dense<0.000000e+00> : vector<8x8x8xf32>
    %105 = tpu.matmul %98, %101, %cst_38 {dimension_numbers = #tpu.dot_dimension_numbers<[2], [2], [1], [1], [0, 0, 0, 1, 1, 1], [0], [0]>} : vector<8x8x16xbf16>, vector<8x8x16xbf16>, vector<8x8x8xf32> -> vector<8x8x8xf32>
    "tpu.trace_stop"() : () -> ()
    %cst_39 = arith.constant dense<0xFF800000> : vector<8x8xf32>
    %106 = vector.multi_reduction <maximumf>, %105, %cst_39 [2] : vector<8x8x8xf32> to vector<8x8xf32>
    %107 = vector.shape_cast %106 : vector<8x8xf32> to vector<8x8x1xf32>
    %108 = vector.broadcast %107 : vector<8x8x1xf32> to vector<8x8x8xf32>
    %109 = arith.subf %105, %108 : vector<8x8x8xf32>
    %110 = math.exp %109 : vector<8x8x8xf32>
    %cst_40 = arith.constant dense<0.000000e+00> : vector<8x8xf32>
    %111 = vector.multi_reduction <add>, %110, %cst_40 [2] : vector<8x8x8xf32> to vector<8x8xf32>
    %112 = vector.shape_cast %111 : vector<8x8xf32> to vector<8x8x1xf32>
    %113 = tpu.reciprocal %112 {approx = true} : vector<8x8x1xf32> -> vector<8x8x1xf32>
    %114 = vector.broadcast %113 : vector<8x8x1xf32> to vector<8x8x8xf32>
    %115 = arith.mulf %110, %114 : vector<8x8x8xf32>
    %116 = arith.truncf %115 : vector<8x8x8xf32> to vector<8x8x8xbf16>
    "tpu.trace_start"() <{level = 10 : i32, message = "hqk,hkd->hqd"}> : () -> ()
    %cst_41 = arith.constant dense<0.000000e+00> : vector<8x8x16xf32>
    %117 = tpu.matmul %116, %104, %cst_41 {dimension_numbers = #tpu.dot_dimension_numbers<[2], [1], [1], [2], [0, 0, 0, 1, 1, 2], [0], [0]>} : vector<8x8x8xbf16>, vector<8x8x16xbf16>, vector<8x8x16xf32> -> vector<8x8x16xf32>
    "tpu.trace_stop"() : () -> ()
    %118 = tpu.transpose %117, [1, 0, 2] : vector<8x8x16xf32> -> vector<8x8x16xf32>
    %119 = vector.shape_cast %118 : vector<8x8x16xf32> to vector<8x128xf32>
    %120 = arith.truncf %119 : vector<8x128xf32> to vector<8x128xbf16>
    %cst_42 = arith.constant dense<0.000000e+00> : vector<8x128xf32>
    %121 = tpu.matmul %120, %82, %cst_42 {dimension_numbers = #tpu.dot_dimension_numbers<[1], [0], [0], [1], [0, 0, 1, 1], [], []>} : vector<8x128xbf16>, vector<128x128xbf16>, vector<8x128xf32> -> vector<8x128xf32>
    %122 = vector.broadcast %83 : vector<1x128xf32> to vector<8x128xf32>
    %123 = arith.addf %121, %122 : vector<8x128xf32>
    %124 = vector.extract_strided_slice %8 {offsets = [7, 0], sizes = [1, 128], strides = [1, 1]} : vector<16x384xf32> to vector<1x128xf32>
    %125 = vector.extract_strided_slice %8 {offsets = [8, 0], sizes = [1, 128], strides = [1, 1]} : vector<16x384xf32> to vector<1x128xf32>
    %126 = arith.addf %74, %123 : vector<8x128xf32>
    %cst_43 = arith.constant dense<0.000000e+00> : vector<8xf32>
    %127 = vector.multi_reduction <add>, %126, %cst_43 [1] : vector<8x128xf32> to vector<8xf32>
    %128 = vector.shape_cast %127 : vector<8xf32> to vector<8x1xf32>
    %cst_44 = arith.constant 1.280000e+02 : f32
    %129 = vector.broadcast %cst_44 : f32 to vector<8x1xf32>
    %130 = arith.divf %128, %129 : vector<8x1xf32>
    %131 = vector.broadcast %130 : vector<8x1xf32> to vector<8x128xf32>
    %132 = arith.subf %126, %131 : vector<8x128xf32>
    %133 = arith.mulf %132, %132 : vector<8x128xf32>
    %cst_45 = arith.constant dense<0.000000e+00> : vector<8xf32>
    %134 = vector.multi_reduction <add>, %133, %cst_45 [1] : vector<8x128xf32> to vector<8xf32>
    %135 = vector.shape_cast %134 : vector<8xf32> to vector<8x1xf32>
    %cst_46 = arith.constant 1.280000e+02 : f32
    %136 = vector.broadcast %cst_46 : f32 to vector<8x1xf32>
    %137 = arith.divf %135, %136 : vector<8x1xf32>
    %cst_47 = arith.constant 9.99999974E-6 : f32
    %138 = vector.broadcast %cst_47 : f32 to vector<8x1xf32>
    %139 = arith.addf %137, %138 : vector<8x1xf32>
    %140 = math.rsqrt %139 : vector<8x1xf32>
    %141 = vector.broadcast %140 : vector<8x1xf32> to vector<8x128xf32>
    %142 = arith.mulf %132, %141 : vector<8x128xf32>
    %143 = vector.broadcast %124 : vector<1x128xf32> to vector<8x128xf32>
    %144 = arith.mulf %142, %143 : vector<8x128xf32>
    %145 = vector.broadcast %125 : vector<1x128xf32> to vector<8x128xf32>
    %146 = arith.addf %144, %145 : vector<8x128xf32>
    %c0_48 = arith.constant 0 : index
    %c0_49 = arith.constant 0 : index
    %c0_50 = arith.constant 0 : index
    %147 = vector.load %arg9[%c0_48, %c0_49, %c0_50] : memref<1x128x256xbf16, #tpu.memory_space<vmem>>, vector<1x128x256xbf16>
    %148 = vector.shape_cast %147 : vector<1x128x256xbf16> to vector<128x256xbf16>
    %149 = arith.truncf %146 : vector<8x128xf32> to vector<8x128xbf16>
    %cst_51 = arith.constant dense<0.000000e+00> : vector<8x256xf32>
    %150 = tpu.matmul %149, %148, %cst_51 {dimension_numbers = #tpu.dot_dimension_numbers<[1], [0], [0], [1], [0, 0, 1, 1], [], []>} : vector<8x128xbf16>, vector<128x256xbf16>, vector<8x256xf32> -> vector<8x256xf32>
    %151 = vector.extract_strided_slice %8 {offsets = [9, 0], sizes = [1, 256], strides = [1, 1]} : vector<16x384xf32> to vector<1x256xf32>
    %152 = vector.broadcast %151 : vector<1x256xf32> to vector<8x256xf32>
    %153 = arith.addf %150, %152 : vector<8x256xf32>
    %cst_52 = arith.constant 5.000000e-01 : f32
    %154 = vector.broadcast %cst_52 : f32 to vector<8x256xf32>
    %155 = arith.mulf %154, %153 : vector<8x256xf32>
    %cst_53 = arith.constant 0.707106769 : f32
    %156 = vector.broadcast %cst_53 : f32 to vector<8x256xf32>
    %157 = arith.mulf %153, %156 : vector<8x256xf32>
    %158 = math.erf %157 : vector<8x256xf32>
    %cst_54 = arith.constant 1.000000e+00 : f32
    %159 = vector.broadcast %cst_54 : f32 to vector<8x256xf32>
    %160 = arith.addf %159, %158 : vector<8x256xf32>
    %161 = arith.mulf %155, %160 : vector<8x256xf32>
    %c0_55 = arith.constant 0 : index
    %c0_56 = arith.constant 0 : index
    %c0_57 = arith.constant 0 : index
    %162 = vector.load %arg10[%c0_55, %c0_56, %c0_57] : memref<1x256x128xbf16, #tpu.memory_space<vmem>>, vector<1x256x128xbf16>
    %163 = vector.shape_cast %162 : vector<1x256x128xbf16> to vector<256x128xbf16>
    %164 = arith.truncf %161 : vector<8x256xf32> to vector<8x256xbf16>
    %cst_58 = arith.constant dense<0.000000e+00> : vector<8x128xf32>
    %165 = tpu.matmul %164, %163, %cst_58 {dimension_numbers = #tpu.dot_dimension_numbers<[1], [0], [0], [1], [0, 0, 1, 1], [], []>} : vector<8x256xbf16>, vector<256x128xbf16>, vector<8x128xf32> -> vector<8x128xf32>
    %166 = vector.extract_strided_slice %8 {offsets = [10, 0], sizes = [1, 128], strides = [1, 1]} : vector<16x384xf32> to vector<1x128xf32>
    %167 = vector.broadcast %166 : vector<1x128xf32> to vector<8x128xf32>
    %168 = arith.addf %165, %167 : vector<8x128xf32>
    %169 = vector.extract_strided_slice %8 {offsets = [11, 0], sizes = [1, 128], strides = [1, 1]} : vector<16x384xf32> to vector<1x128xf32>
    %170 = vector.extract_strided_slice %8 {offsets = [12, 0], sizes = [1, 128], strides = [1, 1]} : vector<16x384xf32> to vector<1x128xf32>
    %171 = arith.addf %146, %168 : vector<8x128xf32>
    %cst_59 = arith.constant dense<0.000000e+00> : vector<8xf32>
    %172 = vector.multi_reduction <add>, %171, %cst_59 [1] : vector<8x128xf32> to vector<8xf32>
    %173 = vector.shape_cast %172 : vector<8xf32> to vector<8x1xf32>
    %cst_60 = arith.constant 1.280000e+02 : f32
    %174 = vector.broadcast %cst_60 : f32 to vector<8x1xf32>
    %175 = arith.divf %173, %174 : vector<8x1xf32>
    %176 = vector.broadcast %175 : vector<8x1xf32> to vector<8x128xf32>
    %177 = arith.subf %171, %176 : vector<8x128xf32>
    %178 = arith.mulf %177, %177 : vector<8x128xf32>
    %cst_61 = arith.constant dense<0.000000e+00> : vector<8xf32>
    %179 = vector.multi_reduction <add>, %178, %cst_61 [1] : vector<8x128xf32> to vector<8xf32>
    %180 = vector.shape_cast %179 : vector<8xf32> to vector<8x1xf32>
    %cst_62 = arith.constant 1.280000e+02 : f32
    %181 = vector.broadcast %cst_62 : f32 to vector<8x1xf32>
    %182 = arith.divf %180, %181 : vector<8x1xf32>
    %cst_63 = arith.constant 9.99999974E-6 : f32
    %183 = vector.broadcast %cst_63 : f32 to vector<8x1xf32>
    %184 = arith.addf %182, %183 : vector<8x1xf32>
    %185 = math.rsqrt %184 : vector<8x1xf32>
    %186 = vector.broadcast %185 : vector<8x1xf32> to vector<8x128xf32>
    %187 = arith.mulf %177, %186 : vector<8x128xf32>
    %188 = vector.broadcast %169 : vector<1x128xf32> to vector<8x128xf32>
    %189 = arith.mulf %187, %188 : vector<8x128xf32>
    %190 = vector.broadcast %170 : vector<1x128xf32> to vector<8x128xf32>
    %191 = arith.addf %189, %190 : vector<8x128xf32>
    %c0_64 = arith.constant 0 : index
    %c0_65 = arith.constant 0 : index
    %c0_66 = arith.constant 0 : index
    %192 = vector.load %arg13[%c0_64, %c0_65, %c0_66] : memref<1x8x128xf32, #tpu.memory_space<vmem>>, vector<1x8x128xf32>
    %193 = vector.shape_cast %192 : vector<1x8x128xf32> to vector<8x128xf32>
    %194 = vector.shape_cast %191 : vector<8x128xf32> to vector<1x8x128xf32>
    tpu.vector_store %arg13[%c0_64, %c0_65, %c0_66], %194 {strides = array<i32>} : memref<1x8x128xf32, #tpu.memory_space<vmem>>, vector<1x8x128xf32>,
    %c3_i32 = arith.constant 3 : i32
    %195 = arith.cmpi eq, %arg1, %c3_i32 : i32
    %196 = arith.extui %195 : i1 to i32
    %c0_i32_67 = arith.constant 0 : i32
    %197 = arith.cmpi ne, %196, %c0_i32_67 : i32
    scf.if %197 {
      %c0_68 = arith.constant 0 : index
      %c0_69 = arith.constant 0 : index
      %198 = vector.load %arg12[%c0_68, %c0_69] : memref<2x128xf32, #tpu.memory_space<vmem>>, vector<1x128xf32>
      %c1 = arith.constant 1 : index
      %c0_70 = arith.constant 0 : index
      %199 = vector.load %arg12[%c1, %c0_70] : memref<2x128xf32, #tpu.memory_space<vmem>>, vector<1x128xf32>
      %cst_71 = arith.constant dense<0.000000e+00> : vector<8xf32>
      %200 = vector.multi_reduction <add>, %191, %cst_71 [1] : vector<8x128xf32> to vector<8xf32>
      %201 = vector.shape_cast %200 : vector<8xf32> to vector<8x1xf32>
      %cst_72 = arith.constant 1.280000e+02 : f32
      %202 = vector.broadcast %cst_72 : f32 to vector<8x1xf32>
      %203 = arith.divf %201, %202 : vector<8x1xf32>
      %204 = vector.broadcast %203 : vector<8x1xf32> to vector<8x128xf32>
      %205 = arith.subf %191, %204 : vector<8x128xf32>
      %206 = arith.mulf %205, %205 : vector<8x128xf32>
      %cst_73 = arith.constant dense<0.000000e+00> : vector<8xf32>
      %207 = vector.multi_reduction <add>, %206, %cst_73 [1] : vector<8x128xf32> to vector<8xf32>
      %208 = vector.shape_cast %207 : vector<8xf32> to vector<8x1xf32>
      %cst_74 = arith.constant 1.280000e+02 : f32
      %209 = vector.broadcast %cst_74 : f32 to vector<8x1xf32>
      %210 = arith.divf %208, %209 : vector<8x1xf32>
      %cst_75 = arith.constant 9.99999974E-6 : f32
      %211 = vector.broadcast %cst_75 : f32 to vector<8x1xf32>
      %212 = arith.addf %210, %211 : vector<8x1xf32>
      %213 = math.rsqrt %212 : vector<8x1xf32>
      %214 = vector.broadcast %213 : vector<8x1xf32> to vector<8x128xf32>
      %215 = arith.mulf %205, %214 : vector<8x128xf32>
      %216 = vector.broadcast %198 : vector<1x128xf32> to vector<8x128xf32>
      %217 = arith.mulf %215, %216 : vector<8x128xf32>
      %218 = vector.broadcast %199 : vector<1x128xf32> to vector<8x128xf32>
      %219 = arith.addf %217, %218 : vector<8x128xf32>
      %c0_76 = arith.constant 0 : index
      %c0_77 = arith.constant 0 : index
      %c0_78 = arith.constant 0 : index
      %220 = vector.load %arg13[%c0_76, %c0_77, %c0_78] : memref<1x8x128xf32, #tpu.memory_space<vmem>>, vector<1x8x128xf32>
      %221 = vector.shape_cast %220 : vector<1x8x128xf32> to vector<8x128xf32>
      %222 = vector.shape_cast %219 : vector<8x128xf32> to vector<1x8x128xf32>
      tpu.vector_store %arg13[%c0_76, %c0_77, %c0_78], %222 {strides = array<i32>} : memref<1x8x128xf32, #tpu.memory_space<vmem>>, vector<1x8x128xf32>,
    } else {
    }
    return
  }
  func.func @transform_0(%arg0: i32, %arg1: i32) -> (i32, i32, i32) {
    %c0_i32 = arith.constant 0 : i32
    %c0_i32_0 = arith.constant 0 : i32
    %c0_i32_1 = arith.constant 0 : i32
    return %arg0, %c0_i32, %c0_i32_0 : i32, i32, i32
  }
  func.func @transform_1(%arg0: i32, %arg1: i32) -> (i32, i32, i32) {
    %c0_i32 = arith.constant 0 : i32
    %c0_i32_0 = arith.constant 0 : i32
    %c0_i32_1 = arith.constant 0 : i32
    return %arg0, %c0_i32, %c0_i32_0 : i32, i32, i32
  }
  func.func @transform_2(%arg0: i32, %arg1: i32) -> (i32, i32, i32) {
    %c0_i32 = arith.constant 0 : i32
    %c0_i32_0 = arith.constant 0 : i32
    %c0_i32_1 = arith.constant 0 : i32
    return %arg1, %c0_i32, %c0_i32_0 : i32, i32, i32
  }
  func.func @transform_3(%arg0: i32, %arg1: i32) -> (i32, i32, i32) {
    %c0_i32 = arith.constant 0 : i32
    %c0_i32_0 = arith.constant 0 : i32
    %c0_i32_1 = arith.constant 0 : i32
    return %arg1, %c0_i32, %c0_i32_0 : i32, i32, i32
  }
  func.func @transform_4(%arg0: i32, %arg1: i32) -> (i32, i32, i32) {
    %c0_i32 = arith.constant 0 : i32
    %c0_i32_0 = arith.constant 0 : i32
    %c0_i32_1 = arith.constant 0 : i32
    return %arg1, %c0_i32, %c0_i32_0 : i32, i32, i32
  }
  func.func @transform_5(%arg0: i32, %arg1: i32) -> (i32, i32, i32) {
    %c0_i32 = arith.constant 0 : i32
    %c0_i32_0 = arith.constant 0 : i32
    %c0_i32_1 = arith.constant 0 : i32
    return %arg1, %c0_i32, %c0_i32_0 : i32, i32, i32
  }
  func.func @transform_6(%arg0: i32, %arg1: i32) -> (i32, i32, i32) {
    %c0_i32 = arith.constant 0 : i32
    %c0_i32_0 = arith.constant 0 : i32
    %c0_i32_1 = arith.constant 0 : i32
    return %arg1, %c0_i32, %c0_i32_0 : i32, i32, i32
  }
  func.func @transform_7(%arg0: i32, %arg1: i32) -> (i32, i32, i32) {
    %c0_i32 = arith.constant 0 : i32
    %c0_i32_0 = arith.constant 0 : i32
    %c0_i32_1 = arith.constant 0 : i32
    return %arg1, %c0_i32, %c0_i32_0 : i32, i32, i32
  }
  func.func @transform_8(%arg0: i32, %arg1: i32) -> (i32, i32, i32) {
    %c0_i32 = arith.constant 0 : i32
    %c0_i32_0 = arith.constant 0 : i32
    %c0_i32_1 = arith.constant 0 : i32
    return %arg1, %c0_i32, %c0_i32_0 : i32, i32, i32
  }
  func.func @transform_9(%arg0: i32, %arg1: i32) -> (i32, i32, i32) {
    %c0_i32 = arith.constant 0 : i32
    %c0_i32_0 = arith.constant 0 : i32
    %c0_i32_1 = arith.constant 0 : i32
    return %arg1, %c0_i32, %c0_i32_0 : i32, i32, i32
  }
  func.func @transform_10(%arg0: i32, %arg1: i32) -> (i32, i32) {
    %c0_i32 = arith.constant 0 : i32
    %c0_i32_0 = arith.constant 0 : i32
    %c0_i32_1 = arith.constant 0 : i32
    return %c0_i32, %c0_i32_0 : i32, i32
  }
  func.func @transform_11(%arg0: i32, %arg1: i32) -> (i32, i32, i32) {
    %c0_i32 = arith.constant 0 : i32
    %c0_i32_0 = arith.constant 0 : i32
    %c0_i32_1 = arith.constant 0 : i32
    return %arg0, %c0_i32, %c0_i32_0 : i32, i32, i32
  }
}

</mosaic_0001>

<bundles_post_ra>
// kernel: transformer_adapter_forward.2
= control target key start
LH: loop header
LB: loop body
LE: loop exit
PB: predicated region body
PF: predicated region fallthrough
CT: control target
= control target key end

     0   :  { %s5156_s0 = inlined_call_operand.vmem [shape: f32[2,8,128], index: 0, kind: input, shape index: {}]   ;;  %s5157_s1 = inlined_call_operand.hbm [shape: bf16[4,128,384], index: 1, kind: input, shape index: {}]   ;;  %s5158_s2 = inlined_call_operand.hbm [shape: bf16[4,128,128], index: 2, kind: input, shape index: {}]   ;;  %s5159_s3 = inlined_call_operand.hbm [shape: bf16[4,128,256], index: 3, kind: input, shape index: {}]   ;;  %s5160_s4 = inlined_call_operand.hbm [shape: bf16[4,256,128], index: 4, kind: input, shape index: {}]   ;;  %s5161_s5 = inlined_call_operand.hbm [shape: f32[4,8,384], index: 5, kind: input, shape index: {}]   ;;  %s5162_s6 = inlined_call_operand.vmem [shape: f32[2,128], index: 6, kind: input, shape index: {}]   ;;  %s5163_s7 = inlined_call_operand.vmem [shape: f32[2,8,128], index: 7, kind: output, shape index: {}]  }
   0x1   :  { %5174 = sst [smem:[#allocation19_spill]] %s5158_s2 }
   0x2   :  { %5175 = sst [smem:[#allocation20_spill]] %s5160_s4 }
   0x3   :  { %5176 = sst [smem:[#allocation21_spill]] %s5162_s6 }
   0x4   :  { %12 = vsyncpa [#allocation3], 0 }
   0x5   :  { %14 = vsyncpa [#allocation3 + $0x1], 0 }
   0x6   :  { %15 = vsyncpa [#allocation5], 0 }
   0x7   :  { %17 = vsyncpa [#allocation5 + $0x1], 0 }
   0x8   :  { %18 = vsyncpa [#allocation8], 0 }
   0x9   :  { %20 = vsyncpa [#allocation8 + $0x1], 0  ;;  %s4364_s24 = smov 0   ;;  %s4366_s25 = smov 0  }
   0xa   :  { %s4368_s26 = smov 0   ;;  %s4370_s27 = smov 0  }
   0xb   :  { %s4372_s28 = smov 0   ;;  %s4374_s29 = smov 0  }
   0xc   :  { %s4376_s30 = smov 0   ;;  %s4378_s8 = smov 0  }
   0xd LB: > { %5177 = sst [smem:[#allocation13_spill]] %s4279_s26  ;;  %s5164_s9 = sadd.s32 4294967295, %s4299_s8   ;;  %s4299_s8 = sphi %s4378_s8, %s26_s8   ;;  %s4295_s30 = sphi %s4376_s30, %s5209_s30   ;;  %s4291_s29 = sphi %s4374_s29, %s5208_s29   ;;  %s4287_s28 = sphi %s4372_s28, %s5202_s28   ;;  %s4283_s27 = sphi %s4370_s27, %s5207_s27   ;;  %s4279_s26 = sphi %s4368_s26, %s5201_s26   ;;  %s4275_s25 = sphi %s4366_s25, %s5206_s25   ;;  %s4271_s24 = sphi %s4364_s24, %s5205_s24  }
   0xe   : > { %5178 = sst [smem:[#allocation14_spill]] %s4283_s27  ;;  %s35_s10 = sadd.s32 1, %s4291_s29 }
   0xf   : > { %5179 = sst [smem:[#allocation15_spill]] %s4295_s30  ;;  %p36_p0 = scmp.ge.s32.totalorder %s35_s10, 4 }
  0x10   : > { %s38_s11 = sadd.s32 1, %s4295_s30  ;;  %s71_s12 = sadd.s32 1, %s4279_s26 }
  0x11   : > { %p78_p1 = scmp.ne.s32.totalorder %s4279_s26, %s4275_s25  ;;  %s5211_s10 = smov (%p36_p0, %s35_s10), 0 }
  0x12   : > { %5180 = sst [smem:[#allocation16_spill]] %s5211_s10  ;;  %s5213_s11 = smov (!%p36_p0, %s38_s11), %s4295_s30 }
  0x13   : > { %s68_s13 = ssub.s32 %s4291_s29, %s5211_s10  ;;  %p79_p2 = scmp.eq.s32.totalorder %s4299_s8, 0 }
  0x14   : > { %p40_p3 = scmp.ge.s32.totalorder %s5213_s11, 2  ;;  %p69_p4 = scmp.eq.s32.totalorder %s68_s13, 0 }
  0x15   : > { %p80_p5 = por %p79_p2, %p78_p1  ;;  %p84_p6 = scmp.ne.s32.totalorder %s4275_s25, %s4271_s24 }
  0x16   : > { %s5215_s11 = smov (%p40_p3, %s5213_s11), 0  ;;  %p85_p7 = scmp.eq.s32.totalorder %s5164_s9, 0 }
  0x17   : > { %5181 = sst [smem:[#allocation17_spill]] %s5215_s11  ;;  %p3867_p8 = scmp.lt.s32.totalorder %s4299_s8, 8 }
  0x18   : > { %s4418_s14 = scalar_select %p69_p4, %s4279_s26, %s71_s12  }
  0x19   : > { %s4424_s15 = sand.u32 1, %s4279_s26   ;;  %p4426_p9 = por %p85_p7, %p84_p6 }
  0x1a   : > { %5182 = sst [smem:[#allocation18_spill]] %s4418_s14  ;;  %s5165_s17 = sand.u32 1, %s4299_s8  }
  0x1b   : > { %s5183_s16 = scalar_select %p4426_p9, 1, 0 }
  0x1c   : > { %p4431_p10 = pnand %p3867_p8, %p80_p5  ;;  %s3490_s19 = sshll.u32 %s4424_s15, 6 }
  0x1d   : > { %s3624_s20 = sshll.u32 %s4291_s29, 10  ;;  %s5185_s2 = sld [smem:[#allocation19_spill]] }
  0x1e   : > { %s5184_s18 = scalar_select %p4431_p10, 1, 0 }
  0x1f   : > { %s294_s24 = scalar_lea.vmem [#allocation4], %s3490_s19  ;;  %s4447_s13 = scalar_lea.sflag [#allocation5], %s5165_s17 }
  0x20   : > { %s301_s12 = sshll.u32 %s294_s24, 4  ;;  %p4453_p13 = pneg %p4431_p10  ;;  %s4442_s12 = int_to_ptr.vmem [resolvable:$true] %s301_s12 }
  0x23   : > { %s4440_s23 = scalar_lea.hbm %s5185_s2, %s3624_s20  ;;  %s4080_s21 = scalar_lea.hbm %s5185_s2, 4096 }
  0x24   : > { %s4075_s9 = scalar_lea.hbm %s4440_s23, 1024  ;;  %p4081_p2 = scmp.lt.u32.totalorder %s4440_s23, %s5185_s2 }
  0x25   : > { %p4076_p12 = scmp.ne.s32.totalorder %s4440_s23, %s4075_s9  ;;  %p4082_p3 = scmp.lt.u32.totalorder %s4080_s21, %s4075_s9 }
  0x26   : > { %p4084_p5 = scmp.lt.u32.totalorder %s4075_s9, %s4440_s23 }
  0x27   : > { %p4078_p0 = pnand %p4453_p13, %p4076_p12  ;;  %p4083_p4 = por %p4082_p3, %p4081_p2 }
  0x29   : > { %p4079_p1 = pneg %p4078_p0  ;;  %p4085_p6 = por %p4084_p5, %p4083_p4 }
  0x2b   : > { %p4086_p7 = pnand %p4085_p6, %p4079_p1 }
  0x2d   : > { %4089 = shalt.err (!%p4086_p7)
}
  0x2e   : > { %s4090_s17 = scalar_lea.vmem %s4442_s12, 1024  ;;  %s4301_s20 = smov [#allocation4]  }
  0x2f   : > { %p4091_p8 = scmp.ne.s32.totalorder %s4442_s12, %s4090_s17  ;;  %s4095_s19 = sshll.u32 %s4301_s20, 4  ;;  %s4096_s19 = int_to_ptr.vmem [resolvable:$false] %s4095_s19 }
  0x30   : > { %s4097_s22 = scalar_lea.vmem %s4096_s19, 2048  ;;  %p4098_p11 = scmp.lt.s32.totalorder %s4442_s12, %s4096_s19 }
  0x31   : > { %p4093_p12 = pnand %p4091_p8, %p4453_p13  ;;  %p4099_p9 = scmp.lt.s32.totalorder %s4097_s22, %s4090_s17 }
  0x33   : > { %p4094_p0 = pneg %p4093_p12  ;;  %p4100_p2 = por %p4099_p9, %p4098_p11 }
  0x35   : > { %p4101_p3 = pnand %p4100_p2, %p4094_p0 }
  0x37   : > { %4104 = shalt.err (!%p4101_p3)
}
  0x38   : > { %s5169_s9 = smov 64   ;;  %s5170_s21 = smov 4  }
  0x39   : > { %3857 = dma.hbm_to_vmem [thread:$0]  (!%p4431_p10), %s4440_s23, 1024, %s4442_s12, %s4447_s13, %s5169_s9, %s5169_s9, %s5170_s21  }
  0x3a   : > { %p370_p9 = scmp.lt.s32.totalorder %s4299_s8, 9  ;;  %s3493_s17 = sshll.u32 %s4424_s15, 7 }
  0x3b   : > { %s3625_s24 = sshll.u32 %s4291_s29, 11  ;;  %p5187_p11 = scmp.ge.s32.totalorder %s4299_s8, 1 }
  0x3c   : > { %s4492_s2 = scalar_lea.hbm %s5159_s3, %s3625_s24  ;;  %s315_s10 = scalar_lea.vmem [#allocation6], %s3493_s17 }
  0x3d   : > { %p4485_p1 = pnand %p5187_p11, %p370_p9  ;;  %s322_s30 = sshll.u32 %s315_s10, 4  ;;  %s4494_s30 = int_to_ptr.vmem [resolvable:$true] %s322_s30 }
  0x3e   : > { %s5189_s4 = sld [smem:[#allocation20_spill]]  ;;  %s336_s9 = scalar_lea.vmem [#allocation7], %s3493_s17 }
  0x3f   : > { %s5188_s20 = scalar_select %p4485_p1, 1, 0 }
  0x40   : > { %s343_s21 = sshll.u32 %s336_s9, 4  ;;  %s5190_s19 = sand.u32 1, %s4299_s8   ;;  %s4501_s21 = int_to_ptr.vmem [resolvable:$true] %s343_s21 }
  0x41   : > { %s4505_s22 = scalar_lea.sflag [#allocation8], %s5190_s19 }
  0x44   : > { %s4499_s12 = scalar_lea.hbm %s5189_s4, %s3625_s24  ;;  %s4110_s24 = scalar_lea.hbm %s5189_s4, 8192 }
  0x45   : > { %s4105_s26 = scalar_lea.hbm %s4499_s12, 2048  ;;  %p4111_p7 = scmp.lt.u32.totalorder %s4499_s12, %s5189_s4 }
  0x46   : > { %p4106_p4 = scmp.ne.s32.totalorder %s4499_s12, %s4105_s26  ;;  %p4112_p8 = scmp.lt.u32.totalorder %s4110_s24, %s4105_s26 }
  0x47   : > { %p4114_p0 = scmp.lt.u32.totalorder %s4105_s26, %s4499_s12 }
  0x48   : > { %p4108_p5 = pnand %p4106_p4, %p4453_p13  ;;  %p4113_p12 = por %p4112_p8, %p4111_p7 }
  0x4a   : > { %p4109_p6 = pneg %p4108_p5  ;;  %p4115_p2 = por %p4114_p0, %p4113_p12 }
  0x4c   : > { %p4116_p3 = pnand %p4115_p2, %p4109_p6 }
  0x4e   : > { %4119 = shalt.err (!%p4116_p3)
}
  0x4f   : > { %s4120_s9 = scalar_lea.vmem %s4501_s21, 2048  ;;  %s4304_s17 = smov [#allocation7]  }
  0x50   : > { %p4121_p9 = scmp.ne.s32.totalorder %s4501_s21, %s4120_s9  ;;  %s4125_s19 = sshll.u32 %s4304_s17, 4  ;;  %s4126_s19 = int_to_ptr.vmem [resolvable:$false] %s4125_s19 }
  0x51   : > { %s4127_s6 = scalar_lea.vmem %s4126_s19, 4096  ;;  %p4128_p5 = scmp.lt.s32.totalorder %s4501_s21, %s4126_s19 }
  0x52   : > { %p4123_p11 = pnand %p4121_p9, %p4453_p13  ;;  %p4129_p1 = scmp.lt.s32.totalorder %s4127_s6, %s4120_s9 }
  0x54   : > { %p4124_p4 = pneg %p4123_p11  ;;  %p4130_p7 = por %p4129_p1, %p4128_p5 }
  0x56   : > { %p4131_p8 = pnand %p4130_p7, %p4124_p4 }
  0x58   : > { %4134 = shalt.err (!%p4131_p8)
}
  0x59   : > { %s5191_s26 = smov 4   ;;  %s5192_s10 = smov 64  }
  0x5a   : > { %3863 = dma.hbm_to_vmem [thread:$0]  (!%p4431_p10), %s4499_s12, 2048, %s4501_s21, %s4505_s22, %s5192_s10, %s5192_s10, %s5191_s26  }
  0x5b   : > { %s3835_s14 = smul.u32 192, %s4424_s15  ;;  %s270_s4 = scalar_lea.sflag [#allocation3], %s4424_s15 }
  0x5c   : > { %s3836_s24 = smul.u32 3072, %s4291_s29  ;;  %s4140_s26 = scalar_lea.hbm %s5157_s1, 12288 }
  0x5d   : > { %s273_s19 = scalar_lea.vmem [#allocation2], %s3835_s14 }
  0x5e   : > { %s4537_s17 = scalar_lea.hbm %s5157_s1, %s3836_s24  ;;  %s280_s6 = sshll.u32 %s273_s19, 4  ;;  %s4539_s6 = int_to_ptr.vmem [resolvable:$true] %s280_s6 }
  0x5f   : > { %s4135_s27 = scalar_lea.hbm %s4537_s17, 3072  ;;  %p4141_p0 = scmp.lt.u32.totalorder %s4537_s17, %s5157_s1 }
  0x60   : > { %p4136_p1 = scmp.ne.s32.totalorder %s4537_s17, %s4135_s27  ;;  %p4142_p2 = scmp.lt.u32.totalorder %s4140_s26, %s4135_s27 }
  0x61   : > { %p4144_p9 = scmp.lt.u32.totalorder %s4135_s27, %s4537_s17 }
  0x62   : > { %p4138_p6 = pnand %p4136_p1, %p4453_p13  ;;  %p4143_p3 = por %p4142_p2, %p4141_p0 }
  0x64   : > { %p4139_p12 = pneg %p4138_p6  ;;  %p4145_p11 = por %p4144_p9, %p4143_p3 }
  0x66   : > { %p4146_p4 = pnand %p4145_p11, %p4139_p12 }
  0x68   : > { %4149 = shalt.err (!%p4146_p4)
}
  0x69   : > { %s4150_s14 = scalar_lea.vmem %s4539_s6, 3072  ;;  %s4305_s23 = smov [#allocation2]  }
  0x6a   : > { %p4151_p5 = scmp.ne.s32.totalorder %s4539_s6, %s4150_s14  ;;  %s4155_s9 = sshll.u32 %s4305_s23, 4  ;;  %s4156_s9 = int_to_ptr.vmem [resolvable:$false] %s4155_s9 }
  0x6b   : > { %s4157_s19 = scalar_lea.vmem %s4156_s9, 6144  ;;  %p4158_p1 = scmp.lt.s32.totalorder %s4539_s6, %s4156_s9 }
  0x6c   : > { %p4153_p7 = pnand %p4151_p5, %p4453_p13  ;;  %p4159_p6 = scmp.lt.s32.totalorder %s4157_s19, %s4150_s14 }
  0x6e   : > { %p4154_p8 = pneg %p4153_p7  ;;  %p4160_p0 = por %p4159_p6, %p4158_p1 }
  0x70   : > { %p4161_p2 = pnand %p4160_p0, %p4154_p8 }
  0x72   : > { %4164 = shalt.err (!%p4161_p2)
}
  0x73   : > { %s4306_s27 = smov 192   ;;  %s4307_s21 = smov 12  }
  0x74   : > { %3854 = dma.hbm_to_vmem [thread:$0]  (!%p4431_p10), %s4537_s17, 3072, %s4539_s6, %s270_s4, %s4306_s27, %s4306_s27, %s4307_s21  }
  0x75   : > { %s4165_s12 = scalar_lea.hbm %s4492_s2, 2048  ;;  %s4170_s24 = scalar_lea.hbm %s5159_s3, 8192 }
  0x76   : > { %p4166_p12 = scmp.ne.s32.totalorder %s4492_s2, %s4165_s12  ;;  %p4171_p11 = scmp.lt.u32.totalorder %s4492_s2, %s5159_s3 }
  0x77   : > { %p4172_p4 = scmp.lt.u32.totalorder %s4170_s24, %s4165_s12  ;;  %p4174_p7 = scmp.lt.u32.totalorder %s4165_s12, %s4492_s2 }
  0x78   : > { %p4168_p3 = pnand %p4166_p12, %p4453_p13 }
  0x79   : > { %p4173_p5 = por %p4172_p4, %p4171_p11 }
  0x7a   : > { %p4169_p9 = pneg %p4168_p3 }
  0x7b   : > { %p4175_p8 = por %p4174_p7, %p4173_p5 }
  0x7d   : > { %p4176_p1 = pnand %p4175_p8, %p4169_p9 }
  0x7f   : > { %4179 = shalt.err (!%p4176_p1)
}
  0x80   : > { %s4180_s4 = scalar_lea.vmem %s4494_s30, 2048  ;;  %s4308_s17 = smov [#allocation6]  }
  0x81   : > { %p4181_p6 = scmp.ne.s32.totalorder %s4494_s30, %s4180_s4  ;;  %s4185_s6 = sshll.u32 %s4308_s17, 4  ;;  %s4186_s6 = int_to_ptr.vmem [resolvable:$false] %s4185_s6 }
  0x82   : > { %s4187_s9 = scalar_lea.vmem %s4186_s6, 4096  ;;  %p4188_p12 = scmp.lt.s32.totalorder %s4494_s30, %s4186_s6 }
  0x83   : > { %p4183_p0 = pnand %p4181_p6, %p4453_p13  ;;  %p4189_p3 = scmp.lt.s32.totalorder %s4187_s9, %s4180_s4 }
  0x85   : > { %p4184_p2 = pneg %p4183_p0  ;;  %p4190_p11 = por %p4189_p3, %p4188_p12 }
  0x87   : > { %p4191_p4 = pnand %p4190_p11, %p4184_p2 }
  0x89   : > { %4194 = shalt.err (!%p4191_p4)
}
  0x8a   : > { %s4309_s19 = smov 128   ;;  %s4310_s27 = smov 8  }
  0x8b   : > { %3860 = dma.hbm_to_vmem [thread:$0]  (!%p4431_p10), %s4492_s2, 2048, %s4494_s30, %s4447_s13, %s4309_s19, %s4309_s19, %s4310_s27  }
  0x8c   : > { %s3837_s21 = smul.u32 24, %s4424_s15  ;;  %s4200_s15 = scalar_lea.hbm %s5161_s5, 1536 }
  0x8d   : > { %s3838_s12 = smul.u32 384, %s4291_s29 }
  0x8e   : > { %s357_s14 = scalar_lea.vmem [#allocation9], %s3837_s21 }
  0x8f   : > { %s4592_s24 = scalar_lea.hbm %s5161_s5, %s3838_s12  ;;  %s365_s23 = sshll.u32 %s357_s14, 4  ;;  %s366_s23 = int_to_ptr.vmem [resolvable:$true] %s365_s23 }
  0x90   : > { %s4195_s4 = scalar_lea.hbm %s4592_s24, 384  ;;  %p4201_p8 = scmp.lt.u32.totalorder %s4592_s24, %s5161_s5 }
  0x91   : > { %p4196_p9 = scmp.ne.s32.totalorder %s4592_s24, %s4195_s4  ;;  %p4202_p1 = scmp.lt.u32.totalorder %s4200_s15, %s4195_s4 }
  0x92   : > { %p4204_p0 = scmp.lt.u32.totalorder %s4195_s4, %s4592_s24 }
  0x93   : > { %p4198_p5 = pnand %p4196_p9, %p4453_p13  ;;  %p4203_p6 = por %p4202_p1, %p4201_p8 }
  0x95   : > { %p4199_p7 = pneg %p4198_p5  ;;  %p4205_p2 = por %p4204_p0, %p4203_p6 }
  0x97   : > { %p4206_p12 = pnand %p4205_p2, %p4199_p7 }
  0x99   : > { %4209 = shalt.err (!%p4206_p12)
}
  0x9a   : > { %s4210_s6 = scalar_lea.vmem %s366_s23, 384  ;;  %s4311_s9 = smov [#allocation9]  }
  0x9b   : > { %p4211_p3 = scmp.ne.s32.totalorder %s366_s23, %s4210_s6  ;;  %s4215_s19 = sshll.u32 %s4311_s9, 4  ;;  %s4216_s19 = int_to_ptr.vmem [resolvable:$false] %s4215_s19 }
  0x9c   : > { %s4217_s27 = scalar_lea.vmem %s4216_s19, 768  ;;  %p4218_p9 = scmp.lt.s32.totalorder %s366_s23, %s4216_s19 }
  0x9d   : > { %p4213_p11 = pnand %p4211_p3, %p4453_p13  ;;  %p4219_p5 = scmp.lt.s32.totalorder %s4217_s27, %s4210_s6 }
  0x9f   : > { %p4214_p4 = pneg %p4213_p11  ;;  %p4220_p10 = por %p4219_p5, %p4218_p9 }
  0xa1   : > { %p4221_p1 = pnand %p4220_p10, %p4214_p4 }
  0xa3   : > { %4224 = shalt.err (!%p4221_p1)
}
  0xa4   : > { %p5193_p8 = scmp.ne.s32.totalorder %s5184_s18, 0  ;;  %p5194_p7 = scmp.ne.s32.totalorder %s5188_s20, 0 }
  0xa5   : > { %s376_s11 = sand.u32 (!%p5194_p7), 1, %s4275_s25   ;;  %p5195_p13 = scmp.ne.s32.totalorder (!%p5194_p7), %s5183_s16, 0 }
  0xa6   : > { %3866 = dma.hbm_to_vmem [thread:$0]  (!%p5193_p8), %s4592_s24, 384, %s366_s23, %s4505_s22  }
  0xa7   : > { %374 = sbr.rel (%p5194_p7) target bundleno = 3174 (0xc66), region = 48  ;;  %s377_s12 = scalar_lea.sflag (!%p5194_p7), [#allocation3], %s376_s11 }
  0xa8   : > { %s3839_s21 = smul.u32 (!%p5194_p7), 192, %s376_s11 }
  0xaa   : > { %s4615_s26 = scalar_lea.vmem (!%p5194_p7), [#allocation2], %s3839_s21 }
  0xae   : > { %4258 = dma.done.wait (%p5195_p13), %s377_s12, 3072  }
  0xaf   : > { %4260 = vsyncadd (%p5195_p13), %s377_s12, 4294964224  ;;  %s5196_s18 = sadd.s32 4294967295, %s4299_s8   ;;  %s3501_s22 = sshll.u32 %s376_s11, 6 }
  0xb0   : > { %s385_s10 = sand.u32 1, %s5196_s18   ;;  %s4623_s20 = scalar_lea.vmem [#allocation4], %s3501_s22 }
  0xb1   : > { %s386_s24 = scalar_lea.sflag [#allocation5], %s385_s10 }
  0xb2   : > { %4262 = dma.done.wait (%p5195_p13), %s386_s24, 3072  }
  0xb3   : > { %4264 = vsyncadd (%p5195_p13), %s386_s24, 4294964224  ;;  %s3502_s14 = sshll.u32 %s376_s11, 7  ;;  %s404_s4 = scalar_lea.sflag [#allocation8], %s385_s10 }
  0xb4   : > { %s4629_s23 = scalar_lea.vmem [#allocation6], %s3502_s14  ;;  %s4631_s2 = scalar_lea.vmem [#allocation7], %s3502_s14 }
  0xb5   : > { %4266 = dma.done.wait (%p5195_p13), %s404_s4, 2432  }
  0xb6   : > { %4268 = vsyncadd (%p5195_p13), %s404_s4, 4294964864  ;;  %s3840_s30 = smul.u32 24, %s376_s11  ;;  %p470_p10 = scmp.lt.s32.totalorder %s4287_s28, 1 }
  0xb7   : > { %s5197_s12 = sld [smem:[#allocation14_spill]] }
  0xb8   : > { %s5217_s28 = smov (!%p470_p10, %s4287_s28), 1  ;;  %s4647_s21 = scalar_lea.vmem [#allocation9], %s3840_s30 }
  0xb9   : > { %s3504_s15 = sshll.u32 %s5217_s28, 3 }
  0xba   : > { %s473_s6 = scalar_lea.vmem %s5156_s0, %s3504_s15  ;;  %s4645_s27 = scalar_lea.vmem %s5163_s7, %s3504_s15 }
  0xbd   : > { %p3506_p6 = scmp.ne.s32.totalorder %s5197_s12, 0 }
  0xbe   : > { %v483_v0 = vld [vmem:[%s473_s6] sm:$0xff] (!%p3506_p6) }
  0xbf   : > { %482 = sbr.rel (%p3506_p6) target bundleno = 198 (0xc6), region = 72  ;;  %484 = vst [vmem:[%s4645_s27] sm:$0xff] (!%p3506_p6), %v483_v0 }
  0xc6 PF: > { %v3950_v1 = vld [vmem:[%s4615_s26 + $0x4] ss:$12 sps:$4 sm:$0xff]   ;;  %v3952_v2 = vld [vmem:[%s4615_s26] ss:$12 sps:$4 sm:$0xff]   ;;  %v4312_v3 = vmov 0   ;;  %v4313_v4 = vmov 0.0   ;;  %v538_v29 = vlaneseq }
  0xc7   : > { %710 = vmatprep.mubr.bf16.mxu0 %v4312_v3  ;;  %3699 = vmatprep.subr.bf16.mxu1 %v4313_v4  ;;  %v3953_v5 = vld [vmem:[%s4615_s26 + $0x1c] ss:$12 sps:$4 sm:$0xff]   ;;  %v3955_v6 = vld [vmem:[%s4615_s26 + $0x18] ss:$12 sps:$4 sm:$0xff]   ;;  %v3956_v7 = vld [vmem:[%s4615_s26 + $0x34] ss:$12 sps:$4 sm:$0xff]  }
  0xc8   : > { %678 = vmatprep.subr.bf16.mxu0 %v3950_v1  ;;  %v3958_v8 = vld [vmem:[%s4615_s26 + $0x30] ss:$12 sps:$4 sm:$0xff]   ;;  %v3959_v9 = vld [vmem:[%s4615_s26 + $0x4c] ss:$12 sps:$4 sm:$0xff]   ;;  %v3961_v10 = vld [vmem:[%s4615_s26 + $0x48] ss:$12 sps:$4 sm:$0xff]  }
  0xc9   : > { %679 = vmatpush1.bf16.msra.mxu0 %v3952_v2  ;;  %v3974_v11 = vld [vmem:[%s4615_s26 + $0x8] ss:$12 sps:$4 sm:$0xff]   ;;  %v3962_v12 = vld [vmem:[%s4615_s26 + $0x64] ss:$12 sps:$4 sm:$0xff]   ;;  %v3964_v13 = vld [vmem:[%s4615_s26 + $0x60] ss:$12 sps:$4 sm:$0xff]  }
  0xca   : > { %680 = vmatprep.subr.bf16.mxu0 %v3953_v5  ;;  %3700 = vmatpush3.bf16.msra.mxu1 %v3974_v11  ;;  %v3975_v14 = vld [vmem:[%s4615_s26 + $0x20] ss:$12 sps:$4 sm:$0xff]   ;;  %v3965_v15 = vld [vmem:[%s4615_s26 + $0x7c] ss:$12 sps:$4 sm:$0xff]   ;;  %v3976_v16 = vld [vmem:[%s4615_s26 + $0x38] ss:$12 sps:$4 sm:$0xff]  }
  0xcb   : > { %3701 = vmatprep.subr.bf16.mxu1 %v4313_v4  ;;  %v3967_v17 = vld [vmem:[%s4615_s26 + $0x78] ss:$12 sps:$4 sm:$0xff]   ;;  %v3968_v18 = vld [vmem:[%s4615_s26 + $0x94] ss:$12 sps:$4 sm:$0xff]   ;;  %v3977_v19 = vld [vmem:[%s4615_s26 + $0x50] ss:$12 sps:$4 sm:$0xff]  }
  0xcc   : > { %v3970_v20 = vld [vmem:[%s4615_s26 + $0x90] ss:$12 sps:$4 sm:$0xff]   ;;  %v3971_v21 = vld [vmem:[%s4615_s26 + $0xac] ss:$12 sps:$4 sm:$0xff]   ;;  %v3973_v22 = vld [vmem:[%s4615_s26 + $0xa8] ss:$12 sps:$4 sm:$0xff]  }
  0xcd   : > { %681 = vmatpush1.bf16.msra.mxu0 %v3955_v6  ;;  %v485_v23 = vld [vmem:[%s4645_s27] sm:$0xff]  ;;  %v3978_v25 = vld [vmem:[%s4615_s26 + $0x68] ss:$12 sps:$4 sm:$0xff]   ;;  %v3981_v28 = vld [vmem:[%s4615_s26 + $0xb0] ss:$12 sps:$4 sm:$0xff]   ;;  %vm4314_vm0 = vmmov 0  }
  0xce   : > { %682 = vmatprep.subr.bf16.mxu0 %v3956_v7  ;;  %3702 = vmatpush3.bf16.msra.mxu1 %v3975_v14  ;;  %v537_v24 = vpack.c.bf16 %v485_v23, %v485_v23  ;;  %v3979_v26 = vld [vmem:[%s4615_s26 + $0x80] ss:$12 sps:$4 sm:$0xff]   ;;  %v3980_v27 = vld [vmem:[%s4615_s26 + $0x98] ss:$12 sps:$4 sm:$0xff]   ;;  %v4693_v30 = vshrl.u32 %v538_v29, 7  ;;  %s4315_s28 = smov 80  }
  0xcf   : > { %3703 = vmatprep.subr.bf16.mxu1 %v4313_v4  ;;  %3715 = vmatprep.mubr.msk.bf16.mxu1 %vm4314_vm0, %v4313_v4  ;;  %v486_v32 = vld [vmem:[%s4647_s21] sm:$0xff]  ;;  %v487_v33 = vld [vmem:[%s4647_s21 + $0x8] sm:$0xff]  ;;  %s4316_s16 = smov 112   ;;  %s4317_s11 = smov 96   ;;  %v488_v43 = vld [vmem:[%s4647_s21 + $0x10] sm:$0xff]  ;;  %vm1666_vm1 = vcmask 130048  }
  0xd0   : > { %v540_v31 = vsub.s32 0, %v4693_v30  ;;  %s4318_s26 = smov 64   ;;  %s4319_s18 = smov 48   ;;  %v4322_v50 = vmov 1983009808   ;;  %vm2135_vm2 = vcmask 1043456  }
  0xd1   : > { %683 = vmatpush1.bf16.msra.mxu0 %v3958_v8  ;;  %s4320_s10 = smov 32   ;;  %s4321_s22 = smov 16   ;;  %v785_v51 = vunpack.c.l.s4 %v4322_v50  ;;  %v4323_v52 = vmov 1934713408   ;;  %vm2035_vm3 = vcmask 64512   ;;  %vm2802_vm4 = vcmask 261120  }
  0xd2   : > { %684 = vmatprep.subr.bf16.mxu0 %v3959_v9  ;;  %3704 = vmatpush3.bf16.msra.mxu1 %v3976_v16  ;;  %v541_v34 = vrot.slane %v486_v32, %v540_v31  ;;  %v545_v35 = vrot.slane %v487_v33, %v540_v31  ;;  %v549_v44 = vrot.slane %v488_v43, %v540_v31  ;;  %v849_v53 = vunpack.c.l.s4 %v4323_v52  ;;  %s5198_s24 = sld [smem:[#allocation14_spill]] }
  0xd3   : > { %3705 = vmatprep.subr.bf16.mxu1 %v4313_v4  ;;  %v786_v54 = vunpack.c.0.s8 %v785_v51  ;;  %vm2804_vm5 = vcmask 392192   ;;  %vm2806_vm6 = vcmask 523264   ;;  %vm2808_vm7 = vcmask 654336  }
  0xd4   : > { %v850_v57 = vunpack.c.0.s8 %v849_v53  ;;  %vm2810_vm8 = vcmask 785408   ;;  %vm2812_vm9 = vcmask 916480  }
  0xd5   : > { %685 = vmatpush1.bf16.msra.mxu0 %v3961_v10  ;;  %v4731_v58 = vsub.s32 %v786_v54, %v4693_v30 }
  0xd6   : > { %686 = vmatprep.subr.bf16.mxu0 %v3962_v12  ;;  %3706 = vmatpush3.bf16.msra.mxu1 %v3977_v19  ;;  %v4734_v1 = vsub.s32 %v850_v57, %v4693_v30 }
  0xd7   : > { %3707 = vmatprep.subr.bf16.mxu1 %v4313_v4 }
  0xd8   : > { %p3619_p0 = scmp.ne.s32.totalorder %s5198_s24, 3 }
  0xd9   : > { %687 = vmatpush1.bf16.msra.mxu0 %v3964_v13 }
  0xda   : > { %688 = vmatprep.subr.bf16.mxu0 %v3965_v15  ;;  %3708 = vmatpush3.bf16.msra.mxu1 %v3978_v25 }
  0xdb   : > { %3709 = vmatprep.subr.bf16.mxu1 %v4313_v4 }
  0xdd   : > { %689 = vmatpush1.bf16.msra.mxu0 %v3967_v17 }
  0xde   : > { %690 = vmatprep.subr.bf16.mxu0 %v3968_v18  ;;  %3710 = vmatpush3.bf16.msra.mxu1 %v3979_v26 }
  0xdf   : > { %3711 = vmatprep.subr.bf16.mxu1 %v4313_v4 }
  0xe1   : > { %691 = vmatpush1.bf16.msra.mxu0 %v3970_v20 }
  0xe2   : > { %692 = vmatprep.subr.bf16.mxu0 %v3971_v21  ;;  %3712 = vmatpush3.bf16.msra.mxu1 %v3980_v27 }
  0xe3   : > { %3713 = vmatprep.subr.bf16.mxu1 %v4313_v4 }
  0xe5   : > { %693 = vmatpush1.bf16.msra.mxu0 %v3973_v22 }
  0xe6   : > { %3743 = vmatprep.subr.bf16.mxu0 %v4313_v4  ;;  %3714 = vmatpush3.bf16.msra.mxu1 %v3981_v28 }
  0xe7   : > { %3719 = vmatprep.subr.bf16.mxu1 %v4313_v4 }
  0xe8   : > { %711 = vmatmul.mubr.bf16.vlgmr.msra.gmra.mrb[0].mxu0 %v537_v24 }
  0xe9   : > { %3745 = vmatprep.mubr.msk.bf16.mxu0 %vm4314_vm0, %v4313_v4  ;;  %3716 = vmatmul.mubr.bf16.vlgmr.msra.gmra.mrb[0].mxu1 %v537_v24 }
  0xea   : > { %3721 = vmatprep.mubr.msk.bf16.mxu1 %vm4314_vm0, %v4313_v4 }
 0x1bb   : > { %v712_v36 = vpop.f32.mrb[0].mxu0 }
 0x1bc   : > { %v714_v37 = vpop.f32.mrb[1].mxu0  ;;  %v713_v38 = vadd.f32 %v712_v36, %v541_v34  ;;  %v753_v45 = vpop.f32.mrb[0].mxu1 }
 0x1bd   : > { %v715_v39 = vadd.f32 %v714_v37, %v545_v35  ;;  %v716_v40 = vpop.f32.mrb[2].mxu0  ;;  %v4722_v46 = vadd.f32 %v753_v45, %v549_v44  ;;  %v3717_v47 = vpop.f32.mrb[1].mxu1 }
 0x1be   : > { %v717_v41 = vpop.f32.mrb[3].mxu0  ;;  %v4700_v42 = vmul.f32 0.25, %v713_v38  ;;  %v756_v48 = vpop.f32.mrb[2].mxu1 }
 0x1bf   : > { %1069 = vrot.lane.b32.xlu1 %v715_v39, %s4315_s28  ;;  %1063 = vrot.lane.b32.xlu0 %v715_v39, %s4316_s16  ;;  %v3718_v49 = vpop.f32.mrb[3].mxu1 }
 0x1c3   : > { %1066 = vrot.lane.b32.xlu0 %v715_v39, %s4317_s11  ;;  %761 = vrot.lane.b32.xlu1 %v4700_v42, %s4316_s16 }
 0x1c7   : > { %764 = vrot.lane.b32.xlu0 %v4700_v42, %s4317_s11  ;;  %767 = vrot.lane.b32.xlu1 %v4700_v42, %s4315_s28 }
 0x1cb   : > { %1072 = vrot.lane.b32.xlu0 %v715_v39, %s4318_s26  ;;  %1075 = vrot.lane.b32.xlu1 %v715_v39, %s4319_s18 }
 0x1cf   : > { %1078 = vrot.lane.b32.xlu0 %v715_v39, %s4320_s10  ;;  %1081 = vrot.lane.b32.xlu1 %v715_v39, %s4321_s22 }
 0x1d3   : > { %770 = vrot.lane.b32.xlu0 %v4700_v42, %s4318_s26  ;;  %773 = vrot.lane.b32.xlu1 %v4700_v42, %s4319_s18 }
 0x1d7   : > { %776 = vrot.lane.b32.xlu0 %v4700_v42, %s4320_s10  ;;  %779 = vrot.lane.b32.xlu1 %v4700_v42, %s4321_s22 }
 0x1db   : > { %1365 = vrot.lane.b32.xlu1 %v4722_v46, %s4316_s16  ;;  %1368 = vrot.lane.b32.xlu0 %v4722_v46, %s4317_s11 }
 0x1df   : > { %1371 = vrot.lane.b32.xlu1 %v4722_v46, %s4315_s28 }
 0x231   : > { %v1070_v55 = vpop.permute.xlu1 %1069  ;;  %v1064_v56 = vpop.permute.xlu0 %1063 }
 0x232   : > { %v1100_v59 = vcombine.low %v1064_v56, %v1070_v55  ;;  %v1101_v60 = vcombine.high %v1064_v56, %v1070_v55 }
 0x234   : > { %v1108_v2 = vrot.slane %v1100_v59, %v4731_v58  ;;  %v1115_v5 = vrot.slane %v1101_v60, %v4731_v58 }
 0x235   : > { %v1067_v61 = vpop.permute.xlu0 %1066  ;;  %v762_v62 = vpop.permute.xlu1 %761 }
 0x236   : > { %v1084_v63 = vcombine.low %v715_v39, %v1067_v61  ;;  %v1085_v0 = vcombine.high %v715_v39, %v1067_v61 }
 0x238   : > { %v1092_v6 = vrot.slane %v1084_v63, %v4731_v58  ;;  %v1099_v7 = vrot.slane %v1085_v0, %v4731_v58 }
 0x239   : > { %v765_v8 = vpop.permute.xlu0 %764  ;;  %v768_v9 = vpop.permute.xlu1 %767 }
 0x23a   : > { %v1148_v10 = vcombine.low %v1092_v6, %v1108_v2  ;;  %v1149_v11 = vcombine.high %v1092_v6, %v1108_v2  ;;  %v1164_v12 = vcombine.low %v1099_v7, %v1115_v5  ;;  %v1165_v13 = vcombine.high %v1099_v7, %v1115_v5 }
 0x23b   : > { %v782_v14 = vcombine.low %v4700_v42, %v765_v8  ;;  %v783_v15 = vcombine.high %v4700_v42, %v765_v8  ;;  %v798_v16 = vcombine.low %v762_v62, %v768_v9  ;;  %v799_v17 = vcombine.high %v762_v62, %v768_v9 }
 0x23c   : > { %v1156_v18 = vrot.slane %v1148_v10, %v4734_v1  ;;  %v1163_v19 = vrot.slane %v1149_v11, %v4734_v1  ;;  %v1172_v20 = vrot.slane %v1164_v12, %v4734_v1  ;;  %v1179_v21 = vrot.slane %v1165_v13, %v4734_v1 }
 0x23d   : > { %v790_v22 = vrot.slane %v782_v14, %v4731_v58  ;;  %v797_v23 = vrot.slane %v783_v15, %v4731_v58  ;;  %v806_v24 = vrot.slane %v798_v16, %v4731_v58  ;;  %v813_v25 = vrot.slane %v799_v17, %v4731_v58  ;;  %v1073_v26 = vpop.permute.xlu0 %1072  ;;  %v1076_v27 = vpop.permute.xlu1 %1075 }
 0x23e   : > { %v3539_v28 = vcombine.low %v1156_v18, %v1163_v19  ;;  %v3541_v29 = vcombine.high %v1156_v18, %v1163_v19  ;;  %v3543_v37 = vcombine.low %v1172_v20, %v1179_v21  ;;  %v3545_v38 = vcombine.high %v1172_v20, %v1179_v21 }
 0x23f   : > { %v846_v31 = vcombine.low %v790_v22, %v806_v24  ;;  %v847_v32 = vcombine.high %v790_v22, %v806_v24  ;;  %v862_v33 = vcombine.low %v797_v23, %v813_v25  ;;  %v863_v34 = vcombine.high %v797_v23, %v813_v25 }
 0x240   : > { %v4751_v35 = vrot.slane %v3539_v28, %v4731_v58  ;;  %v4754_v36 = vrot.slane %v3541_v29, %v4731_v58  ;;  %v4765_v59 = vrot.slane %v3543_v37, %v4731_v58  ;;  %v4768_v60 = vrot.slane %v3545_v38, %v4731_v58 }
 0x241   : > { %v854_v39 = vrot.slane %v846_v31, %v4734_v1  ;;  %v861_v40 = vrot.slane %v847_v32, %v4734_v1  ;;  %v870_v41 = vrot.slane %v862_v33, %v4734_v1  ;;  %v877_v42 = vrot.slane %v863_v34, %v4734_v1  ;;  %v1079_v43 = vpop.permute.xlu0 %1078  ;;  %v1082_v44 = vpop.permute.xlu1 %1081 }
 0x242   : > { %v1116_v45 = vcombine.low %v1073_v26, %v1079_v43  ;;  %v1117_v47 = vcombine.high %v1073_v26, %v1079_v43  ;;  %v1132_v48 = vcombine.low %v1076_v27, %v1082_v44  ;;  %v1133_v49 = vcombine.high %v1076_v27, %v1082_v44 }
 0x243   : > { %v3531_v50 = vcombine.low %v854_v39, %v861_v40  ;;  %v3533_v51 = vcombine.high %v854_v39, %v861_v40  ;;  %v3535_v52 = vcombine.low %v870_v41, %v877_v42  ;;  %v3537_v53 = vcombine.high %v870_v41, %v877_v42 }
 0x244   : > { %v1124_v54 = vrot.slane %v1116_v45, %v4731_v58  ;;  %v1131_v55 = vrot.slane %v1117_v47, %v4731_v58  ;;  %v1140_v56 = vrot.slane %v1132_v48, %v4731_v58  ;;  %v1147_v57 = vrot.slane %v1133_v49, %v4731_v58 }
 0x245   : > { %v4771_v61 = vrot.slane %v3531_v50, %v4731_v58  ;;  %v4774_v62 = vrot.slane %v3533_v51, %v4731_v58  ;;  %v771_v63 = vpop.permute.xlu0 %770  ;;  %v774_v0 = vpop.permute.xlu1 %773  ;;  %v4777_v8 = vrot.slane %v3535_v52, %v4731_v58  ;;  %v4780_v9 = vrot.slane %v3537_v53, %v4731_v58 }
 0x246   : > { %v1180_v2 = vcombine.low %v1124_v54, %v1140_v56  ;;  %v1181_v5 = vcombine.high %v1124_v54, %v1140_v56  ;;  %v1196_v6 = vcombine.low %v1131_v55, %v1147_v57  ;;  %v1197_v7 = vcombine.high %v1131_v55, %v1147_v57 }
 0x247   : > { %v982_v14 = vcombine.low %v4771_v61, %v4774_v62  ;;  %v1284_v17 = vcombine.low %v4751_v35, %v4754_v36  ;;  %v1316_v18 = vcombine.low %v4765_v59, %v4768_v60  ;;  %v1014_v27 = vcombine.low %v4777_v8, %v4780_v9 }
 0x248   : > { %v1188_v10 = vrot.slane %v1180_v2, %v4734_v1  ;;  %v1195_v11 = vrot.slane %v1181_v5, %v4734_v1  ;;  %v1204_v12 = vrot.slane %v1196_v6, %v4734_v1  ;;  %v1211_v13 = vrot.slane %v1197_v7, %v4734_v1 }
 0x249   : > { %v777_v15 = vpop.permute.xlu0 %776  ;;  %v780_v16 = vpop.permute.xlu1 %779  ;;  %v1292_v39 = vrot.slane %v1284_v17, %v4734_v1  ;;  %v1324_v40 = vrot.slane %v1316_v18, %v4734_v1  ;;  %v990_v48 = vrot.slane %v982_v14, %v4734_v1  ;;  %v1022_v49 = vrot.slane %v1014_v27, %v4734_v1 }
 0x24a   : > { %v3540_v19 = vcombine.low %v1188_v10, %v1195_v11  ;;  %v3542_v20 = vcombine.high %v1188_v10, %v1195_v11  ;;  %v3544_v21 = vcombine.low %v1204_v12, %v1211_v13  ;;  %v3546_v22 = vcombine.high %v1204_v12, %v1211_v13 }
 0x24b   : > { %v814_v23 = vcombine.low %v771_v63, %v777_v15  ;;  %v815_v24 = vcombine.high %v771_v63, %v777_v15  ;;  %v830_v25 = vcombine.low %v774_v0, %v780_v16  ;;  %v831_v26 = vcombine.high %v774_v0, %v780_v16 }
 0x24c   : > { %v1235_v28 = vrot.slane %v3540_v19, %v4731_v58  ;;  %v1251_v29 = vrot.slane %v3542_v20, %v4731_v58  ;;  %v1267_v31 = vrot.slane %v3544_v21, %v4731_v58  ;;  %v1283_v38 = vrot.slane %v3546_v22, %v4731_v58 }
 0x24d   : > { %v822_v32 = vrot.slane %v814_v23, %v4731_v58  ;;  %v829_v33 = vrot.slane %v815_v24, %v4731_v58  ;;  %v838_v34 = vrot.slane %v830_v25, %v4731_v58  ;;  %v845_v37 = vrot.slane %v831_v26, %v4731_v58 }
 0x24e   : > { %v1300_v41 = vcombine.low %v1235_v28, %v1251_v29  ;;  %v1348_v47 = vcombine.low %v1292_v39, %v1324_v40  ;;  %v1332_v56 = vcombine.low %v1267_v31, %v1283_v38  ;;  %v1046_v6 = vcombine.low %v990_v48, %v1022_v49 }
 0x24f   : > { %v878_v42 = vcombine.low %v822_v32, %v838_v34  ;;  %v879_v43 = vcombine.high %v822_v32, %v838_v34  ;;  %v894_v44 = vcombine.low %v829_v33, %v845_v37  ;;  %v895_v45 = vcombine.high %v829_v33, %v845_v37 }
 0x250   : > { %v1356_v54 = vpack.c.bf16 %v1348_v47, %v1348_v47  ;;  %v4811_v55 = vrot.slane %v1300_v41, %v4734_v1  ;;  %v1349_v7 = vcombine.high %v1292_v39, %v1324_v40  ;;  %v4815_v10 = vrot.slane %v1332_v56, %v4734_v1 }
 0x251   : > { %v886_v50 = vrot.slane %v878_v42, %v4734_v1  ;;  %v893_v51 = vrot.slane %v879_v43, %v4734_v1  ;;  %v902_v52 = vrot.slane %v894_v44, %v4734_v1  ;;  %v909_v53 = vrot.slane %v895_v45, %v4734_v1 }
 0x252   : > { %v1671_v5 = vsel %vm1666_vm1, %v1356_v54, 0  ;;  %v1352_v15 = vcombine.low %v4811_v55, %v4815_v10  ;;  %v1285_v16 = vcombine.high %v4751_v35, %v4754_v36  ;;  %v1317_v17 = vcombine.high %v4765_v59, %v4768_v60 }
 0x253   : > { %v3532_v57 = vcombine.low %v886_v50, %v893_v51  ;;  %v3534_v63 = vcombine.high %v886_v50, %v893_v51  ;;  %v3536_v0 = vcombine.low %v902_v52, %v909_v53  ;;  %v3538_v2 = vcombine.high %v902_v52, %v909_v53  ;;  %3720 = vmatpush3.bf16.xpose.msra.mxu1 %v1671_v5 }
 0x254   : > { %3725 = vmatprep.subr.bf16.mxu1 %v4313_v4  ;;  %v1301_v18 = vcombine.high %v1235_v28, %v1251_v29  ;;  %v1357_v21 = vpack.c.bf16 %v1349_v7, %v1349_v7  ;;  %v1360_v22 = vpack.c.bf16 %v1352_v15, %v1352_v15  ;;  %v1299_v23 = vrot.slane %v1285_v16, %v4734_v1 }
 0x255   : > { %v933_v11 = vrot.slane %v3532_v57, %v4731_v58  ;;  %v949_v12 = vrot.slane %v3534_v63, %v4731_v58  ;;  %v965_v13 = vrot.slane %v3536_v0, %v4731_v58  ;;  %v981_v14 = vrot.slane %v3538_v2, %v4731_v58 }
 0x256   : > { %v1331_v24 = vrot.slane %v1317_v17, %v4734_v1  ;;  %v1315_v27 = vrot.slane %v1301_v18, %v4734_v1  ;;  %v1333_v32 = vcombine.high %v1267_v31, %v1283_v38  ;;  %v1054_v35 = vpack.c.bf16 %v1046_v6, %v1046_v6 }
 0x257   : > { %v998_v19 = vcombine.low %v933_v11, %v949_v12  ;;  %v1030_v20 = vcombine.low %v965_v13, %v981_v14  ;;  %v1855_v36 = vsel %vm1666_vm1, %v1360_v22, 0  ;;  %v999_v28 = vcombine.high %v933_v11, %v949_v12  ;;  %v1366_v12 = vpop.permute.xlu1 %1365 }
 0x258   : > { %3744 = vmatpush3.bf16.xpose.msra.mxu0 %v1855_v36  ;;  %v1347_v60 = vrot.slane %v1333_v32, %v4734_v1  ;;  %v1031_v29 = vcombine.high %v965_v13, %v981_v14  ;;  %v1717_v33 = vsel %vm1666_vm1, %v1357_v21, 0  ;;  %v1350_v34 = vcombine.low %v1299_v23, %v1331_v24  ;;  %v1369_v13 = vpop.permute.xlu0 %1368 }
 0x259   : > { %v1006_v25 = vrot.slane %v998_v19, %v4734_v1  ;;  %v1038_v26 = vrot.slane %v1030_v20, %v4734_v1  ;;  %3755 = vmatprep.subr.bf16.mxu0 %v4313_v4  ;;  %v983_v37 = vcombine.high %v4771_v61, %v4774_v62  ;;  %v1015_v38 = vcombine.high %v4777_v8, %v4780_v9 }
 0x25a   : > { %3722 = vmatmul.mubr.msk.bf16.vlgmr.msra.gmra.mrb[4].mxu1 %vm1666_vm1, %v1054_v35  ;;  %v1354_v31 = vcombine.low %v1315_v27, %v1347_v60  ;;  %v1047_v39 = vcombine.high %v990_v48, %v1022_v49  ;;  %v1358_v42 = vpack.c.bf16 %v1350_v34, %v1350_v34  ;;  %v1013_v43 = vrot.slane %v999_v28, %v4734_v1 }
 0x25b   : > { %v1050_v59 = vcombine.low %v1006_v25, %v1038_v26  ;;  %3726 = vmatpush3.bf16.xpose.msra.mxu1 %v1717_v33  ;;  %3727 = vmatprep.mubr.msk.bf16.mxu1 %vm4314_vm0, %v4313_v4  ;;  %v1045_v44 = vrot.slane %v1031_v29, %v4734_v1  ;;  %v997_v61 = vrot.slane %v983_v37, %v4734_v1  ;;  %v1372_v14 = vpop.permute.xlu1 %1371 }
 0x25c   : > { %3731 = vmatprep.subr.bf16.mxu1 %v4313_v4  ;;  %v1362_v41 = vpack.c.bf16 %v1354_v31, %v1354_v31  ;;  %v1055_v45 = vpack.c.bf16 %v1047_v39, %v1047_v39  ;;  %v1029_v62 = vrot.slane %v1015_v38, %v4734_v1  ;;  %v1763_v8 = vsel %vm1666_vm1, %v1358_v42, 0 }
 0x25d   : > { %v1058_v40 = vpack.c.bf16 %v1050_v59, %v1050_v59  ;;  %v1351_v9 = vcombine.high %v1299_v23, %v1331_v24  ;;  %v1052_v48 = vcombine.low %v1013_v43, %v1045_v44  ;;  %v1353_v54 = vcombine.high %v4811_v55, %v4815_v10 }
 0x25e   : > { %v1947_v47 = vsel %vm1666_vm1, %v1362_v41, 0  ;;  %v1048_v49 = vcombine.low %v997_v61, %v1029_v62  ;;  %v1049_v56 = vcombine.high %v997_v61, %v1029_v62  ;;  %v1355_v2 = vcombine.high %v1315_v27, %v1347_v60 }
 0x25f   : > { %3746 = vmatmul.mubr.msk.bf16.vlgmr.msra.gmra.mrb[4].mxu0 %vm1666_vm1, %v1058_v40  ;;  %v1359_v50 = vpack.c.bf16 %v1351_v9, %v1351_v9  ;;  %v1060_v51 = vpack.c.bf16 %v1052_v48, %v1052_v48  ;;  %v1361_v57 = vpack.c.bf16 %v1353_v54, %v1353_v54  ;;  %v1051_v5 = vcombine.high %v1006_v25, %v1038_v26 }
 0x260   : > { %3756 = vmatpush3.bf16.xpose.msra.mxu0 %v1947_v47  ;;  %3757 = vmatprep.mubr.msk.bf16.mxu0 %vm4314_vm0, %v4313_v4  ;;  %v1056_v52 = vpack.c.bf16 %v1048_v49, %v1048_v49  ;;  %v1057_v63 = vpack.c.bf16 %v1049_v56, %v1049_v56  ;;  %v1363_v55 = vpack.c.bf16 %v1355_v2, %v1355_v2 }
 0x261   : > { %3767 = vmatprep.subr.bf16.mxu0 %v4313_v4  ;;  %v1809_v53 = vsel %vm1666_vm1, %v1359_v50, 0  ;;  %v1901_v0 = vsel %vm1666_vm1, %v1361_v57, 0  ;;  %v1059_v6 = vpack.c.bf16 %v1051_v5, %v1051_v5  ;;  %v1053_v10 = vcombine.high %v1013_v43, %v1045_v44 }
 0x262   : > { %3728 = vmatmul.mubr.msk.bf16.vlgmr.msra.gmra.mrb[8].mxu1 %vm1666_vm1, %v1055_v45  ;;  %v1993_v7 = vsel %vm1666_vm1, %v1363_v55, 0  ;;  %v1386_v15 = vcombine.low %v4722_v46, %v1369_v13  ;;  %v1387_v16 = vcombine.high %v4722_v46, %v1369_v13  ;;  %v1402_v17 = vcombine.low %v1366_v12, %v1372_v14 }
 0x263   : > { %3732 = vmatpush3.bf16.xpose.msra.mxu1 %v1763_v8  ;;  %3733 = vmatprep.mubr.msk.bf16.mxu1 %vm4314_vm0, %v4313_v4  ;;  %v1061_v11 = vpack.c.bf16 %v1053_v10, %v1053_v10  ;;  %v1403_v18 = vcombine.high %v1366_v12, %v1372_v14 }
 0x264   : > { %3737 = vmatprep.subr.bf16.mxu1 %v4313_v4  ;;  %v1394_v19 = vrot.slane %v1386_v15, %v4731_v58  ;;  %v1401_v20 = vrot.slane %v1387_v16, %v4731_v58  ;;  %v1410_v21 = vrot.slane %v1402_v17, %v4731_v58 }
 0x265   : > { %v1417_v22 = vrot.slane %v1403_v18, %v4731_v58 }
 0x266   : > { %v1450_v23 = vcombine.low %v1394_v19, %v1410_v21  ;;  %v1451_v24 = vcombine.high %v1394_v19, %v1410_v21 }
 0x267   : > { %3758 = vmatmul.mubr.msk.bf16.vlgmr.msra.gmra.mrb[8].mxu0 %vm1666_vm1, %v1060_v51  ;;  %v1466_v25 = vcombine.low %v1401_v20, %v1417_v22  ;;  %v1467_v26 = vcombine.high %v1401_v20, %v1417_v22 }
 0x268   : > { %3769 = vmatprep.mubr.msk.bf16.mxu0 %vm4314_vm0, %v4313_v4  ;;  %v1458_v27 = vrot.slane %v1450_v23, %v4734_v1  ;;  %v1465_v32 = vrot.slane %v1451_v24, %v4734_v1 }
 0x269   : > { %v1474_v35 = vrot.slane %v1466_v25, %v4734_v1  ;;  %v1481_v36 = vrot.slane %v1467_v26, %v4734_v1 }
 0x26a   : > { %3734 = vmatmul.mubr.msk.bf16.vlgmr.msra.gmra.mrb[12].mxu1 %vm1666_vm1, %v1056_v52  ;;  %v3547_v59 = vcombine.low %v1458_v27, %v1465_v32  ;;  %v3549_v60 = vcombine.high %v1458_v27, %v1465_v32 }
 0x26b   : > { %3738 = vmatpush3.bf16.xpose.msra.mxu1 %v1809_v53  ;;  %3739 = vmatprep.mubr.msk.bf16.mxu1 %vm4314_vm0, %v4313_v4  ;;  %v3551_v28 = vcombine.low %v1474_v35, %v1481_v36  ;;  %v3553_v29 = vcombine.high %v1474_v35, %v1481_v36 }
 0x26c   : > { %3749 = vmatprep.subr.bf16.mxu1 %v4313_v4  ;;  %v1530_v33 = vrot.slane %v3547_v59, %v4731_v58  ;;  %v1546_v34 = vrot.slane %v3549_v60, %v4731_v58 }
 0x26d   : > { %v1562_v31 = vrot.slane %v3551_v28, %v4731_v58  ;;  %v1578_v37 = vrot.slane %v3553_v29, %v4731_v58 }
 0x26e   : > { %v1586_v38 = vcombine.low %v1530_v33, %v1546_v34  ;;  %v1587_v40 = vcombine.high %v1530_v33, %v1546_v34 }
 0x26f   : > { %v1618_v39 = vcombine.low %v1562_v31, %v1578_v37  ;;  %v1619_v41 = vcombine.high %v1562_v31, %v1578_v37 }
 0x270   : > { %v1594_v42 = vrot.slane %v1586_v38, %v4734_v1  ;;  %v1601_v44 = vrot.slane %v1587_v40, %v4734_v1 }
 0x271   : > { %v1626_v43 = vrot.slane %v1618_v39, %v4734_v1  ;;  %v1633_v45 = vrot.slane %v1619_v41, %v4734_v1 }
 0x272   : > { %3740 = vmatmul.mubr.msk.bf16.vlgmr.msra.gmra.mrb[16].mxu1 %vm1666_vm1, %v1057_v63 }
 0x273   : > { %3750 = vmatpush3.bf16.xpose.msra.mxu1 %v1901_v0  ;;  %3751 = vmatprep.mubr.msk.bf16.mxu1 %vm4314_vm0, %v4313_v4  ;;  %v1650_v47 = vcombine.low %v1594_v42, %v1626_v43  ;;  %v1651_v61 = vcombine.high %v1594_v42, %v1626_v43  ;;  %v4900_v62 = vcombine.low %v1601_v44, %v1633_v45 }
 0x274   : > { %3761 = vmatprep.subr.bf16.mxu1 %v4313_v4  ;;  %v4902_v8 = vcombine.high %v1601_v44, %v1633_v45 }
 0x275   : > { %v1658_v9 = vpack.c.bf16 %v1650_v47, %v1650_v47  ;;  %v1659_v48 = vpack.c.bf16 %v1651_v61, %v1651_v61 }
 0x277   : > { %v2137_v49 = vsel %vm2135_vm2, %v1658_v9, 0  ;;  %v2183_v50 = vsel %vm2135_vm2, %v1659_v48, 0 }
 0x278   : > { %3768 = vmatpush3.bf16.msra.mxu0 %v2137_v49 }
 0x279   : > { %3779 = vmatprep.subr.bf16.mxu0 %v4313_v4 }
 0x27a   : > { %3752 = vmatmul.mubr.msk.bf16.vlgmr.msra.gmra.mrb[20].mxu1 %vm1666_vm1, %v1059_v6 }
 0x27b   : > { %3762 = vmatpush3.bf16.xpose.msra.mxu1 %v1993_v7  ;;  %3763 = vmatprep.mubr.msk.bf16.mxu1 %vm4314_vm0, %v4313_v4 }
 0x27c   : > { %3773 = vmatprep.subr.bf16.mxu1 %v4313_v4 }
 0x282   : > { %3764 = vmatmul.mubr.msk.bf16.vlgmr.msra.gmra.mrb[24].mxu1 %vm1666_vm1, %v1061_v11 }
 0x283   : > { %3775 = vmatprep.mubr.msk.bf16.mxu1 %vm4314_vm0, %v4313_v4  ;;  %3774 = vmatpush3.bf16.msra.mxu1 %v2183_v50 }
 0x284   : > { %3785 = vmatprep.subr.bf16.mxu1 %v4313_v4 }
 0x32d   : > { %v1707_v51 = vpop.f32.mrb[4].mxu1 }
 0x32e   : > { %v3723_v52 = vpop.f32.mrb[5].mxu1  ;;  %v2036_v53 = vsel %vm2035_vm3, %v1707_v51, -inf }
 0x32f   : > { %2037 = vmax.xlane.f32.xlu0 %v2036_v53  ;;  %v1710_v54 = vpop.f32.mrb[6].mxu1 }
 0x330   : > { %v3724_v56 = vpop.f32.mrb[7].mxu1 }
 0x332   : > { %v1891_v57 = vpop.f32.mrb[4].mxu0 }
 0x333   : > { %v3747_v63 = vpop.f32.mrb[5].mxu0  ;;  %v2048_v0 = vsel %vm2035_vm3, %v1891_v57, -inf }
 0x334   : > { %2049 = vmax.xlane.f32.xlu1 %v2048_v0  ;;  %v1894_v5 = vpop.f32.mrb[6].mxu0 }
 0x335   : > { %v1753_v2 = vpop.f32.mrb[8].mxu1  ;;  %v3748_v6 = vpop.f32.mrb[7].mxu0 }
 0x336   : > { %v3729_v55 = vpop.f32.mrb[9].mxu1  ;;  %v2039_v11 = vsel %vm2035_vm3, %v1753_v2, -inf }
 0x337   : > { %v1756_v7 = vpop.f32.mrb[10].mxu1 }
 0x338   : > { %v3730_v10 = vpop.f32.mrb[11].mxu1  ;;  %2040 = vmax.xlane.f32.xlu1 %v2039_v11 }
 0x33a   : > { %v4911_v12 = vpop.f32.mrb[8].mxu0 }
 0x33b   : > { %v3759_v13 = vpop.f32.mrb[9].mxu0  ;;  %v2054_v14 = vsel %vm2035_vm3, %v4911_v12, -inf }
 0x33c   : > { %2055 = vmax.xlane.f32.xlu1 %v2054_v14  ;;  %v1986_v16 = vpop.f32.mrb[10].mxu0 }
 0x33d   : > { %v1799_v15 = vpop.f32.mrb[12].mxu1  ;;  %v3760_v19 = vpop.f32.mrb[11].mxu0 }
 0x33e   : > { %v3735_v17 = vpop.f32.mrb[13].mxu1  ;;  %v2042_v18 = vsel %vm2035_vm3, %v1799_v15, -inf }
 0x33f   : > { %2043 = vmax.xlane.f32.xlu0 %v2042_v18  ;;  %v1802_v20 = vpop.f32.mrb[14].mxu1 }
 0x340   : > { %v3736_v21 = vpop.f32.mrb[15].mxu1 }
 0x345   : > { %v1845_v22 = vpop.f32.mrb[16].mxu1 }
 0x346   : > { %v3741_v23 = vpop.f32.mrb[17].mxu1  ;;  %v2045_v24 = vsel %vm2035_vm3, %v1845_v22, -inf }
 0x347   : > { %2046 = vmax.xlane.f32.xlu0 %v2045_v24  ;;  %v1848_v25 = vpop.f32.mrb[18].mxu1 }
 0x348   : > { %v3742_v26 = vpop.f32.mrb[19].mxu1 }
 0x34d   : > { %v1937_v27 = vpop.f32.mrb[20].mxu1  ;;  %1377 = vrot.lane.b32.xlu1 %v4722_v46, %s4319_s18 }
 0x34e   : > { %v3753_v32 = vpop.f32.mrb[21].mxu1  ;;  %v2051_v35 = vsel %vm2035_vm3, %v1937_v27, -inf }
 0x34f   : > { %2052 = vmax.xlane.f32.xlu0 %v2051_v35  ;;  %v1940_v36 = vpop.f32.mrb[22].mxu1 }
 0x350   : > { %v3754_v59 = vpop.f32.mrb[23].mxu1 }
 0x355   : > { %v2029_v60 = vpop.f32.mrb[24].mxu1 }
 0x356   : > { %v3765_v28 = vpop.f32.mrb[25].mxu1  ;;  %v2057_v29 = vsel %vm2035_vm3, %v2029_v60, -inf }
 0x357   : > { %2058 = vmax.xlane.f32.xlu0 %v2057_v29  ;;  %v2032_v33 = vpop.f32.mrb[26].mxu1  ;;  %v1661_v28 = vpack.c.bf16 %v4902_v8, %v4902_v8 }
 0x358   : > { %v3766_v34 = vpop.f32.mrb[27].mxu1 }
 0x359   : > { %v2275_v33 = vsel %vm2135_vm2, %v1661_v28, 0 }
 0x36d   : > { %1374 = vrot.lane.b32.xlu0 %v4722_v46, %s4318_s26 }
 0x3bc   : > { %v2038_v31 = vpop.xlane.xlu0 %2037 }
 0x3bd   : > { %v2060_v37 = vsub.f32 %v1707_v51, %v2038_v31 }
 0x3bf   : > { %v2068_v38 = vmul.f32 1.442695, %v2060_v37 }
 0x3c1   : > { %4030 = vpow2.f32 %v2068_v38  ;;  %v2050_v39 = vpop.xlane.xlu1 %2049 }
 0x3c2   : > { %v2064_v40 = vsub.f32 %v1891_v57, %v2050_v39 }
 0x3c4   : > { %v2076_v41 = vmul.f32 1.442695, %v2064_v40 }
 0x3c5   : > { %v2041_v42 = vpop.xlane.xlu1 %2040 }
 0x3c6   : > { %4032 = vpow2.f32 %v2076_v41  ;;  %v2061_v43 = vsub.f32 %v1753_v2, %v2041_v42 }
 0x3c8   : > { %v2070_v44 = vmul.f32 1.442695, %v2061_v43 }
 0x3ca   : > { %4034 = vpow2.f32 %v2070_v44 }
 0x3cb   : > { %v4031_v45 = vpop.eup %4030 }
 0x3cc   : > { %v2044_v47 = vpop.xlane.xlu0 %2043  ;;  %v2084_v61 = vsel %vm2035_vm3, %v4031_v45, 0.0 }
 0x3cd   : > { %v2062_v9 = vsub.f32 %v1799_v15, %v2044_v47  ;;  %2085 = vadd.xlane.f32.xlu1 %v2084_v61  ;;  %v2056_v15 = vpop.xlane.xlu1 %2055 }
 0x3ce   : > { %v2066_v16 = vsub.f32 %v4911_v12, %v2056_v15 }
 0x3cf   : > { %v2072_v48 = vmul.f32 1.442695, %v2062_v9 }
 0x3d0   : > { %v4924_v49 = vpop.eup %4032  ;;  %v2080_v17 = vmul.f32 1.442695, %v2066_v16 }
 0x3d1   : > { %4036 = vpow2.f32 %v2072_v48  ;;  %v2096_v50 = vsel %vm2035_vm3, %v4924_v49, 0.0  ;;  %v1378_v21 = vpop.permute.xlu1 %1377 }
 0x3d2   : > { %2097 = vadd.xlane.f32.xlu0 %v2096_v50 }
 0x3d4   : > { %v2047_v51 = vpop.xlane.xlu0 %2046  ;;  %v4035_v52 = vpop.eup %4034 }
 0x3d5   : > { %v2063_v53 = vsub.f32 %v1845_v22, %v2047_v51  ;;  %v2087_v54 = vsel %vm2035_vm3, %v4035_v52, 0.0 }
 0x3d6   : > { %2088 = vadd.xlane.f32.xlu0 %v2087_v54 }
 0x3d7   : > { %v2074_v56 = vmul.f32 1.442695, %v2063_v53 }
 0x3d9   : > { %4038 = vpow2.f32 %v2074_v56 }
 0x3db   : > { %v4037_v57 = vpop.eup %4036 }
 0x3dc   : > { %v2053_v63 = vpop.xlane.xlu0 %2052  ;;  %v2090_v0 = vsel %vm2035_vm3, %v4037_v57, 0.0 }
 0x3dd   : > { %v2065_v2 = vsub.f32 %v1937_v27, %v2053_v63  ;;  %2091 = vadd.xlane.f32.xlu1 %v2090_v0  ;;  %v1660_v27 = vpack.c.bf16 %v4900_v62, %v4900_v62 }
 0x3df   : > { %v2078_v5 = vmul.f32 1.442695, %v2065_v2  ;;  %v2229_v35 = vsel %vm2135_vm2, %v1660_v27, 0 }
 0x3e1   : > { %4040 = vpow2.f32 %v2078_v5 }
 0x3e3   : > { %v4039_v55 = vpop.eup %4038 }
 0x3e4   : > { %v2093_v6 = vsel %vm2035_vm3, %v4039_v55, 0.0  ;;  %v2059_v11 = vpop.xlane.xlu0 %2058 }
 0x3e5   : > { %2094 = vadd.xlane.f32.xlu0 %v2093_v6  ;;  %v2067_v13 = vsub.f32 %v2029_v60, %v2059_v11 }
 0x3e7   : > { %v2082_v14 = vmul.f32 1.442695, %v2067_v13 }
 0x3e8   : > { %v1375_v23 = vpop.permute.xlu0 %1374 }
 0x3e9   : > { %4042 = vpow2.f32 %v2082_v14 }
 0x3ea   : > { %4044 = vpow2.f32 %v2080_v17 }
 0x3eb   : > { %v4931_v7 = vpop.eup %4040 }
 0x3ec   : > { %v2099_v10 = vsel %vm2035_vm3, %v4931_v7, 0.0 }
 0x3ed   : > { %2100 = vadd.xlane.f32.xlu1 %v2099_v10 }
 0x3f3   : > { %v4940_v18 = vpop.eup %4042 }
 0x3f4   : > { %v2105_v19 = vsel %vm2035_vm3, %v4940_v18, 0.0  ;;  %v4944_v20 = vpop.eup %4044 }
 0x3fb   : > { %1383 = vrot.lane.b32.xlu0 %v4722_v46, %s4321_s22 }
 0x3fe   : > { %1380 = vrot.lane.b32.xlu1 %v4722_v46, %s4320_s10  ;;  %v2102_v46 = vsel %vm2035_vm3, %v4944_v20, 0.0 }
 0x41a   : > { %2106 = vadd.xlane.f32.xlu0 %v2105_v19 }
 0x422   : > { %2103 = vadd.xlane.f32.xlu1 %v2102_v46 }
 0x45a   : > { %v2086_v22 = vpop.xlane.xlu1 %2085 }
 0x45b   : > { %4046 = vrcp.f32 %v2086_v22 }
 0x45f   : > { %v2098_v12 = vpop.xlane.xlu0 %2097 }
 0x463   : > { %v2089_v24 = vpop.xlane.xlu0 %2088 }
 0x464   : > { %4048 = vrcp.f32 %v2089_v24 }
 0x465   : > { %v4047_v25 = vpop.eup %4046 }
 0x466   : > { %v2116_v26 = vmul.f32 %v4047_v25, %v4031_v45 }
 0x468   : > { %v2124_v32 = vpack.c.bf16 %v2116_v26, %v2116_v26 }
 0x46a   : > { %3770 = vmatmul.mubr.msk.bf16.vlgmr.msra.gmra.mrb[12].mxu0 %vm2035_vm3, %v2124_v32  ;;  %v2092_v36 = vpop.xlane.xlu1 %2091 }
 0x46b   : > { %3780 = vmatpush3.bf16.msra.mxu0 %v2229_v35  ;;  %4050 = vrcp.f32 %v2092_v36  ;;  %3781 = vmatprep.mubr.msk.bf16.mxu0 %vm4314_vm0, %v4313_v4 }
 0x46c   : > { %3791 = vmatprep.subr.bf16.mxu0 %v4313_v4 }
 0x46e   : > { %v4049_v59 = vpop.eup %4048 }
 0x46f   : > { %v2117_v60 = vmul.f32 %v4049_v59, %v4035_v52 }
 0x471   : > { %v2125_v62 = vpack.c.bf16 %v2117_v60, %v2117_v60 }
 0x472   : > { %v2095_v29 = vpop.xlane.xlu0 %2094 }
 0x473   : > { %4052 = vrcp.f32 %v2095_v29  ;;  %3776 = vmatmul.mubr.msk.bf16.vlgmr.msra.gmra.mrb[28].mxu1 %vm2035_vm3, %v2125_v62 }
 0x474   : > { %3786 = vmatpush3.bf16.msra.mxu1 %v2275_v33  ;;  %3787 = vmatprep.mubr.msk.bf16.mxu1 %vm4314_vm0, %v4313_v4  ;;  %4054 = vrcp.f32 %v2098_v12 }
 0x475   : > { %v4051_v34 = vpop.eup %4050  ;;  %3797 = vmatprep.subr.bf16.mxu1 %v4313_v4 }
 0x476   : > { %v2118_v31 = vmul.f32 %v4051_v34, %v4037_v57  ;;  %v1384_v38 = vpop.permute.xlu0 %1383 }
 0x477   : > { %v1434_v40 = vcombine.low %v1378_v21, %v1384_v38  ;;  %v1435_v41 = vcombine.high %v1378_v21, %v1384_v38 }
 0x478   : > { %v2126_v37 = vpack.c.bf16 %v2118_v31, %v2118_v31 }
 0x479   : > { %v1442_v61 = vrot.slane %v1434_v40, %v4731_v58  ;;  %v1449_v9 = vrot.slane %v1435_v41, %v4731_v58 }
 0x47a   : > { %3782 = vmatmul.mubr.msk.bf16.vlgmr.msra.gmra.mrb[16].mxu0 %vm2035_vm3, %v2126_v37  ;;  %v2101_v8 = vpop.xlane.xlu1 %2100 }
 0x47b   : > { %3793 = vmatprep.mubr.msk.bf16.mxu0 %vm4314_vm0, %v4313_v4  ;;  %4056 = vrcp.f32 %v2101_v8 }
 0x47d   : > { %v4053_v39 = vpop.eup %4052 }
 0x47e   : > { %v2119_v42 = vmul.f32 %v4053_v39, %v4039_v55  ;;  %v1381_v43 = vpop.permute.xlu1 %1380  ;;  %v4055_v46 = vpop.eup %4054 }
 0x47f   : > { %v1418_v44 = vcombine.low %v1375_v23, %v1381_v43  ;;  %v1419_v45 = vcombine.high %v1375_v23, %v1381_v43  ;;  %v2120_v35 = vmul.f32 %v4055_v46, %v4924_v49 }
 0x480   : > { %v2127_v47 = vpack.c.bf16 %v2119_v42, %v2119_v42 }
 0x481   : > { %v1426_v48 = vrot.slane %v1418_v44, %v4731_v58  ;;  %v1433_v50 = vrot.slane %v1419_v45, %v4731_v58  ;;  %v2128_v34 = vpack.c.bf16 %v2120_v35, %v2120_v35 }
 0x482   : > { %3788 = vmatmul.mubr.msk.bf16.vlgmr.msra.gmra.mrb[32].mxu1 %vm2035_vm3, %v2127_v47 }
 0x483   : > { %v1482_v51 = vcombine.low %v1426_v48, %v1442_v61  ;;  %v1483_v52 = vcombine.high %v1426_v48, %v1442_v61  ;;  %v1498_v53 = vcombine.low %v1433_v50, %v1449_v9  ;;  %v1499_v54 = vcombine.high %v1433_v50, %v1449_v9  ;;  %3799 = vmatprep.mubr.msk.bf16.mxu1 %vm4314_vm0, %v4313_v4 }
 0x485   : > { %v1490_v56 = vrot.slane %v1482_v51, %v4734_v1  ;;  %v1497_v57 = vrot.slane %v1483_v52, %v4734_v1  ;;  %v1506_v63 = vrot.slane %v1498_v53, %v4734_v1  ;;  %v1513_v0 = vrot.slane %v1499_v54, %v4734_v1  ;;  %v4057_v24 = vpop.eup %4056 }
 0x486   : > { %v2121_v36 = vmul.f32 %v4057_v24, %v4931_v7 }
 0x487   : > { %v3548_v2 = vcombine.low %v1490_v56, %v1497_v57  ;;  %v3550_v5 = vcombine.high %v1490_v56, %v1497_v57  ;;  %v3552_v55 = vcombine.low %v1506_v63, %v1513_v0  ;;  %v3554_v6 = vcombine.high %v1506_v63, %v1513_v0 }
 0x488   : > { %v2129_v31 = vpack.c.bf16 %v2121_v36, %v2121_v36  ;;  %v3983_v36 = vld [vmem:[%s4623_s20 + $0x8] sm:$0xff]  }
 0x489   : > { %v1537_v10 = vrot.slane %v3548_v2, %v4731_v58  ;;  %v1553_v11 = vrot.slane %v3550_v5, %v4731_v58  ;;  %v1569_v13 = vrot.slane %v3552_v55, %v4731_v58  ;;  %v1585_v14 = vrot.slane %v3554_v6, %v4731_v58 }
 0x48b   : > { %v1602_v15 = vcombine.low %v1537_v10, %v1553_v11  ;;  %v1634_v16 = vcombine.low %v1569_v13, %v1585_v14  ;;  %v1603_v17 = vcombine.high %v1537_v10, %v1553_v11  ;;  %v1635_v19 = vcombine.high %v1569_v13, %v1585_v14 }
 0x48d   : > { %v1610_v21 = vrot.slane %v1602_v15, %v4734_v1  ;;  %v1642_v22 = vrot.slane %v1634_v16, %v4734_v1  ;;  %v1617_v23 = vrot.slane %v1603_v17, %v4734_v1  ;;  %v1649_v12 = vrot.slane %v1635_v19, %v4734_v1 }
 0x48f   : > { %v1654_v25 = vcombine.low %v1610_v21, %v1642_v22  ;;  %v1655_v26 = vcombine.high %v1610_v21, %v1642_v22  ;;  %v1656_v27 = vcombine.low %v1617_v23, %v1649_v12  ;;  %v1657_v32 = vcombine.high %v1617_v23, %v1649_v12 }
 0x491   : > { %v1662_v59 = vpack.c.bf16 %v1654_v25, %v1654_v25  ;;  %v1663_v60 = vpack.c.bf16 %v1655_v26, %v1655_v26  ;;  %v1664_v62 = vpack.c.bf16 %v1656_v27, %v1656_v27  ;;  %v1665_v33 = vpack.c.bf16 %v1657_v32, %v1657_v32  ;;  %v3982_v25 = vld [vmem:[%s4623_s20] sm:$0xff]  }
 0x493   : > { %v2321_v28 = vsel %vm2135_vm2, %v1662_v59, 0  ;;  %v2367_v29 = vsel %vm2135_vm2, %v1663_v60, 0  ;;  %v2413_v49 = vsel %vm2135_vm2, %v1664_v62, 0  ;;  %v2459_v7 = vsel %vm2135_vm2, %v1665_v33, 0 }
 0x494   : > { %3792 = vmatpush3.bf16.msra.mxu0 %v2321_v28  ;;  %3798 = vmatpush3.bf16.msra.mxu1 %v2367_v29 }
 0x495   : > { %3803 = vmatprep.subr.bf16.mxu0 %v4313_v4  ;;  %3809 = vmatprep.subr.bf16.mxu1 %v4313_v4 }
 0x497   : > { %3794 = vmatmul.mubr.msk.bf16.vlgmr.msra.gmra.mrb[20].mxu0 %vm2035_vm3, %v2128_v34  ;;  %3800 = vmatmul.mubr.msk.bf16.vlgmr.msra.gmra.mrb[36].mxu1 %vm2035_vm3, %v2129_v31 }
 0x498   : > { %3804 = vmatpush3.bf16.msra.mxu0 %v2413_v49  ;;  %3810 = vmatpush3.bf16.msra.mxu1 %v2459_v7  ;;  %v3984_v49 = vld [vmem:[%s4623_s20 + $0x10] sm:$0xff]  }
 0x499   : > { %3811 = vmatprep.mubr.msk.bf16.mxu1 %vm4314_vm0, %v4313_v4  ;;  %3805 = vmatprep.mubr.msk.bf16.mxu0 %vm4314_vm0, %v4313_v4 }
 0x49a   : > { %3815 = vmatprep.subr.bf16.mxu0 %v4313_v4 }
 0x4a7   : > { %v2107_v37 = vpop.xlane.xlu0 %2106 }
 0x4a8   : > { %4058 = vrcp.f32 %v2107_v37 }
 0x4af   : > { %v2104_v38 = vpop.xlane.xlu1 %2103 }
 0x4b0   : > { %4060 = vrcp.f32 %v2104_v38 }
 0x4b2   : > { %v4059_v8 = vpop.eup %4058 }
 0x4b3   : > { %v2123_v39 = vmul.f32 %v4059_v8, %v4940_v18 }
 0x4b5   : > { %v2131_v40 = vpack.c.bf16 %v2123_v39, %v2123_v39  ;;  %v3985_v39 = vld [vmem:[%s4623_s20 + $0x18] sm:$0xff]  }
 0x4b7   : > { %3812 = vmatmul.mubr.msk.bf16.vlgmr.msra.gmra.mrb[40].mxu1 %vm2035_vm3, %v2131_v40 }
 0x4b8   : > { %3067 = vmatprep.mubr.bf16.mxu1 %v4312_v3 }
 0x4ba   : > { %v4061_v41 = vpop.eup %4060 }
 0x4bb   : > { %v2122_v42 = vmul.f32 %v4061_v41, %v4944_v20 }
 0x4bd   : > { %v2130_v43 = vpack.c.bf16 %v2122_v42, %v2122_v42 }
 0x4bf   : > { %3806 = vmatmul.mubr.msk.bf16.vlgmr.msra.gmra.mrb[24].mxu0 %vm2035_vm3, %v2130_v43 }
 0x4c0   : > { %3831 = vmatprep.mubr.msk.bf16.mxu0 %vm4314_vm0, %v4313_v4  ;;  %3816 = vmatpush3.bf16.msra.mxu0 %v3982_v25 }
 0x4c1   : > { %3817 = vmatprep.subr.bf16.mxu0 %v4313_v4 }
 0x4c4   : > { %3818 = vmatpush3.bf16.msra.mxu0 %v3983_v36 }
 0x4c5   : > { %3819 = vmatprep.subr.bf16.mxu0 %v4313_v4 }
 0x4c8   : > { %3820 = vmatpush3.bf16.msra.mxu0 %v3984_v49 }
 0x4c9   : > { %3821 = vmatprep.subr.bf16.mxu0 %v4313_v4 }
 0x4cc   : > { %3822 = vmatpush3.bf16.msra.mxu0 %v3985_v39 }
 0x4cd   : > { %3823 = vmatprep.subr.bf16.mxu0 %v4313_v4 }
 0x53d   : > { %v2173_v44 = vpop.f32.mrb[12].mxu0 }
 0x53e   : > { %v3771_v45 = vpop.f32.mrb[13].mxu0 }
 0x53f   : > { %v2176_v47 = vpop.f32.mrb[14].mxu0 }
 0x540   : > { %v3772_v61 = vpop.f32.mrb[15].mxu0 }
 0x546   : > { %v2219_v9 = vpop.f32.mrb[28].mxu1 }
 0x547   : > { %v3777_v18 = vpop.f32.mrb[29].mxu1 }
 0x548   : > { %v2222_v48 = vpop.f32.mrb[30].mxu1  ;;  %v3987_v18 = vld [vmem:[%s4623_s20 + $0x28] sm:$0xff]  }
 0x549   : > { %v3778_v50 = vpop.f32.mrb[31].mxu1 }
 0x54d   : > { %v2265_v51 = vpop.f32.mrb[16].mxu0 }
 0x54e   : > { %v2501_v52 = vcombine.low %v2173_v44, %v2265_v51  ;;  %v2502_v3 = vcombine.high %v2173_v44, %v2265_v51  ;;  %v3783_v53 = vpop.f32.mrb[17].mxu0 }
 0x54f   : > { %v2268_v54 = vpop.f32.mrb[18].mxu0 }
 0x550   : > { %v3784_v20 = vpop.f32.mrb[19].mxu0  ;;  %v2509_v5 = vrot.slane %v2501_v52, %v4731_v58  ;;  %v2516_v55 = vrot.slane %v2502_v3, %v4731_v58 }
 0x555   : > { %v2311_v56 = vpop.f32.mrb[32].mxu1 }
 0x556   : > { %v2517_v57 = vcombine.low %v2219_v9, %v2311_v56  ;;  %v2518_v63 = vcombine.high %v2219_v9, %v2311_v56  ;;  %v3789_v0 = vpop.f32.mrb[33].mxu1  ;;  %v3986_v9 = vld [vmem:[%s4623_s20 + $0x20] sm:$0xff]  }
 0x557   : > { %v2314_v2 = vpop.f32.mrb[34].mxu1  ;;  %3824 = vmatpush3.bf16.msra.mxu0 %v3986_v9  ;;  %v2817_v9 = vsub.s32 1, %v4693_v30 }
 0x558   : > { %v2525_v6 = vrot.slane %v2517_v57, %v4731_v58  ;;  %v2532_v10 = vrot.slane %v2518_v63, %v4731_v58  ;;  %v3790_v11 = vpop.f32.mrb[35].mxu1  ;;  %3825 = vmatprep.subr.bf16.mxu0 %v4313_v4 }
 0x55a   : > { %v2565_v13 = vcombine.low %v2509_v5, %v2525_v6  ;;  %v2566_v14 = vcombine.high %v2509_v5, %v2525_v6  ;;  %v2581_v15 = vcombine.low %v2516_v55, %v2532_v10  ;;  %v2582_v16 = vcombine.high %v2516_v55, %v2532_v10 }
 0x55b   : > { %3826 = vmatpush3.bf16.msra.mxu0 %v3987_v18  ;;  %v5074_v18 = vld [vmem:[%s4647_s21] sm:$0xff] }
 0x55c   : > { %v2573_v17 = vrot.slane %v2565_v13, %v4734_v1  ;;  %v2580_v19 = vrot.slane %v2566_v14, %v4734_v1  ;;  %v2589_v46 = vrot.slane %v2581_v15, %v4734_v1  ;;  %v2596_v21 = vrot.slane %v2582_v16, %v4734_v1  ;;  %3827 = vmatprep.subr.bf16.mxu0 %v4313_v4 }
 0x55e   : > { %v3571_v22 = vcombine.low %v2573_v17, %v2580_v19  ;;  %v3573_v23 = vcombine.high %v2573_v17, %v2580_v19  ;;  %v3575_v12 = vcombine.low %v2589_v46, %v2596_v21  ;;  %v3577_v24 = vcombine.high %v2589_v46, %v2596_v21  ;;  %v3988_v46 = vld [vmem:[%s4623_s20 + $0x30] sm:$0xff]  }
 0x55f   : > { %3828 = vmatpush3.bf16.msra.mxu0 %v3988_v46  ;;  %v4010_v46 = vld [vmem:[%s4629_s23 + $0x64] ss:$8 sps:$4 sm:$0xff]  }
 0x560   : > { %v2645_v26 = vrot.slane %v3571_v22, %v4731_v58  ;;  %v2661_v27 = vrot.slane %v3573_v23, %v4731_v58  ;;  %v2677_v32 = vrot.slane %v3575_v12, %v4731_v58  ;;  %v2693_v35 = vrot.slane %v3577_v24, %v4731_v58  ;;  %3829 = vmatprep.subr.bf16.mxu0 %v4313_v4 }
 0x562   : > { %v2702_v59 = vcombine.high %v2645_v26, %v2661_v27  ;;  %v2734_v60 = vcombine.high %v2677_v32, %v2693_v35  ;;  %v2701_v28 = vcombine.low %v2645_v26, %v2661_v27  ;;  %v2733_v29 = vcombine.low %v2677_v32, %v2693_v35  ;;  %v3989_v32 = vld [vmem:[%s4623_s20 + $0x38] sm:$0xff]  }
 0x563   : > { %3830 = vmatpush3.bf16.msra.mxu0 %v3989_v32 }
 0x564   : > { %v2716_v62 = vrot.slane %v2702_v59, %v4734_v1  ;;  %v2748_v33 = vrot.slane %v2734_v60, %v4734_v1  ;;  %v5024_v34 = vrot.slane %v2701_v28, %v4734_v1  ;;  %v5027_v31 = vrot.slane %v2733_v29, %v4734_v1 }
 0x566   : > { %v2767_v7 = vcombine.low %v2716_v62, %v2748_v33  ;;  %v2766_v37 = vcombine.high %v5024_v34, %v5027_v31  ;;  %v2768_v38 = vcombine.high %v2716_v62, %v2748_v33  ;;  %v2765_v8 = vcombine.low %v5024_v34, %v5027_v31 }
 0x568   : > { %2778 = vrot.lane.b32.xlu1 %v2767_v7, %s4320_s10  ;;  %2774 = vrot.lane.b32.xlu0 %v2766_v37, %s4321_s22 }
 0x56a   : > { %v2357_v40 = vpop.f32.mrb[20].mxu0  ;;  %v2403_v41 = vpop.f32.mrb[36].mxu1 }
 0x56b   : > { %v3795_v42 = vpop.f32.mrb[21].mxu0  ;;  %v3801_v43 = vpop.f32.mrb[37].mxu1 }
 0x56c   : > { %2782 = vrot.lane.b32.xlu1 %v2768_v38, %s4319_s18  ;;  %v2360_v44 = vpop.f32.mrb[22].mxu0  ;;  %v2406_v45 = vpop.f32.mrb[38].mxu1 }
 0x56d   : > { %v3796_v47 = vpop.f32.mrb[23].mxu0  ;;  %v3802_v61 = vpop.f32.mrb[39].mxu1 }
 0x58a   : > { %v2495_v48 = vpop.f32.mrb[40].mxu1 }
 0x58b   : > { %v2549_v50 = vcombine.low %v2403_v41, %v2495_v48  ;;  %v2550_v51 = vcombine.high %v2403_v41, %v2495_v48  ;;  %v3813_v52 = vpop.f32.mrb[41].mxu1  ;;  %v2818_v48 = vrot.slane %v5074_v18, %v2817_v9 }
 0x58c   : > { %v2498_v3 = vpop.f32.mrb[42].mxu1 }
 0x58d   : > { %v3814_v53 = vpop.f32.mrb[43].mxu1  ;;  %v2557_v0 = vrot.slane %v2549_v50, %v4731_v58  ;;  %v2564_v2 = vrot.slane %v2550_v51, %v4731_v58 }
 0x592   : > { %v2449_v54 = vpop.f32.mrb[24].mxu0 }
 0x593   : > { %v2533_v20 = vcombine.low %v2357_v40, %v2449_v54  ;;  %v2534_v56 = vcombine.high %v2357_v40, %v2449_v54  ;;  %v3807_v57 = vpop.f32.mrb[25].mxu0  ;;  %v4071_v54 = vld [vmem:[%s4645_s27] sm:$0xff] }
 0x594   : > { %v2452_v63 = vpop.f32.mrb[26].mxu0  ;;  %v3992_v57 = vld [vmem:[%s4629_s23 + $0x4] ss:$8 sps:$4 sm:$0xff]  }
 0x595   : > { %v2541_v5 = vrot.slane %v2533_v20, %v4731_v58  ;;  %v2548_v55 = vrot.slane %v2534_v56, %v4731_v58  ;;  %v3808_v6 = vpop.f32.mrb[27].mxu0  ;;  %v3990_v56 = vld [vmem:[%s4629_s23] ss:$8 sps:$4 sm:$0xff]   ;;  %v3995_v63 = vld [vmem:[%s4629_s23 + $0x14] ss:$8 sps:$4 sm:$0xff]   ;;  %3035 = vmatprep.subr.bf16.mxu1 %v3992_v57 }
 0x596   : > { %3036 = vmatpush1.bf16.msra.mxu1 %v3990_v56 }
 0x597   : > { %v2597_v10 = vcombine.low %v2541_v5, %v2557_v0  ;;  %v2598_v11 = vcombine.high %v2541_v5, %v2557_v0  ;;  %v2613_v13 = vcombine.low %v2548_v55, %v2564_v2  ;;  %v2614_v14 = vcombine.high %v2548_v55, %v2564_v2  ;;  %v3993_v0 = vld [vmem:[%s4629_s23 + $0x10] ss:$8 sps:$4 sm:$0xff]   ;;  %3037 = vmatprep.subr.bf16.mxu1 %v3995_v63  ;;  %v3998_v2 = vld [vmem:[%s4629_s23 + $0x24] ss:$8 sps:$4 sm:$0xff]   ;;  %v3996_v5 = vld [vmem:[%s4629_s23 + $0x20] ss:$8 sps:$4 sm:$0xff]  }
 0x599   : > { %v2605_v15 = vrot.slane %v2597_v10, %v4734_v1  ;;  %v2612_v16 = vrot.slane %v2598_v11, %v4734_v1  ;;  %v2621_v17 = vrot.slane %v2613_v13, %v4734_v1  ;;  %v2628_v19 = vrot.slane %v2614_v14, %v4734_v1  ;;  %v4001_v13 = vld [vmem:[%s4629_s23 + $0x34] ss:$8 sps:$4 sm:$0xff]   ;;  %v3999_v14 = vld [vmem:[%s4629_s23 + $0x30] ss:$8 sps:$4 sm:$0xff]  }
 0x59a   : > { %3038 = vmatpush1.bf16.msra.mxu1 %v3993_v0 }
 0x59b   : > { %v3572_v21 = vcombine.low %v2605_v15, %v2612_v16  ;;  %v3574_v22 = vcombine.high %v2605_v15, %v2612_v16  ;;  %v3576_v23 = vcombine.low %v2621_v17, %v2628_v19  ;;  %v3578_v12 = vcombine.high %v2621_v17, %v2628_v19  ;;  %3039 = vmatprep.subr.bf16.mxu1 %v3998_v2  ;;  %v4002_v15 = vld [vmem:[%s4629_s23 + $0x40] ss:$8 sps:$4 sm:$0xff]   ;;  %v4004_v16 = vld [vmem:[%s4629_s23 + $0x44] ss:$8 sps:$4 sm:$0xff]   ;;  %v4007_v17 = vld [vmem:[%s4629_s23 + $0x54] ss:$8 sps:$4 sm:$0xff]  }
 0x59c   : > { %v4005_v19 = vld [vmem:[%s4629_s23 + $0x50] ss:$8 sps:$4 sm:$0xff]  }
 0x59d   : > { %v2652_v24 = vrot.slane %v3572_v21, %v4731_v58  ;;  %v2668_v25 = vrot.slane %v3574_v22, %v4731_v58  ;;  %v2684_v26 = vrot.slane %v3576_v23, %v4731_v58  ;;  %v2700_v27 = vrot.slane %v3578_v12, %v4731_v58  ;;  %v4008_v21 = vld [vmem:[%s4629_s23 + $0x60] ss:$8 sps:$4 sm:$0xff]   ;;  %v4013_v22 = vld [vmem:[%s4629_s23 + $0x74] ss:$8 sps:$4 sm:$0xff]  }
 0x59e   : > { %3040 = vmatpush1.bf16.msra.mxu1 %v3996_v5  ;;  %v4014_v23 = vld [vmem:[%s4631_s2 + $0x40] sm:$0xff]  }
 0x59f   : > { %v2717_v35 = vcombine.low %v2652_v24, %v2668_v25  ;;  %v2749_v36 = vcombine.low %v2684_v26, %v2700_v27  ;;  %v2718_v59 = vcombine.high %v2652_v24, %v2668_v25  ;;  %v2750_v60 = vcombine.high %v2684_v26, %v2700_v27  ;;  %3041 = vmatprep.subr.bf16.mxu1 %v4001_v13  ;;  %v4015_v12 = vld [vmem:[%s4631_s2] sm:$0xff]   ;;  %v4016_v24 = vld [vmem:[%s4631_s2 + $0x48] sm:$0xff]   ;;  %v4011_v25 = vld [vmem:[%s4629_s23 + $0x70] ss:$8 sps:$4 sm:$0xff]   ;;  %s5199_s23 = sld [smem:[#allocation21_spill]] (!%p3619_p0) }
 0x5a0   : > { %3677 = vmatprep.subr.bf16.mxu0 %v4014_v23  ;;  %v4017_v26 = vld [vmem:[%s4631_s2 + $0x8] sm:$0xff]  }
 0x5a1   : > { %v2725_v28 = vrot.slane %v2717_v35, %v4734_v1  ;;  %v2757_v29 = vrot.slane %v2749_v36, %v4734_v1  ;;  %v2732_v4 = vrot.slane %v2718_v59, %v4734_v1  ;;  %v2764_v62 = vrot.slane %v2750_v60, %v4734_v1 }
 0x5a2   : > { %3042 = vmatpush1.bf16.msra.mxu1 %v3999_v14  ;;  %v2922_v36 = vsub.s32 2, %v4693_v30  ;;  %v2927_v59 = vsub.s32 3, %v4693_v30 }
 0x5a3   : > { %v2770_v33 = vcombine.high %v2725_v28, %v2757_v29  ;;  %v2769_v49 = vcombine.low %v2725_v28, %v2757_v29  ;;  %v2772_v7 = vcombine.high %v2732_v4, %v2764_v62  ;;  %v2771_v37 = vcombine.low %v2732_v4, %v2764_v62  ;;  %3043 = vmatprep.subr.bf16.mxu1 %v4004_v16 }
 0x5a4   : > { %v2923_v60 = vrot.slane %v5074_v18, %v2922_v36  ;;  %v2928_v4 = vrot.slane %v5074_v18, %v2927_v59 }
 0x5a5   : > { %2790 = vrot.lane.b32.xlu1 %v2770_v33, %s4315_s28  ;;  %2786 = vrot.lane.b32.xlu0 %v2769_v49, %s4318_s26 }
 0x5a6   : > { %3044 = vmatpush1.bf16.msra.mxu1 %v4002_v15 }
 0x5a7   : > { %3045 = vmatprep.subr.bf16.mxu1 %v4007_v17 }
 0x5a9   : > { %2798 = vrot.lane.b32.xlu1 %v2772_v7, %s4316_s16  ;;  %2794 = vrot.lane.b32.xlu0 %v2771_v37, %s4317_s11  ;;  %v4018_v7 = vld [vmem:[%s4631_s2 + $0x50] sm:$0xff]  }
 0x5aa   : > { %3046 = vmatpush1.bf16.msra.mxu1 %v4005_v19  ;;  %v4019_v37 = vld [vmem:[%s4631_s2 + $0x10] sm:$0xff]  }
 0x5ab   : > { %3047 = vmatprep.subr.bf16.mxu1 %v4010_v46 }
 0x5ae   : > { %3048 = vmatpush1.bf16.msra.mxu1 %v4008_v21 }
 0x5af   : > { %3049 = vmatprep.subr.bf16.mxu1 %v4013_v22 }
 0x5b2   : > { %3050 = vmatpush1.bf16.msra.mxu1 %v4011_v25 }
 0x5da   : > { %v2779_v58 = vpop.permute.xlu1 %2778  ;;  %v2775_v38 = vpop.permute.xlu0 %2774 }
 0x5db   : > { %v2801_v39 = vsel %vm1666_vm1, %v2765_v8, %v2775_v38  ;;  %v4021_v38 = vld [vmem:[%s4631_s2 + $0x18] sm:$0xff]  }
 0x5dc   : > { %v2803_v40 = vsel %vm2802_vm4, %v2801_v39, %v2779_v58  ;;  %v4020_v58 = vld [vmem:[%s4631_s2 + $0x58] sm:$0xff]   ;;  %v4022_v39 = vld [vmem:[%s4631_s2 + $0x60] sm:$0xff]  }
 0x5de   : > { %v2783_v1 = vpop.permute.xlu1 %2782 }
 0x5df   : > { %v2805_v41 = vsel %vm2804_vm5, %v2803_v40, %v2783_v1  ;;  %v4023_v1 = vld [vmem:[%s4631_s2 + $0x20] sm:$0xff]   ;;  %v4024_v40 = vld [vmem:[%s4631_s2 + $0x68] sm:$0xff]  }
 0x617   : > { %v2787_v42 = vpop.permute.xlu0 %2786  ;;  %v2791_v43 = vpop.permute.xlu1 %2790 }
 0x618   : > { %v2807_v44 = vsel %vm2806_vm6, %v2805_v41, %v2787_v42  ;;  %v4025_v41 = vld [vmem:[%s4631_s2 + $0x28] sm:$0xff]   ;;  %v4026_v42 = vld [vmem:[%s4631_s2 + $0x70] sm:$0xff]  }
 0x619   : > { %v2809_v45 = vsel %vm2808_vm7, %v2807_v44, %v2791_v43  ;;  %v4027_v43 = vld [vmem:[%s4631_s2 + $0x30] sm:$0xff]   ;;  %v4028_v44 = vld [vmem:[%s4631_s2 + $0x78] sm:$0xff]  }
 0x61b   : > { %v2795_v47 = vpop.permute.xlu0 %2794  ;;  %v2799_v61 = vpop.permute.xlu1 %2798 }
 0x61c   : > { %v2811_v34 = vsel %vm2810_vm8, %v2809_v45, %v2795_v47  ;;  %v4029_v45 = vld [vmem:[%s4631_s2 + $0x38] sm:$0xff]   ;;  %v2949_v47 = vsub.s32 4, %v4693_v30 }
 0x61d   : > { %v2813_v31 = vsel %vm2812_vm9, %v2811_v34, %v2799_v61  ;;  %v4072_v34 = vld [vmem:[%s4647_s21 + $0x8] sm:$0xff] }
 0x61e   : > { %v2814_v8 = vpack.c.bf16 %v2813_v31, %v2813_v31  ;;  %v2950_v61 = vrot.slane %v5074_v18, %v2949_v47  ;;  %v2954_v31 = vrot.slane %v4072_v34, %v2949_v47 }
 0x620   : > { %3832 = vmatmul.mubr.bf16.vlgmr.msra.gmra.mrb[28].mxu0 %v2814_v8 }
 0x621   : > { %3678 = vmatpush3.bf16.msra.mxu0 %v4015_v12 }
 0x622   : > { %3679 = vmatprep.subr.bf16.mxu0 %v4016_v24 }
 0x625   : > { %3680 = vmatpush3.bf16.msra.mxu0 %v4017_v26 }
 0x626   : > { %3681 = vmatprep.subr.bf16.mxu0 %v4018_v7 }
 0x629   : > { %3682 = vmatpush3.bf16.msra.mxu0 %v4019_v37 }
 0x62a   : > { %3683 = vmatprep.subr.bf16.mxu0 %v4020_v58 }
 0x62d   : > { %3684 = vmatpush3.bf16.msra.mxu0 %v4021_v38 }
 0x62e   : > { %3685 = vmatprep.subr.bf16.mxu0 %v4022_v39  ;;  %v3621_v39 = vld [vmem:[%s5199_s23 + $0x1] ss:$0 sm:$0xff] (!%p3619_p0) }
 0x631   : > { %3686 = vmatpush3.bf16.msra.mxu0 %v4023_v1 }
 0x632   : > { %3687 = vmatprep.subr.bf16.mxu0 %v4024_v40 }
 0x635   : > { %3688 = vmatpush3.bf16.msra.mxu0 %v4025_v41 }
 0x636   : > { %3689 = vmatprep.subr.bf16.mxu0 %v4026_v42 }
 0x639   : > { %3690 = vmatpush3.bf16.msra.mxu0 %v4027_v43 }
 0x63a   : > { %3691 = vmatprep.subr.bf16.mxu0 %v4028_v44 }
 0x63d   : > { %3692 = vmatpush3.bf16.msra.mxu0 %v4029_v45 }
 0x6f3   : > { %v2901_v50 = vpop.f32.mrb[28].mxu0 }
 0x6f4   : > { %v2902_v51 = vadd.f32 %v2901_v50, %v2818_v48  ;;  %v3833_v52 = vpop.f32.mrb[29].mxu0 }
 0x6f5   : > { %v2904_v3 = vpop.f32.mrb[30].mxu0 }
 0x6f6   : > { %v3834_v53 = vpop.f32.mrb[31].mxu0  ;;  %v2907_v20 = vadd.f32 %v4071_v54, %v2902_v51 }
 0x6f8   : > { %2908 = vadd.xlane.f32.xlu0 %v2907_v20 }
 0x785   : > { %v2909_v55 = vpop.xlane.xlu0 %2908 }
 0x786   : > { %v2911_v6 = vmul.f32 0.0078125, %v2909_v55 }
 0x788   : > { %v2912_v10 = vsub.f32 %v2907_v20, %v2911_v6 }
 0x78a   : > { %v2913_v11 = vmul.f32 %v2912_v10, %v2912_v10 }
 0x78c   : > { %2914 = vadd.xlane.f32.xlu1 %v2913_v11 }
 0x819   : > { %v2915_v27 = vpop.xlane.xlu1 %2914 }
 0x81a   : > { %v2916_v32 = vmul.f32 0.0078125, %v2915_v27  ;;  %v3274_v27 = vsub.s32 6, %v4693_v30 }
 0x81c   : > { %v2917_v35 = vadd.f32 1e-05, %v2916_v32  ;;  %v3279_v32 = vsub.s32 7, %v4693_v30 }
 0x81e   : > { %4062 = vrsqrt.f32 %v2917_v35  ;;  %v3275_v35 = vrot.slane %v5074_v18, %v3274_v27  ;;  %v3280_v59 = vrot.slane %v5074_v18, %v3279_v32 }
 0x828   : > { %v4063_v28 = vpop.eup %4062 }
 0x829   : > { %v2919_v29 = vmul.f32 %v4063_v28, %v2912_v10  ;;  %v3122_v10 = vsub.s32 5, %v4693_v30 }
 0x82b   : > { %v2924_v62 = vmul.f32 %v2923_v60, %v2919_v29  ;;  %v3123_v13 = vrot.slane %v5074_v18, %v3122_v10  ;;  %v3620_v18 = vld [vmem:[%s5199_s23] ss:$0 sm:$0xff] (!%p3619_p0) }
 0x82d   : > { %v2929_v33 = vadd.f32 %v2928_v4, %v2924_v62 }
 0x82f   : > { %v2946_v49 = vpack.c.bf16 %v2929_v33, %v2929_v33 }
 0x831   : > { %3068 = vmatmul.mubr.bf16.vlgmr.msra.gmra.mrb[44].mxu1 %v2946_v49 }
 0x904   : > { %v3069_v8 = vpop.f32.mrb[44].mxu1 }
 0x905   : > { %v3070_v9 = vadd.f32 %v3069_v8, %v2950_v61  ;;  %v3071_v48 = vpop.f32.mrb[45].mxu1 }
 0x906   : > { %v3072_v50 = vadd.f32 %v3071_v48, %v2954_v31  ;;  %v3073_v51 = vpop.f32.mrb[46].mxu1 }
 0x907   : > { %v3078_v52 = vmul.f32 0.70710677, %v3070_v9  ;;  %v3074_v3 = vpop.f32.mrb[47].mxu1  ;;  %v3076_v56 = vmul.f32 0.5, %v3070_v9 }
 0x908   : > { %v3079_v53 = vmul.f32 0.70710677, %v3072_v50  ;;  %v3077_v63 = vmul.f32 0.5, %v3072_v50 }
 0x909   : > { %4064 = verf.f32 %v3078_v52 }
 0x90a   : > { %4066 = verf.f32 %v3079_v53 }
 0x913   : > { %v4065_v54 = vpop.eup %4064 }
 0x914   : > { %v4067_v20 = vpop.eup %4066  ;;  %v3082_v57 = vadd.f32 1.0, %v4065_v54 }
 0x915   : > { %v3083_v0 = vadd.f32 1.0, %v4067_v20 }
 0x916   : > { %v3084_v2 = vmul.f32 %v3082_v57, %v3076_v56 }
 0x917   : > { %v3085_v5 = vmul.f32 %v3083_v0, %v3077_v63 }
 0x918   : > { %v3118_v6 = vpack.c.bf16 %v3084_v2, %v3084_v2 }
 0x919   : > { %v3119_v55 = vpack.c.bf16 %v3085_v5, %v3085_v5 }
 0x91b   : > { %3252 = vmatprep.mubr.bf16.mxu0 %v3119_v55 }
 0x91c   : > { %3253 = vmatmul.mubr.bf16.vlgmr.msra.gmra.mrb[32].mxu0 %v3118_v6 }
 0x9ef   : > { %v3693_v11 = vpop.f32.mrb[32].mxu0 }
 0x9f0   : > { %v3694_v14 = vpop.f32.mrb[33].mxu0 }
 0x9f1   : > { %v3695_v15 = vadd.f32 %v3694_v14, %v3693_v11  ;;  %v3696_v16 = vpop.f32.mrb[34].mxu0 }
 0x9f2   : > { %v3697_v17 = vpop.f32.mrb[35].mxu0 }
 0x9f3   : > { %v3255_v19 = vadd.f32 %v3695_v15, %v3123_v13 }
 0x9f5   : > { %v3260_v46 = vadd.f32 %v3255_v19, %v2929_v33 }
 0x9f7   : > { %3261 = vadd.xlane.f32.xlu0 %v3260_v46 }
 0xa84   : > { %v3262_v21 = vpop.xlane.xlu0 %3261 }
 0xa85   : > { %v3263_v22 = vmul.f32 0.0078125, %v3262_v21 }
 0xa87   : > { %v3264_v23 = vsub.f32 %v3260_v46, %v3263_v22 }
 0xa89   : > { %v3265_v12 = vmul.f32 %v3264_v23, %v3264_v23 }
 0xa8b   : > { %3266 = vadd.xlane.f32.xlu0 %v3265_v12 }
 0xb18   : > { %v3267_v24 = vpop.xlane.xlu0 %3266 }
 0xb19   : > { %v3268_v25 = vmul.f32 0.0078125, %v3267_v24 }
 0xb1b   : > { %v3269_v26 = vadd.f32 1e-05, %v3268_v25 }
 0xb1d   : > { %4068 = vrsqrt.f32 %v3269_v26 }
 0xb27   : > { %v4069_v36 = vpop.eup %4068 }
 0xb28   : > { %v3271_v60 = vmul.f32 %v4069_v36, %v3264_v23  ;;  %3286 = sbr.rel (%p3619_p0) target bundleno = 3174 (0xc66), region = 76 }
 0xb2a   : > { %v3276_v28 = vmul.f32 %v3275_v35, %v3271_v60 }
 0xb2c   : > { %v3281_v29 = vadd.f32 %v3280_v59, %v3276_v28 }
 0xb2e   : > { %3282 = vst [vmem:[%s4645_s27] sm:$0xff] %v3281_v29  ;;  %3289 = vadd.xlane.f32.xlu0 (!%p3619_p0), %v3281_v29 }
 0xbbb   : > { %v3290_v4 = vpop.xlane.xlu0 %3289 }
 0xbbc   : > { %v3291_v62 = vmul.f32 0.0078125, %v3290_v4 }
 0xbbe   : > { %v3292_v33 = vsub.f32 %v3281_v29, %v3291_v62 }
 0xbc0   : > { %v3293_v49 = vmul.f32 %v3292_v33, %v3292_v33 }
 0xbc2   : > { %3294 = vadd.xlane.f32.xlu0 %v3293_v49 }
 0xc4f   : > { %v3295_v30 = vpop.xlane.xlu0 %3294 }
 0xc50   : > { %v3296_v7 = vmul.f32 0.0078125, %v3295_v30 }
 0xc52   : > { %v3297_v37 = vadd.f32 1e-05, %v3296_v7 }
 0xc54   : > { %4073 = vrsqrt.f32 %v3297_v37 }
 0xc5e   : > { %v4074_v58 = vpop.eup %4073 }
 0xc5f   : > { %v3299_v38 = vmul.f32 %v4074_v58, %v3292_v33 }
 0xc61   : > { %v3304_v1 = vmul.f32 %v3620_v18, %v3299_v38 }
 0xc63   : > { %v3309_v40 = vadd.f32 %v3621_v39, %v3304_v1 }
 0xc65   : > { %3310 = vst [vmem:[%s4645_s27] sm:$0xff] %v3309_v40 }
 0xc66 PF: > { %s26_s8 = sadd.s32 1, %s4299_s8   ;;  %s5200_s30 = sld [smem:[#allocation13_spill]] }
 0xc67   : > { %p23_p2 = scmp.ge.s32.totalorder %s26_s8, 10   ;;  %s5201_s26 = sld [smem:[#allocation18_spill]] }
 0xc68   : > { %s5202_s28 = sld [smem:[#allocation15_spill]]  ;;  %s5203_s15 = sld [smem:[#allocation16_spill]] }
 0xc69   : > { %s5204_s13 = sld [smem:[#allocation17_spill]]  ;;  %s5205_s24 = smov %s4275_s25 }
 0xc6a   : > { %s5207_s27 = smov %s4291_s29  ;;  %25 = sbr.rel (!%p23_p2) target bundleno = 13 (0xd), region = 147 }
 0xc6c   : > { %s5206_s25 = smov %s5200_s30 }
 0xc6e   : > { %s5208_s29 = smov %s5203_s15 }
 0xc6f   : > { %s5209_s30 = smov %s5204_s13 }
 0xc71   :  { %3330 = vsyncpa [#allocation3], 1 }
 0xc72   :  { %3332 = vsyncpa [#allocation3 + $0x1], 1 }
 0xc73   :  { %3333 = vsyncpa [#allocation5], 1 }
 0xc74   :  { %3335 = vsyncpa [#allocation5 + $0x1], 1 }
 0xc75   :  { %3336 = vsyncpa [#allocation8], 1 }
 0xc76   :  { %3338 = vsyncpa [#allocation8 + $0x1], 1 }

// kernel: transformer_adapter_forward.3
= control target key start
LH: loop header
LB: loop body
LE: loop exit
PB: predicated region body
PF: predicated region fallthrough
CT: control target
= control target key end

     0   :  { %s8632_s0 = inlined_call_operand.vmem [shape: f32[2,8,128], index: 0, kind: input, shape index: {}]   ;;  %s8633_s1 = inlined_call_operand.vmem [shape: f32[2,8,128], index: 1, kind: input, shape index: {}]   ;;  %s8634_s2 = inlined_call_operand.vmem [shape: bf16[4,128,384], index: 2, kind: input, shape index: {}]   ;;  %s8635_s3 = inlined_call_operand.vmem [shape: bf16[4,128,128], index: 3, kind: input, shape index: {}]   ;;  %s8636_s4 = inlined_call_operand.hbm [shape: bf16[4,128,128], index: 4, kind: input, shape index: {}]   ;;  %s8637_s5 = inlined_call_operand.vmem [shape: bf16[4,128,256], index: 5, kind: input, shape index: {}]   ;;  %s8638_s6 = inlined_call_operand.hbm [shape: bf16[4,128,128], index: 6, kind: input, shape index: {}]   ;;  %s8639_s7 = inlined_call_operand.vmem [shape: bf16[4,128,256], index: 7, kind: input, shape index: {}]   ;;  %s8640_s8 = inlined_call_operand.hbm [shape: bf16[4,256,128], index: 8, kind: input, shape index: {}]   ;;  %s8641_s9 = inlined_call_operand.vmem [shape: f32[4,16,384], index: 9, kind: input, shape index: {}]   ;;  %s8642_s10 = inlined_call_operand.hbm [shape: f32[2,128], index: 10, kind: input, shape index: {}]   ;;  %s8643_s11 = inlined_call_operand.vmem [shape: f32[2,8,128], index: 11, kind: output, shape index: {}]  }
   0x1   :  { %8663 = sst [smem:[#allocation18_spill]] %s8632_s0 }
   0x2   :  { %8664 = sst [smem:[#allocation19_spill]] %s8634_s2 }
   0x3   :  { %8665 = sst [smem:[#allocation20_spill]] %s8635_s3 }
   0x4   :  { %8666 = sst [smem:[#allocation21_spill]] %s8636_s4 }
   0x5   :  { %8667 = sst [smem:[#allocation22_spill]] %s8637_s5 }
   0x6   :  { %8668 = sst [smem:[#allocation23_spill]] %s8638_s6 }
   0x7   :  { %8669 = sst [smem:[#allocation24_spill]] %s8639_s7 }
   0x8   :  { %8670 = sst [smem:[#allocation25_spill]] %s8640_s8 }
   0x9   :  { %8671 = sst [smem:[#allocation26_spill]] %s8641_s9 }
   0xa   :  { %8672 = sst [smem:[#allocation27_spill]] %s8642_s10 }
   0xb   :  { %8673 = sst [smem:[#allocation28_spill]] %s8643_s11 }
   0xc   :  { %16 = vsyncpa [#allocation3], 0 }
   0xd   :  { %18 = vsyncpa [#allocation3 + $0x1], 0 }
   0xe   :  { %19 = vsyncpa [#allocation5], 0 }
   0xf   :  { %21 = vsyncpa [#allocation5 + $0x1], 0 }
  0x10   :  { %22 = vsyncpa [#allocation8], 0  ;;  %s7330_s17 = smov 0   ;;  %s7332_s18 = smov 0  }
  0x11   :  { %s7334_s19 = smov 0   ;;  %s7336_s20 = smov 0  }
  0x12   :  { %s7338_s21 = smov 0   ;;  %s7340_s22 = smov 0  }
  0x13   :  { %s7342_s23 = smov 0   ;;  %s7344_s24 = smov 0  }
  0x14 LB: > { %8674 = sst [smem:[#allocation12_spill]] %s7230_s19  ;;  %s37_s25 = sadd.s32 1, %s7242_s22  ;;  %s7250_s24 = sphi %s7344_s24, %s28_s24   ;;  %s7246_s23 = sphi %s7342_s23, %s8713_s23   ;;  %s7242_s22 = sphi %s7340_s22, %s8712_s22   ;;  %s7238_s21 = sphi %s7338_s21, %s8711_s21   ;;  %s7234_s20 = sphi %s7336_s20, %s8710_s20   ;;  %s7230_s19 = sphi %s7334_s19, %s8709_s19   ;;  %s7226_s18 = sphi %s7332_s18, %s8715_s18   ;;  %s7222_s17 = sphi %s7330_s17, %s8714_s17  }
  0x15   : > { %8675 = sst [smem:[#allocation13_spill]] %s7242_s22  ;;  %s40_s26 = sadd.s32 1, %s7246_s23 }
  0x16   : > { %8676 = sst [smem:[#allocation14_spill]] %s7246_s23  ;;  %p38_p0 = scmp.ge.s32.totalorder %s37_s25, 4 }
  0x17   : > { %s151_s27 = sadd.s32 1, %s7230_s19  ;;  %p158_p1 = scmp.ne.s32.totalorder %s7230_s19, %s7226_s18 }
  0x18   : > { %p159_p2 = scmp.eq.s32.totalorder %s7250_s24, 0  ;;  %s8717_s25 = smov (%p38_p0, %s37_s25), 0 }
  0x19   : > { %8677 = sst [smem:[#allocation15_spill]] %s8717_s25  ;;  %s8719_s26 = smov (!%p38_p0, %s40_s26), %s7246_s23 }
  0x1a   : > { %s148_s28 = ssub.s32 %s7242_s22, %s8717_s25  ;;  %p160_p3 = por %p159_p2, %p158_p1 }
  0x1b   : > { %p42_p4 = scmp.ge.s32.totalorder %s8719_s26, 2  ;;  %p149_p5 = scmp.eq.s32.totalorder %s148_s28, 0 }
  0x1c   : > { %p6777_p6 = scmp.lt.s32.totalorder %s7250_s24, 8  ;;  %s7388_s30 = sand.u32 1, %s7230_s19  }
  0x1d   : > { %s8721_s26 = smov (%p42_p4, %s8719_s26), 0  ;;  %s8648_s12 = sshll.u32 %s7242_s22, 10 }
  0x1e   : > { %8678 = sst [smem:[#allocation16_spill]] %s8721_s26  ;;  %s8647_s13 = sshll.u32 %s7388_s30, 6 }
  0x1f   : > { %s7385_s29 = scalar_select %p149_p5, %s7230_s19, %s151_s27  }
  0x20   : > { %p7392_p7 = pnand %p6777_p6, %p160_p3  ;;  %s435_s15 = sand.u32 1, %s7250_s24  }
  0x21   : > { %8679 = sst [smem:[#allocation17_spill]] %s7385_s29  ;;  %s8681_s6 = sld [smem:[#allocation23_spill]] }
  0x22   : > { %s8680_s14 = scalar_select %p7392_p7, 1, 0 }
  0x23   : > { %s439_s27 = scalar_lea.vmem [#allocation4], %s8647_s13  ;;  %s7408_s23 = scalar_lea.sflag [#allocation5], %s435_s15 }
  0x24   : > { %s446_s26 = sshll.u32 %s439_s27, 4  ;;  %p7414_p9 = pneg %p7392_p7  ;;  %s7406_s26 = int_to_ptr.vmem [resolvable:$true] %s446_s26 }
  0x26   : > { %s8682_s19 = scalar_select %p7414_p9, 1, 0 }
  0x27   : > { %s7402_s25 = scalar_lea.hbm %s8681_s6, %s8648_s12  ;;  %s7063_s13 = scalar_lea.hbm %s8681_s6, 4096 }
  0x28   : > { %s7058_s29 = scalar_lea.hbm %s7402_s25, 1024  ;;  %p7064_p12 = scmp.lt.u32.totalorder %s7402_s25, %s8681_s6 }
  0x29   : > { %p7059_p8 = scmp.ne.s32.totalorder %s7402_s25, %s7058_s29  ;;  %p7065_p13 = scmp.lt.u32.totalorder %s7063_s13, %s7058_s29 }
  0x2a   : > { %p7067_p1 = scmp.lt.u32.totalorder %s7058_s29, %s7402_s25 }
  0x2b   : > { %p7061_p10 = pnand %p7414_p9, %p7059_p8  ;;  %p7066_p0 = por %p7065_p13, %p7064_p12 }
  0x2d   : > { %p7062_p11 = pneg %p7061_p10  ;;  %p7068_p2 = por %p7067_p1, %p7066_p0 }
  0x2f   : > { %p7069_p3 = pnand %p7068_p2, %p7062_p11 }
  0x31   : > { %7072 = shalt.err (!%p7069_p3)
}
  0x32   : > { %s7073_s15 = scalar_lea.vmem %s7406_s26, 1024  ;;  %s7252_s16 = smov [#allocation4]  }
  0x33   : > { %p7074_p4 = scmp.ne.s32.totalorder %s7406_s26, %s7073_s15  ;;  %s7078_s28 = sshll.u32 %s7252_s16, 4  ;;  %s7079_s28 = int_to_ptr.vmem [resolvable:$false] %s7078_s28 }
  0x34   : > { %s7080_s12 = scalar_lea.vmem %s7079_s28, 2048  ;;  %p7081_p8 = scmp.lt.s32.totalorder %s7406_s26, %s7079_s28 }
  0x35   : > { %p7076_p5 = pnand %p7074_p4, %p7414_p9  ;;  %p7082_p10 = scmp.lt.s32.totalorder %s7080_s12, %s7073_s15 }
  0x37   : > { %p7077_p6 = pneg %p7076_p5  ;;  %p7083_p12 = por %p7082_p10, %p7081_p8 }
  0x39   : > { %p7084_p13 = pnand %p7083_p12, %p7077_p6 }
  0x3b   : > { %7087 = shalt.err (!%p7084_p13)
}
  0x3c   : > { %s8650_s29 = smov 64   ;;  %s8652_s13 = smov 4  }
  0x3d   : > { %6772 = dma.hbm_to_vmem [thread:$0]  (!%p7392_p7), %s7402_s25, 1024, %s7406_s26, %s7408_s23, %s8650_s29, %s8650_s29, %s8652_s13  }
  0x3e   : > { %s8649_s27 = sadd.s32 4294967295, %s7250_s24   ;;  %p164_p11 = scmp.ne.s32.totalorder %s7226_s18, %s7222_s17 }
  0x3f   : > { %p7446_p0 = scmp.eq.s32.totalorder %s8649_s27, 0  ;;  %p6124_p1 = scmp.ge.s32.totalorder %s7250_s24, 1 }
  0x40   : > { %p352_p2 = scmp.lt.s32.totalorder %s7250_s24, 9  ;;  %s7255_s17 = smov [#allocation7]  }
  0x41   : > { %s8683_s15 = scalar_select %p7446_p0, 1, 0 }
  0x42   : > { %p7454_p3 = por %p7446_p0, %p164_p11  ;;  %p7458_p4 = pnand %p6124_p1, %p352_p2 }
  0x43   : > { %s365_s25 = sshll.u32 %s7255_s17, 4  ;;  %s8686_s26 = sshll.u32 %s7242_s22, 10  ;;  %s366_s25 = int_to_ptr.vmem [resolvable:$true] %s365_s25 }
  0x44   : > { %s8684_s16 = scalar_select %p7454_p3, 1, 0 }
  0x45   : > { %s8685_s28 = scalar_select %p7458_p4, 1, 0 }
  0x46   : > { %p6762_p5 = pneg %p7458_p4  ;;  %s8687_s4 = sld [smem:[#allocation21_spill]] }
  0x47   : > { %s8689_s6 = sshll.u32 %s7388_s30, 6  ;;  %s6133_s17 = sshll.u32 %s7388_s30, 7 }
  0x48   : > { %p7473_p6 = pnand %p6762_p5, %p7446_p0  ;;  %s410_s9 = scalar_lea.vmem [#allocation2], %s8689_s6 }
  0x49   : > { %s417_s11 = sshll.u32 %s410_s9, 4  ;;  %s8690_s10 = sld [smem:[#allocation27_spill]]  ;;  %s7479_s11 = int_to_ptr.vmem [resolvable:$true] %s417_s11 }
  0x4a   : > { %p7090_p10 = pneg %p7473_p6 }
  0x4c   : > { %s7469_s29 = scalar_lea.hbm %s8687_s4, %s8686_s26 }
  0x4f   : > { %s7088_s2 = scalar_lea.hbm %s8690_s10, 32 }
  0x50   : > { %p7089_p8 = scmp.ne.s32.totalorder %s8690_s10, %s7088_s2  ;;  %p7095_p11 = scmp.lt.u32.totalorder %s7088_s2, %s8690_s10 }
  0x52   : > { %p7091_p12 = pnand %p7090_p10, %p7089_p8 }
  0x54   : > { %p7092_p13 = pneg %p7091_p12 }
  0x56   : > { %p7097_p1 = pnand %p7095_p11, %p7092_p13 }
  0x58   : > { %7100 = shalt.err (!%p7097_p1)
}
  0x59   : > { %s7101_s6 = scalar_lea.vmem %s366_s25, 32  ;;  %p7109_p3 = scmp.lt.s32.totalorder %s366_s25, %s366_s25 }
  0x5a   : > { %p7102_p2 = scmp.ne.s32.totalorder %s366_s25, %s7101_s6  ;;  %p7110_p4 = scmp.lt.s32.totalorder %s7101_s6, %s7101_s6 }
  0x5c   : > { %p7104_p5 = pnand %p7102_p2, %p7090_p10  ;;  %p7111_p7 = por %p7110_p4, %p7109_p3 }
  0x5e   : > { %p7105_p0 = pneg %p7104_p5 }
  0x60   : > { %p7112_p9 = pnand %p7111_p7, %p7105_p0 }
  0x62   : > { %7115 = shalt.err (!%p7112_p9)
}
  0x63   : > { %6765 = dma.hbm_to_vmem [thread:$0]  (!%p7473_p6), %s8690_s10, 32, %s366_s25, [#allocation8]  }
  0x64   : > { %s407_s2 = scalar_lea.sflag [#allocation3], %s7388_s30  ;;  %s7116_s7 = scalar_lea.hbm %s7469_s29, 1024 }
  0x65   : > { %p7117_p8 = scmp.ne.s32.totalorder %s7469_s29, %s7116_s7  ;;  %p8691_p10 = scmp.ne.s32.totalorder %s8682_s19, 0 }
  0x66   : > { %s7121_s13 = scalar_lea.hbm %s8687_s4, 4096  ;;  %p7122_p7 = scmp.lt.u32.totalorder %s7469_s29, %s8687_s4 }
  0x67   : > { %p7119_p12 = pnand %p7117_p8, %p8691_p10  ;;  %p7123_p9 = scmp.lt.u32.totalorder %s7121_s13, %s7116_s7 }
  0x68   : > { %p7125_p4 = scmp.lt.u32.totalorder %s7116_s7, %s7469_s29 }
  0x69   : > { %p7120_p3 = pneg %p7119_p12  ;;  %p7124_p0 = por %p7123_p9, %p7122_p7 }
  0x6b   : > { %p7126_p13 = por %p7125_p4, %p7124_p0 }
  0x6d   : > { %p7127_p11 = pnand %p7126_p13, %p7120_p3 }
  0x6f   : > { %7130 = shalt.err (!%p7127_p11)
}
  0x70   : > { %s7131_s25 = scalar_lea.vmem %s7479_s11, 1024  ;;  %s7256_s6 = smov [#allocation2]  }
  0x71   : > { %p7132_p6 = scmp.ne.s32.totalorder %s7479_s11, %s7131_s25  ;;  %s7136_s3 = sshll.u32 %s7256_s6, 4  ;;  %s7137_s3 = int_to_ptr.vmem [resolvable:$false] %s7136_s3 }
  0x72   : > { %s7138_s5 = scalar_lea.vmem %s7137_s3, 2048  ;;  %p7139_p5 = scmp.lt.s32.totalorder %s7479_s11, %s7137_s3 }
  0x73   : > { %p7134_p1 = pnand %p7132_p6, %p8691_p10  ;;  %p7140_p8 = scmp.lt.s32.totalorder %s7138_s5, %s7131_s25 }
  0x75   : > { %p7135_p2 = pneg %p7134_p1  ;;  %p7141_p12 = por %p7140_p8, %p7139_p5 }
  0x77   : > { %p7142_p7 = pnand %p7141_p12, %p7135_p2 }
  0x79   : > { %7145 = shalt.err (!%p7142_p7)
}
  0x7a   : > { %p8692_p3 = scmp.ne.s32.totalorder %s8680_s14, 0  ;;  %s8693_s7 = smov 4  }
  0x7b   : > { %s8694_s9 = smov 64   ;;  %s6352_s27 = sshll.u32 %s7242_s22, 11 }
  0x7c   : > { %6769 = dma.hbm_to_vmem [thread:$0]  (!%p8692_p3), %s7469_s29, 1024, %s7479_s11, %s407_s2, %s8694_s9, %s8694_s9, %s8693_s7  }
  0x7d   : > { %s468_s13 = scalar_lea.vmem [#allocation6], %s6133_s17  ;;  %s8695_s8 = sld [smem:[#allocation25_spill]] }
  0x7e   : > { %s475_s26 = sshll.u32 %s468_s13, 4  ;;  %s7533_s26 = int_to_ptr.vmem [resolvable:$true] %s475_s26 }
  0x83   : > { %s7531_s6 = scalar_lea.hbm %s8695_s8, %s6352_s27  ;;  %s7151_s29 = scalar_lea.hbm %s8695_s8, 8192 }
  0x84   : > { %s7146_s3 = scalar_lea.hbm %s7531_s6, 2048  ;;  %p7152_p13 = scmp.lt.u32.totalorder %s7531_s6, %s8695_s8 }
  0x85   : > { %p7147_p9 = scmp.ne.s32.totalorder %s7531_s6, %s7146_s3  ;;  %p7153_p11 = scmp.lt.u32.totalorder %s7151_s29, %s7146_s3 }
  0x86   : > { %p7155_p1 = scmp.lt.u32.totalorder %s7146_s3, %s7531_s6 }
  0x87   : > { %p7149_p0 = pnand %p7147_p9, %p8691_p10  ;;  %p7154_p6 = por %p7153_p11, %p7152_p13 }
  0x89   : > { %p7150_p4 = pneg %p7149_p0  ;;  %p7156_p2 = por %p7155_p1, %p7154_p6 }
  0x8b   : > { %p7157_p5 = pnand %p7156_p2, %p7150_p4 }
  0x8d   : > { %7160 = shalt.err (!%p7157_p5)
}
  0x8e   : > { %s7161_s5 = scalar_lea.vmem %s7533_s26, 2048  ;;  %s7257_s27 = smov [#allocation6]  }
  0x8f   : > { %p7162_p8 = scmp.ne.s32.totalorder %s7533_s26, %s7161_s5  ;;  %s7166_s13 = sshll.u32 %s7257_s27, 4  ;;  %s7167_s13 = int_to_ptr.vmem [resolvable:$false] %s7166_s13 }
  0x90   : > { %s7168_s12 = scalar_lea.vmem %s7167_s13, 4096  ;;  %p7169_p9 = scmp.lt.s32.totalorder %s7533_s26, %s7167_s13 }
  0x91   : > { %p7164_p12 = pnand %p7162_p8, %p8691_p10  ;;  %p7170_p0 = scmp.lt.s32.totalorder %s7168_s12, %s7161_s5 }
  0x93   : > { %p7165_p7 = pneg %p7164_p12  ;;  %p7171_p13 = por %p7170_p0, %p7169_p9 }
  0x95   : > { %p7172_p11 = pnand %p7171_p13, %p7165_p7 }
  0x97   : > { %7175 = shalt.err (!%p7172_p11)
}
  0x98   : > { %6775 = dma.hbm_to_vmem [thread:$0]  (!%p8692_p3), %s7531_s6, 2048, %s7533_s26, %s7408_s23, %s8694_s9, %s8694_s9, %s8693_s7  }
  0x99   : > { %p8696_p10 = scmp.ne.s32.totalorder %s8685_s28, 0 }
  0x9a   : > { %s497_s19 = sand.u32 (!%p8696_p10), 1, %s7226_s18   ;;  %p8697_p4 = scmp.ne.s32.totalorder (!%p8696_p10), %s8684_s16, 0 }
  0x9b   : > { %495 = sbr.rel (%p8696_p10) target bundleno = 5020 (0x139c), region = 64  ;;  %s6137_s25 = sshll.u32 (!%p8696_p10), %s497_s19, 6 }
  0x9c   : > { %s498_s3 = scalar_lea.sflag (!%p8696_p10), [#allocation3], %s497_s19  ;;  %s7563_s11 = scalar_lea.vmem (!%p8696_p10), [#allocation2], %s6137_s25 }
  0xa2   : > { %7209 = dma.done.wait (%p8697_p4), %s498_s3, 1024  }
  0xa3   : > { %7211 = vsyncadd (%p8697_p4), %s498_s3, 4294966272  ;;  %s8698_s14 = sadd.s32 4294967295, %s7250_s24   ;;  %s7571_s7 = scalar_lea.vmem [#allocation4], %s6137_s25 }
  0xa4   : > { %s506_s30 = sand.u32 1, %s8698_s14  }
  0xa5   : > { %s507_s23 = scalar_lea.sflag [#allocation5], %s506_s30 }
  0xa6   : > { %7213 = dma.done.wait (%p8697_p4), %s507_s23, 3072  }
  0xa7   : > { %7215 = vsyncadd (%p8697_p4), %s507_s23, 4294964224  ;;  %s6139_s28 = sshll.u32 %s497_s19, 7  ;;  %p8699_p3 = scmp.ne.s32.totalorder %s8683_s15, 0 }
  0xa8   : > { %s7577_s9 = scalar_lea.vmem [#allocation6], %s6139_s28 }
  0xa9   : > { %7217 = dma.done.wait (%p8699_p3), [#allocation8], 32  }
  0xaa   : > { %7219 = vsyncadd (%p8699_p3), [#allocation8], 4294967264  ;;  %p604_p6 = scmp.lt.s32.totalorder %s7238_s21, 1  ;;  %p612_p1 = scmp.lt.s32.totalorder %s7234_s20, 3 }
  0xab   : > { %s8700_s0 = sld [smem:[#allocation18_spill]]  ;;  %s8701_s25 = sld [smem:[#allocation20_spill]] }
  0xac   : > { %s8723_s21 = smov (!%p604_p6, %s7238_s21), 1  ;;  %s8702_s23 = sld [smem:[#allocation19_spill]] }
  0xad   : > { %s613_s26 = scalar_select %p612_p1, %s7234_s20, 3 }
  0xae   : > { %s7587_s6 = sshll.u32 %s8723_s21, 3  ;;  %s8704_s5 = sld [smem:[#allocation24_spill]] }
  0xaf   : > { %s6750_s27 = smul.u32 192, %s613_s26  ;;  %s6353_s13 = sshll.u32 %s613_s26, 6 }
  0xb0   : > { %s6354_s21 = sshll.u32 %s613_s26, 7  ;;  %s6751_s10 = smul.u32 48, %s613_s26 }
  0xb1   : > { %s607_s17 = scalar_lea.vmem %s8700_s0, %s7587_s6  ;;  %s7600_s3 = scalar_lea.vmem %s8701_s25, %s6353_s13 }
  0xb2   : > { %s7605_s28 = scalar_lea.vmem %s8702_s23, %s6750_s27  ;;  %s8703_s0 = sld [smem:[#allocation22_spill]] }
  0xb3   : > { %s8705_s19 = sld [smem:[#allocation28_spill]]  ;;  %s8706_s27 = sld [smem:[#allocation26_spill]] }
  0xb4   : > { %s7615_s8 = scalar_lea.vmem %s8704_s5, %s6354_s21  ;;  %p6152_p2 = scmp.ne.s32.totalorder %s7234_s20, 0 }
  0xb5   : > { %v646_v0 = vld [vmem:[%s607_s17] sm:$0xff] (!%p6152_p2) }
  0xb6   : > { %645 = sbr.rel (%p6152_p2) target bundleno = 189 (0xbd), region = 84 }
  0xb8   : > { %s7610_s4 = scalar_lea.vmem %s8703_s0, %s6354_s21 }
  0xb9   : > { %s7621_s25 = scalar_lea.vmem %s8705_s19, %s7587_s6  ;;  %s7626_s30 = scalar_lea.vmem %s8706_s27, %s6751_s10 }
  0xba   : > { %647 = vst [vmem:[%s7621_s25] sm:$0xff] (!%p6152_p2), %v646_v0 }
  0xbd PF: > { %v6858_v1 = vld [vmem:[%s7605_s28 + $0x4] ss:$12 sps:$4 sm:$0xff]   ;;  %v6860_v2 = vld [vmem:[%s7605_s28] ss:$12 sps:$4 sm:$0xff]   ;;  %v7258_v3 = vmov 0   ;;  %v7259_v4 = vmov 0.0   ;;  %v704_v29 = vlaneseq }
  0xbe   : > { %876 = vmatprep.mubr.bf16.mxu0 %v7258_v3  ;;  %6478 = vmatprep.subr.bf16.mxu1 %v7259_v4  ;;  %v6861_v5 = vld [vmem:[%s7605_s28 + $0x1c] ss:$12 sps:$4 sm:$0xff]   ;;  %v6863_v6 = vld [vmem:[%s7605_s28 + $0x18] ss:$12 sps:$4 sm:$0xff]   ;;  %v6864_v7 = vld [vmem:[%s7605_s28 + $0x34] ss:$12 sps:$4 sm:$0xff]  }
  0xbf   : > { %844 = vmatprep.subr.bf16.mxu0 %v6858_v1  ;;  %v6866_v8 = vld [vmem:[%s7605_s28 + $0x30] ss:$12 sps:$4 sm:$0xff]   ;;  %v6867_v9 = vld [vmem:[%s7605_s28 + $0x4c] ss:$12 sps:$4 sm:$0xff]   ;;  %v6869_v10 = vld [vmem:[%s7605_s28 + $0x48] ss:$12 sps:$4 sm:$0xff]  }
  0xc0   : > { %845 = vmatpush1.bf16.msra.mxu0 %v6860_v2  ;;  %v6882_v11 = vld [vmem:[%s7605_s28 + $0x8] ss:$12 sps:$4 sm:$0xff]   ;;  %v6870_v12 = vld [vmem:[%s7605_s28 + $0x64] ss:$12 sps:$4 sm:$0xff]   ;;  %v6872_v13 = vld [vmem:[%s7605_s28 + $0x60] ss:$12 sps:$4 sm:$0xff]  }
  0xc1   : > { %846 = vmatprep.subr.bf16.mxu0 %v6861_v5  ;;  %6479 = vmatpush3.bf16.msra.mxu1 %v6882_v11  ;;  %v6883_v14 = vld [vmem:[%s7605_s28 + $0x20] ss:$12 sps:$4 sm:$0xff]   ;;  %v6873_v15 = vld [vmem:[%s7605_s28 + $0x7c] ss:$12 sps:$4 sm:$0xff]   ;;  %v6884_v16 = vld [vmem:[%s7605_s28 + $0x38] ss:$12 sps:$4 sm:$0xff]  }
  0xc2   : > { %6480 = vmatprep.subr.bf16.mxu1 %v7259_v4  ;;  %v6875_v17 = vld [vmem:[%s7605_s28 + $0x78] ss:$12 sps:$4 sm:$0xff]   ;;  %v6876_v18 = vld [vmem:[%s7605_s28 + $0x94] ss:$12 sps:$4 sm:$0xff]   ;;  %v6885_v19 = vld [vmem:[%s7605_s28 + $0x50] ss:$12 sps:$4 sm:$0xff]  }
  0xc3   : > { %v6878_v20 = vld [vmem:[%s7605_s28 + $0x90] ss:$12 sps:$4 sm:$0xff]   ;;  %v6879_v21 = vld [vmem:[%s7605_s28 + $0xac] ss:$12 sps:$4 sm:$0xff]   ;;  %v6881_v22 = vld [vmem:[%s7605_s28 + $0xa8] ss:$12 sps:$4 sm:$0xff]  }
  0xc4   : > { %847 = vmatpush1.bf16.msra.mxu0 %v6863_v6  ;;  %v648_v23 = vld [vmem:[%s7621_s25] sm:$0xff]  ;;  %v6886_v25 = vld [vmem:[%s7605_s28 + $0x68] ss:$12 sps:$4 sm:$0xff]   ;;  %v6889_v28 = vld [vmem:[%s7605_s28 + $0xb0] ss:$12 sps:$4 sm:$0xff]   ;;  %vm7260_vm0 = vmmov 0  }
  0xc5   : > { %848 = vmatprep.subr.bf16.mxu0 %v6864_v7  ;;  %6481 = vmatpush3.bf16.msra.mxu1 %v6883_v14  ;;  %v703_v24 = vpack.c.bf16 %v648_v23, %v648_v23  ;;  %v6887_v26 = vld [vmem:[%s7605_s28 + $0x80] ss:$12 sps:$4 sm:$0xff]   ;;  %v6888_v27 = vld [vmem:[%s7605_s28 + $0x98] ss:$12 sps:$4 sm:$0xff]   ;;  %v7672_v30 = vshrl.u32 %v704_v29, 7  ;;  %s7261_s0 = smov 80   ;;  %s8707_s28 = scalar_lea.vmem %s8633_s1, %s7587_s6 }
  0xc6   : > { %6482 = vmatprep.subr.bf16.mxu1 %v7259_v4  ;;  %6494 = vmatprep.mubr.msk.bf16.mxu1 %vm7260_vm0, %v7259_v4  ;;  %v650_v32 = vld [vmem:[%s7626_s30] sm:$0xff]  ;;  %v651_v33 = vld [vmem:[%s7626_s30 + $0x8] sm:$0xff]  ;;  %s7262_s10 = smov 112   ;;  %s7263_s22 = smov 96   ;;  %v652_v43 = vld [vmem:[%s7626_s30 + $0x10] sm:$0xff]  ;;  %vm1832_vm1 = vcmask 130048  }
  0xc7   : > { %v7675_v31 = vsub.s32 0, %v7672_v30  ;;  %s7264_s26 = smov 64   ;;  %s7265_s17 = smov 48   ;;  %v7268_v50 = vmov 1983009808   ;;  %vm2301_vm2 = vcmask 1043456  }
  0xc8   : > { %849 = vmatpush1.bf16.msra.mxu0 %v6866_v8  ;;  %s7266_s5 = smov 32   ;;  %s7267_s21 = smov 16   ;;  %v951_v51 = vunpack.c.l.s4 %v7268_v50  ;;  %v7269_v52 = vmov 1934713408   ;;  %vm2201_vm3 = vcmask 64512   ;;  %vm2968_vm4 = vcmask 261120  }
  0xc9   : > { %850 = vmatprep.subr.bf16.mxu0 %v6867_v9  ;;  %6483 = vmatpush3.bf16.msra.mxu1 %v6884_v16  ;;  %v707_v34 = vrot.slane %v650_v32, %v7675_v31  ;;  %v711_v35 = vrot.slane %v651_v33, %v7675_v31  ;;  %v715_v44 = vrot.slane %v652_v43, %v7675_v31  ;;  %v1015_v53 = vunpack.c.l.s4 %v7269_v52  ;;  %p6345_p5 = scmp.ne.s32.totalorder %s7234_s20, 3 }
  0xca   : > { %6484 = vmatprep.subr.bf16.mxu1 %v7259_v4  ;;  %v952_v54 = vunpack.c.0.s8 %v951_v51  ;;  %vm2970_vm5 = vcmask 392192   ;;  %vm2972_vm6 = vcmask 523264   ;;  %vm2974_vm7 = vcmask 654336  }
  0xcb   : > { %v1016_v57 = vunpack.c.0.s8 %v1015_v53  ;;  %vm2976_vm8 = vcmask 785408   ;;  %vm2978_vm9 = vcmask 916480  }
  0xcc   : > { %851 = vmatpush1.bf16.msra.mxu0 %v6869_v10  ;;  %v7715_v58 = vsub.s32 %v952_v54, %v7672_v30 }
  0xcd   : > { %852 = vmatprep.subr.bf16.mxu0 %v6870_v12  ;;  %6485 = vmatpush3.bf16.msra.mxu1 %v6885_v19  ;;  %v7718_v1 = vsub.s32 %v1016_v57, %v7672_v30 }
  0xce   : > { %6486 = vmatprep.subr.bf16.mxu1 %v7259_v4 }
  0xd0   : > { %853 = vmatpush1.bf16.msra.mxu0 %v6872_v13 }
  0xd1   : > { %854 = vmatprep.subr.bf16.mxu0 %v6873_v15  ;;  %6487 = vmatpush3.bf16.msra.mxu1 %v6886_v25 }
  0xd2   : > { %6488 = vmatprep.subr.bf16.mxu1 %v7259_v4 }
  0xd4   : > { %855 = vmatpush1.bf16.msra.mxu0 %v6875_v17 }
  0xd5   : > { %856 = vmatprep.subr.bf16.mxu0 %v6876_v18  ;;  %6489 = vmatpush3.bf16.msra.mxu1 %v6887_v26 }
  0xd6   : > { %6490 = vmatprep.subr.bf16.mxu1 %v7259_v4 }
  0xd8   : > { %857 = vmatpush1.bf16.msra.mxu0 %v6878_v20 }
  0xd9   : > { %858 = vmatprep.subr.bf16.mxu0 %v6879_v21  ;;  %6491 = vmatpush3.bf16.msra.mxu1 %v6888_v27 }
  0xda   : > { %6492 = vmatprep.subr.bf16.mxu1 %v7259_v4 }
  0xdc   : > { %859 = vmatpush1.bf16.msra.mxu0 %v6881_v22 }
  0xdd   : > { %6522 = vmatprep.subr.bf16.mxu0 %v7259_v4  ;;  %6493 = vmatpush3.bf16.msra.mxu1 %v6889_v28 }
  0xde   : > { %6498 = vmatprep.subr.bf16.mxu1 %v7259_v4 }
  0xdf   : > { %877 = vmatmul.mubr.bf16.vlgmr.msra.gmra.mrb[0].mxu0 %v703_v24 }
  0xe0   : > { %6524 = vmatprep.mubr.msk.bf16.mxu0 %vm7260_vm0, %v7259_v4  ;;  %6495 = vmatmul.mubr.bf16.vlgmr.msra.gmra.mrb[0].mxu1 %v703_v24 }
  0xe1   : > { %6500 = vmatprep.mubr.msk.bf16.mxu1 %vm7260_vm0, %v7259_v4 }
 0x1b2   : > { %v878_v36 = vpop.f32.mrb[0].mxu0 }
 0x1b3   : > { %v880_v37 = vpop.f32.mrb[1].mxu0  ;;  %v879_v38 = vadd.f32 %v878_v36, %v707_v34  ;;  %v919_v45 = vpop.f32.mrb[0].mxu1 }
 0x1b4   : > { %v881_v39 = vadd.f32 %v880_v37, %v711_v35  ;;  %v882_v40 = vpop.f32.mrb[2].mxu0  ;;  %v7706_v46 = vadd.f32 %v919_v45, %v715_v44  ;;  %v6496_v47 = vpop.f32.mrb[1].mxu1 }
 0x1b5   : > { %v883_v41 = vpop.f32.mrb[3].mxu0  ;;  %v7683_v42 = vmul.f32 0.25, %v879_v38  ;;  %v922_v48 = vpop.f32.mrb[2].mxu1 }
 0x1b6   : > { %1235 = vrot.lane.b32.xlu1 %v881_v39, %s7261_s0  ;;  %1229 = vrot.lane.b32.xlu0 %v881_v39, %s7262_s10  ;;  %v6497_v49 = vpop.f32.mrb[3].mxu1 }
 0x1ba   : > { %1232 = vrot.lane.b32.xlu0 %v881_v39, %s7263_s22  ;;  %927 = vrot.lane.b32.xlu1 %v7683_v42, %s7262_s10 }
 0x1be   : > { %930 = vrot.lane.b32.xlu0 %v7683_v42, %s7263_s22  ;;  %933 = vrot.lane.b32.xlu1 %v7683_v42, %s7261_s0 }
 0x1c2   : > { %1238 = vrot.lane.b32.xlu0 %v881_v39, %s7264_s26  ;;  %1241 = vrot.lane.b32.xlu1 %v881_v39, %s7265_s17 }
 0x1c6   : > { %1244 = vrot.lane.b32.xlu0 %v881_v39, %s7266_s5  ;;  %1247 = vrot.lane.b32.xlu1 %v881_v39, %s7267_s21 }
 0x1ca   : > { %936 = vrot.lane.b32.xlu0 %v7683_v42, %s7264_s26  ;;  %939 = vrot.lane.b32.xlu1 %v7683_v42, %s7265_s17 }
 0x1ce   : > { %942 = vrot.lane.b32.xlu0 %v7683_v42, %s7266_s5  ;;  %945 = vrot.lane.b32.xlu1 %v7683_v42, %s7267_s21 }
 0x1d2   : > { %1531 = vrot.lane.b32.xlu1 %v7706_v46, %s7262_s10  ;;  %1534 = vrot.lane.b32.xlu0 %v7706_v46, %s7263_s22 }
 0x1d6   : > { %1537 = vrot.lane.b32.xlu1 %v7706_v46, %s7261_s0 }
 0x228   : > { %v1236_v55 = vpop.permute.xlu1 %1235  ;;  %v1230_v56 = vpop.permute.xlu0 %1229 }
 0x229   : > { %v1266_v59 = vcombine.low %v1230_v56, %v1236_v55  ;;  %v1267_v60 = vcombine.high %v1230_v56, %v1236_v55 }
 0x22b   : > { %v1274_v2 = vrot.slane %v1266_v59, %v7715_v58  ;;  %v1281_v5 = vrot.slane %v1267_v60, %v7715_v58 }
 0x22c   : > { %v1233_v61 = vpop.permute.xlu0 %1232  ;;  %v928_v62 = vpop.permute.xlu1 %927 }
 0x22d   : > { %v1250_v63 = vcombine.low %v881_v39, %v1233_v61  ;;  %v1251_v0 = vcombine.high %v881_v39, %v1233_v61 }
 0x22f   : > { %v1258_v6 = vrot.slane %v1250_v63, %v7715_v58  ;;  %v1265_v7 = vrot.slane %v1251_v0, %v7715_v58 }
 0x230   : > { %v931_v8 = vpop.permute.xlu0 %930  ;;  %v934_v9 = vpop.permute.xlu1 %933 }
 0x231   : > { %v1314_v10 = vcombine.low %v1258_v6, %v1274_v2  ;;  %v1315_v11 = vcombine.high %v1258_v6, %v1274_v2  ;;  %v1330_v12 = vcombine.low %v1265_v7, %v1281_v5  ;;  %v1331_v13 = vcombine.high %v1265_v7, %v1281_v5 }
 0x232   : > { %v948_v14 = vcombine.low %v7683_v42, %v931_v8  ;;  %v949_v15 = vcombine.high %v7683_v42, %v931_v8  ;;  %v964_v16 = vcombine.low %v928_v62, %v934_v9  ;;  %v965_v17 = vcombine.high %v928_v62, %v934_v9 }
 0x233   : > { %v1322_v18 = vrot.slane %v1314_v10, %v7718_v1  ;;  %v1329_v19 = vrot.slane %v1315_v11, %v7718_v1  ;;  %v1338_v20 = vrot.slane %v1330_v12, %v7718_v1  ;;  %v1345_v21 = vrot.slane %v1331_v13, %v7718_v1 }
 0x234   : > { %v956_v22 = vrot.slane %v948_v14, %v7715_v58  ;;  %v963_v23 = vrot.slane %v949_v15, %v7715_v58  ;;  %v972_v24 = vrot.slane %v964_v16, %v7715_v58  ;;  %v979_v25 = vrot.slane %v965_v17, %v7715_v58  ;;  %v1239_v26 = vpop.permute.xlu0 %1238  ;;  %v1242_v27 = vpop.permute.xlu1 %1241 }
 0x235   : > { %v6185_v28 = vcombine.low %v1322_v18, %v1329_v19  ;;  %v6187_v29 = vcombine.high %v1322_v18, %v1329_v19  ;;  %v6189_v38 = vcombine.low %v1338_v20, %v1345_v21  ;;  %v6191_v39 = vcombine.high %v1338_v20, %v1345_v21 }
 0x236   : > { %v1012_v32 = vcombine.low %v956_v22, %v972_v24  ;;  %v1013_v33 = vcombine.high %v956_v22, %v972_v24  ;;  %v1028_v34 = vcombine.low %v963_v23, %v979_v25  ;;  %v1029_v35 = vcombine.high %v963_v23, %v979_v25 }
 0x237   : > { %v7735_v36 = vrot.slane %v6185_v28, %v7715_v58  ;;  %v7738_v37 = vrot.slane %v6187_v29, %v7715_v58  ;;  %v7749_v60 = vrot.slane %v6189_v38, %v7715_v58  ;;  %v7752_v61 = vrot.slane %v6191_v39, %v7715_v58 }
 0x238   : > { %v1020_v40 = vrot.slane %v1012_v32, %v7718_v1  ;;  %v1027_v41 = vrot.slane %v1013_v33, %v7718_v1  ;;  %v1036_v42 = vrot.slane %v1028_v34, %v7718_v1  ;;  %v1043_v43 = vrot.slane %v1029_v35, %v7718_v1  ;;  %v1245_v44 = vpop.permute.xlu0 %1244  ;;  %v1248_v45 = vpop.permute.xlu1 %1247 }
 0x239   : > { %v1282_v47 = vcombine.low %v1239_v26, %v1245_v44  ;;  %v1283_v48 = vcombine.high %v1239_v26, %v1245_v44  ;;  %v1298_v49 = vcombine.low %v1242_v27, %v1248_v45  ;;  %v1299_v50 = vcombine.high %v1242_v27, %v1248_v45 }
 0x23a   : > { %v6177_v51 = vcombine.low %v1020_v40, %v1027_v41  ;;  %v6179_v52 = vcombine.high %v1020_v40, %v1027_v41  ;;  %v6181_v53 = vcombine.low %v1036_v42, %v1043_v43  ;;  %v6183_v54 = vcombine.high %v1036_v42, %v1043_v43 }
 0x23b   : > { %v1290_v55 = vrot.slane %v1282_v47, %v7715_v58  ;;  %v1297_v56 = vrot.slane %v1283_v48, %v7715_v58  ;;  %v1306_v57 = vrot.slane %v1298_v49, %v7715_v58  ;;  %v1313_v59 = vrot.slane %v1299_v50, %v7715_v58 }
 0x23c   : > { %v7755_v62 = vrot.slane %v6177_v51, %v7715_v58  ;;  %v7758_v63 = vrot.slane %v6179_v52, %v7715_v58  ;;  %v937_v0 = vpop.permute.xlu0 %936  ;;  %v940_v2 = vpop.permute.xlu1 %939  ;;  %v7761_v9 = vrot.slane %v6181_v53, %v7715_v58  ;;  %v7764_v10 = vrot.slane %v6183_v54, %v7715_v58 }
 0x23d   : > { %v1346_v5 = vcombine.low %v1290_v55, %v1306_v57  ;;  %v1347_v6 = vcombine.high %v1290_v55, %v1306_v57  ;;  %v1362_v7 = vcombine.low %v1297_v56, %v1313_v59  ;;  %v1363_v8 = vcombine.high %v1297_v56, %v1313_v59 }
 0x23e   : > { %v1148_v15 = vcombine.low %v7755_v62, %v7758_v63  ;;  %v1450_v18 = vcombine.low %v7735_v36, %v7738_v37  ;;  %v1482_v19 = vcombine.low %v7749_v60, %v7752_v61  ;;  %v1180_v28 = vcombine.low %v7761_v9, %v7764_v10 }
 0x23f   : > { %v1354_v11 = vrot.slane %v1346_v5, %v7718_v1  ;;  %v1361_v12 = vrot.slane %v1347_v6, %v7718_v1  ;;  %v1370_v13 = vrot.slane %v1362_v7, %v7718_v1  ;;  %v1377_v14 = vrot.slane %v1363_v8, %v7718_v1 }
 0x240   : > { %v943_v16 = vpop.permute.xlu0 %942  ;;  %v946_v17 = vpop.permute.xlu1 %945  ;;  %v1458_v41 = vrot.slane %v1450_v18, %v7718_v1  ;;  %v1490_v42 = vrot.slane %v1482_v19, %v7718_v1  ;;  %v1156_v50 = vrot.slane %v1148_v15, %v7718_v1  ;;  %v1188_v51 = vrot.slane %v1180_v28, %v7718_v1 }
 0x241   : > { %v6186_v20 = vcombine.low %v1354_v11, %v1361_v12  ;;  %v6188_v21 = vcombine.high %v1354_v11, %v1361_v12  ;;  %v6190_v22 = vcombine.low %v1370_v13, %v1377_v14  ;;  %v6192_v23 = vcombine.high %v1370_v13, %v1377_v14 }
 0x242   : > { %v980_v24 = vcombine.low %v937_v0, %v943_v16  ;;  %v981_v25 = vcombine.high %v937_v0, %v943_v16  ;;  %v996_v26 = vcombine.low %v940_v2, %v946_v17  ;;  %v997_v27 = vcombine.high %v940_v2, %v946_v17 }
 0x243   : > { %v1401_v29 = vrot.slane %v6186_v20, %v7715_v58  ;;  %v1417_v32 = vrot.slane %v6188_v21, %v7715_v58  ;;  %v1433_v33 = vrot.slane %v6190_v22, %v7715_v58  ;;  %v1449_v40 = vrot.slane %v6192_v23, %v7715_v58 }
 0x244   : > { %v988_v34 = vrot.slane %v980_v24, %v7715_v58  ;;  %v995_v35 = vrot.slane %v981_v25, %v7715_v58  ;;  %v1004_v38 = vrot.slane %v996_v26, %v7715_v58  ;;  %v1011_v39 = vrot.slane %v997_v27, %v7715_v58 }
 0x245   : > { %v1466_v43 = vcombine.low %v1401_v29, %v1417_v32  ;;  %v1514_v49 = vcombine.low %v1458_v41, %v1490_v42  ;;  %v1498_v59 = vcombine.low %v1433_v33, %v1449_v40  ;;  %v1212_v8 = vcombine.low %v1156_v50, %v1188_v51 }
 0x246   : > { %v1044_v44 = vcombine.low %v988_v34, %v1004_v38  ;;  %v1045_v45 = vcombine.high %v988_v34, %v1004_v38  ;;  %v1060_v47 = vcombine.low %v995_v35, %v1011_v39  ;;  %v1061_v48 = vcombine.high %v995_v35, %v1011_v39 }
 0x247   : > { %v1522_v56 = vpack.c.bf16 %v1514_v49, %v1514_v49  ;;  %v7795_v57 = vrot.slane %v1466_v43, %v7718_v1  ;;  %v1515_v11 = vcombine.high %v1458_v41, %v1490_v42  ;;  %v7799_v12 = vrot.slane %v1498_v59, %v7718_v1 }
 0x248   : > { %v1052_v52 = vrot.slane %v1044_v44, %v7718_v1  ;;  %v1059_v53 = vrot.slane %v1045_v45, %v7718_v1  ;;  %v1068_v54 = vrot.slane %v1060_v47, %v7718_v1  ;;  %v1075_v55 = vrot.slane %v1061_v48, %v7718_v1 }
 0x249   : > { %v1837_v7 = vsel %vm1832_vm1, %v1522_v56, 0  ;;  %v1518_v17 = vcombine.low %v7795_v57, %v7799_v12  ;;  %v1451_v18 = vcombine.high %v7735_v36, %v7738_v37  ;;  %v1483_v19 = vcombine.high %v7749_v60, %v7752_v61 }
 0x24a   : > { %v6178_v0 = vcombine.low %v1052_v52, %v1059_v53  ;;  %v6180_v2 = vcombine.high %v1052_v52, %v1059_v53  ;;  %v6182_v5 = vcombine.low %v1068_v54, %v1075_v55  ;;  %v6184_v6 = vcombine.high %v1068_v54, %v1075_v55  ;;  %6499 = vmatpush3.bf16.xpose.msra.mxu1 %v1837_v7 }
 0x24b   : > { %6504 = vmatprep.subr.bf16.mxu1 %v7259_v4  ;;  %v1467_v20 = vcombine.high %v1401_v29, %v1417_v32  ;;  %v1523_v23 = vpack.c.bf16 %v1515_v11, %v1515_v11  ;;  %v1526_v24 = vpack.c.bf16 %v1518_v17, %v1518_v17  ;;  %v1465_v25 = vrot.slane %v1451_v18, %v7718_v1 }
 0x24c   : > { %v1099_v13 = vrot.slane %v6178_v0, %v7715_v58  ;;  %v1115_v14 = vrot.slane %v6180_v2, %v7715_v58  ;;  %v1131_v15 = vrot.slane %v6182_v5, %v7715_v58  ;;  %v1147_v16 = vrot.slane %v6184_v6, %v7715_v58 }
 0x24d   : > { %v1497_v26 = vrot.slane %v1483_v19, %v7718_v1  ;;  %v1481_v34 = vrot.slane %v1467_v20, %v7718_v1  ;;  %v1499_v35 = vcombine.high %v1433_v33, %v1449_v40  ;;  %v1220_v36 = vpack.c.bf16 %v1212_v8, %v1212_v8 }
 0x24e   : > { %v1164_v21 = vcombine.low %v1099_v13, %v1115_v14  ;;  %v1196_v22 = vcombine.low %v1131_v15, %v1147_v16  ;;  %v2021_v37 = vsel %vm1832_vm1, %v1526_v24, 0  ;;  %v1165_v29 = vcombine.high %v1099_v13, %v1115_v14 }
 0x24f   : > { %6523 = vmatpush3.bf16.xpose.msra.mxu0 %v2021_v37  ;;  %v1513_v61 = vrot.slane %v1499_v35, %v7718_v1  ;;  %v1197_v32 = vcombine.high %v1131_v15, %v1147_v16  ;;  %v1883_v38 = vsel %vm1832_vm1, %v1523_v23, 0  ;;  %v1516_v39 = vcombine.low %v1465_v25, %v1497_v26  ;;  %v1532_v15 = vpop.permute.xlu1 %1531  ;;  %v1535_v16 = vpop.permute.xlu0 %1534 }
 0x250   : > { %v1172_v27 = vrot.slane %v1164_v21, %v7718_v1  ;;  %v1204_v28 = vrot.slane %v1196_v22, %v7718_v1  ;;  %6534 = vmatprep.subr.bf16.mxu0 %v7259_v4  ;;  %v1149_v40 = vcombine.high %v7755_v62, %v7758_v63  ;;  %v1181_v41 = vcombine.high %v7761_v9, %v7764_v10 }
 0x251   : > { %6501 = vmatmul.mubr.msk.bf16.vlgmr.msra.gmra.mrb[4].mxu1 %vm1832_vm1, %v1220_v36  ;;  %v1520_v33 = vcombine.low %v1481_v34, %v1513_v61  ;;  %v1213_v42 = vcombine.high %v1156_v50, %v1188_v51  ;;  %v1524_v45 = vpack.c.bf16 %v1516_v39, %v1516_v39  ;;  %v1179_v47 = vrot.slane %v1165_v29, %v7718_v1 }
 0x252   : > { %v1216_v60 = vcombine.low %v1172_v27, %v1204_v28  ;;  %6505 = vmatpush3.bf16.xpose.msra.mxu1 %v1883_v38  ;;  %6506 = vmatprep.mubr.msk.bf16.mxu1 %vm7260_vm0, %v7259_v4  ;;  %v1211_v48 = vrot.slane %v1197_v32, %v7718_v1  ;;  %v1163_v62 = vrot.slane %v1149_v40, %v7718_v1 }
 0x253   : > { %6510 = vmatprep.subr.bf16.mxu1 %v7259_v4  ;;  %v1528_v44 = vpack.c.bf16 %v1520_v33, %v1520_v33  ;;  %v1221_v49 = vpack.c.bf16 %v1213_v42, %v1213_v42  ;;  %v1195_v63 = vrot.slane %v1181_v41, %v7718_v1  ;;  %v1929_v9 = vsel %vm1832_vm1, %v1524_v45, 0  ;;  %v1538_v17 = vpop.permute.xlu1 %1537 }
 0x254   : > { %v1224_v43 = vpack.c.bf16 %v1216_v60, %v1216_v60  ;;  %v1517_v10 = vcombine.high %v1465_v25, %v1497_v26  ;;  %v1218_v50 = vcombine.low %v1179_v47, %v1211_v48  ;;  %v1519_v59 = vcombine.high %v7795_v57, %v7799_v12 }
 0x255   : > { %v2113_v52 = vsel %vm1832_vm1, %v1528_v44, 0  ;;  %v1214_v51 = vcombine.low %v1163_v62, %v1195_v63  ;;  %v1215_v0 = vcombine.high %v1163_v62, %v1195_v63  ;;  %v1521_v7 = vcombine.high %v1481_v34, %v1513_v61 }
 0x256   : > { %6525 = vmatmul.mubr.msk.bf16.vlgmr.msra.gmra.mrb[4].mxu0 %vm1832_vm1, %v1224_v43  ;;  %v1525_v53 = vpack.c.bf16 %v1517_v10, %v1517_v10  ;;  %v1226_v54 = vpack.c.bf16 %v1218_v50, %v1218_v50  ;;  %v1527_v2 = vpack.c.bf16 %v1519_v59, %v1519_v59  ;;  %v1217_v8 = vcombine.high %v1172_v27, %v1204_v28 }
 0x257   : > { %6535 = vmatpush3.bf16.xpose.msra.mxu0 %v2113_v52  ;;  %6536 = vmatprep.mubr.msk.bf16.mxu0 %vm7260_vm0, %v7259_v4  ;;  %v1222_v55 = vpack.c.bf16 %v1214_v51, %v1214_v51  ;;  %v1223_v5 = vpack.c.bf16 %v1215_v0, %v1215_v0  ;;  %v1529_v57 = vpack.c.bf16 %v1521_v7, %v1521_v7 }
 0x258   : > { %6546 = vmatprep.subr.bf16.mxu0 %v7259_v4  ;;  %v1975_v56 = vsel %vm1832_vm1, %v1525_v53, 0  ;;  %v2067_v6 = vsel %vm1832_vm1, %v1527_v2, 0  ;;  %v1225_v11 = vpack.c.bf16 %v1217_v8, %v1217_v8  ;;  %v1219_v13 = vcombine.high %v1179_v47, %v1211_v48 }
 0x259   : > { %6507 = vmatmul.mubr.msk.bf16.vlgmr.msra.gmra.mrb[8].mxu1 %vm1832_vm1, %v1221_v49  ;;  %v2159_v12 = vsel %vm1832_vm1, %v1529_v57, 0  ;;  %v1552_v18 = vcombine.low %v7706_v46, %v1535_v16  ;;  %v1553_v19 = vcombine.high %v7706_v46, %v1535_v16  ;;  %v1568_v20 = vcombine.low %v1532_v15, %v1538_v17 }
 0x25a   : > { %6511 = vmatpush3.bf16.xpose.msra.mxu1 %v1929_v9  ;;  %6512 = vmatprep.mubr.msk.bf16.mxu1 %vm7260_vm0, %v7259_v4  ;;  %v1227_v14 = vpack.c.bf16 %v1219_v13, %v1219_v13  ;;  %v1569_v21 = vcombine.high %v1532_v15, %v1538_v17 }
 0x25b   : > { %6516 = vmatprep.subr.bf16.mxu1 %v7259_v4  ;;  %v1560_v22 = vrot.slane %v1552_v18, %v7715_v58  ;;  %v1567_v23 = vrot.slane %v1553_v19, %v7715_v58  ;;  %v1576_v24 = vrot.slane %v1568_v20, %v7715_v58 }
 0x25c   : > { %v1583_v25 = vrot.slane %v1569_v21, %v7715_v58 }
 0x25d   : > { %v1616_v26 = vcombine.low %v1560_v22, %v1576_v24  ;;  %v1617_v27 = vcombine.high %v1560_v22, %v1576_v24 }
 0x25e   : > { %6537 = vmatmul.mubr.msk.bf16.vlgmr.msra.gmra.mrb[8].mxu0 %vm1832_vm1, %v1226_v54  ;;  %v1632_v28 = vcombine.low %v1567_v23, %v1583_v25  ;;  %v1633_v34 = vcombine.high %v1567_v23, %v1583_v25 }
 0x25f   : > { %6548 = vmatprep.mubr.msk.bf16.mxu0 %vm7260_vm0, %v7259_v4  ;;  %v1624_v35 = vrot.slane %v1616_v26, %v7718_v1  ;;  %v1631_v36 = vrot.slane %v1617_v27, %v7718_v1 }
 0x260   : > { %v1640_v37 = vrot.slane %v1632_v28, %v7718_v1  ;;  %v1647_v60 = vrot.slane %v1633_v34, %v7718_v1 }
 0x261   : > { %6513 = vmatmul.mubr.msk.bf16.vlgmr.msra.gmra.mrb[12].mxu1 %vm1832_vm1, %v1222_v55  ;;  %v6193_v61 = vcombine.low %v1624_v35, %v1631_v36  ;;  %v6195_v29 = vcombine.high %v1624_v35, %v1631_v36 }
 0x262   : > { %6517 = vmatpush3.bf16.xpose.msra.mxu1 %v1975_v56  ;;  %6518 = vmatprep.mubr.msk.bf16.mxu1 %vm7260_vm0, %v7259_v4  ;;  %v6197_v32 = vcombine.low %v1640_v37, %v1647_v60  ;;  %v6199_v38 = vcombine.high %v1640_v37, %v1647_v60 }
 0x263   : > { %6528 = vmatprep.subr.bf16.mxu1 %v7259_v4  ;;  %v1696_v39 = vrot.slane %v6193_v61, %v7715_v58  ;;  %v1712_v33 = vrot.slane %v6195_v29, %v7715_v58 }
 0x264   : > { %v1728_v40 = vrot.slane %v6197_v32, %v7715_v58  ;;  %v1744_v41 = vrot.slane %v6199_v38, %v7715_v58 }
 0x265   : > { %v1752_v42 = vcombine.low %v1696_v39, %v1712_v33  ;;  %v1753_v44 = vcombine.high %v1696_v39, %v1712_v33 }
 0x266   : > { %v1784_v43 = vcombine.low %v1728_v40, %v1744_v41  ;;  %v1785_v45 = vcombine.high %v1728_v40, %v1744_v41 }
 0x267   : > { %v1760_v47 = vrot.slane %v1752_v42, %v7718_v1  ;;  %v1767_v49 = vrot.slane %v1753_v44, %v7718_v1 }
 0x268   : > { %v1792_v48 = vrot.slane %v1784_v43, %v7718_v1  ;;  %v1799_v52 = vrot.slane %v1785_v45, %v7718_v1 }
 0x269   : > { %6519 = vmatmul.mubr.msk.bf16.vlgmr.msra.gmra.mrb[16].mxu1 %vm1832_vm1, %v1223_v5 }
 0x26a   : > { %6529 = vmatpush3.bf16.xpose.msra.mxu1 %v2067_v6  ;;  %6530 = vmatprep.mubr.msk.bf16.mxu1 %vm7260_vm0, %v7259_v4  ;;  %v1816_v62 = vcombine.low %v1760_v47, %v1792_v48  ;;  %v1817_v63 = vcombine.high %v1760_v47, %v1792_v48  ;;  %v7884_v9 = vcombine.low %v1767_v49, %v1799_v52 }
 0x26b   : > { %6540 = vmatprep.subr.bf16.mxu1 %v7259_v4  ;;  %v7886_v10 = vcombine.high %v1767_v49, %v1799_v52 }
 0x26c   : > { %v1824_v50 = vpack.c.bf16 %v1816_v62, %v1816_v62  ;;  %v1825_v51 = vpack.c.bf16 %v1817_v63, %v1817_v63 }
 0x26e   : > { %v2303_v53 = vsel %vm2301_vm2, %v1824_v50, 0  ;;  %v2349_v54 = vsel %vm2301_vm2, %v1825_v51, 0 }
 0x26f   : > { %6547 = vmatpush3.bf16.msra.mxu0 %v2303_v53 }
 0x270   : > { %6558 = vmatprep.subr.bf16.mxu0 %v7259_v4 }
 0x271   : > { %6531 = vmatmul.mubr.msk.bf16.vlgmr.msra.gmra.mrb[20].mxu1 %vm1832_vm1, %v1225_v11 }
 0x272   : > { %6541 = vmatpush3.bf16.xpose.msra.mxu1 %v2159_v12  ;;  %6542 = vmatprep.mubr.msk.bf16.mxu1 %vm7260_vm0, %v7259_v4 }
 0x273   : > { %6552 = vmatprep.subr.bf16.mxu1 %v7259_v4 }
 0x279   : > { %6543 = vmatmul.mubr.msk.bf16.vlgmr.msra.gmra.mrb[24].mxu1 %vm1832_vm1, %v1227_v14 }
 0x27a   : > { %6554 = vmatprep.mubr.msk.bf16.mxu1 %vm7260_vm0, %v7259_v4  ;;  %6553 = vmatpush3.bf16.msra.mxu1 %v2349_v54 }
 0x27b   : > { %6564 = vmatprep.subr.bf16.mxu1 %v7259_v4 }
 0x324   : > { %v1873_v55 = vpop.f32.mrb[4].mxu1 }
 0x325   : > { %v6502_v56 = vpop.f32.mrb[5].mxu1  ;;  %v2202_v59 = vsel %vm2201_vm3, %v1873_v55, -inf }
 0x326   : > { %2203 = vmax.xlane.f32.xlu0 %v2202_v59  ;;  %v1876_v0 = vpop.f32.mrb[6].mxu1 }
 0x327   : > { %v6503_v2 = vpop.f32.mrb[7].mxu1 }
 0x329   : > { %v2057_v5 = vpop.f32.mrb[4].mxu0 }
 0x32a   : > { %v6526_v6 = vpop.f32.mrb[5].mxu0  ;;  %v2214_v7 = vsel %vm2201_vm3, %v2057_v5, -inf }
 0x32b   : > { %2215 = vmax.xlane.f32.xlu1 %v2214_v7  ;;  %v2060_v57 = vpop.f32.mrb[6].mxu0 }
 0x32c   : > { %v1919_v8 = vpop.f32.mrb[8].mxu1  ;;  %v6527_v12 = vpop.f32.mrb[7].mxu0 }
 0x32d   : > { %v6508_v11 = vpop.f32.mrb[9].mxu1  ;;  %v2205_v15 = vsel %vm2201_vm3, %v1919_v8, -inf }
 0x32e   : > { %v1922_v13 = vpop.f32.mrb[10].mxu1 }
 0x32f   : > { %v6509_v14 = vpop.f32.mrb[11].mxu1  ;;  %2206 = vmax.xlane.f32.xlu1 %v2205_v15 }
 0x331   : > { %v7895_v16 = vpop.f32.mrb[8].mxu0 }
 0x332   : > { %v6538_v17 = vpop.f32.mrb[9].mxu0  ;;  %v2220_v18 = vsel %vm2201_vm3, %v7895_v16, -inf }
 0x333   : > { %2221 = vmax.xlane.f32.xlu1 %v2220_v18  ;;  %v2152_v20 = vpop.f32.mrb[10].mxu0 }
 0x334   : > { %v1965_v19 = vpop.f32.mrb[12].mxu1  ;;  %v6539_v23 = vpop.f32.mrb[11].mxu0 }
 0x335   : > { %v6514_v21 = vpop.f32.mrb[13].mxu1  ;;  %v2208_v22 = vsel %vm2201_vm3, %v1965_v19, -inf }
 0x336   : > { %2209 = vmax.xlane.f32.xlu0 %v2208_v22  ;;  %v1968_v24 = vpop.f32.mrb[14].mxu1 }
 0x337   : > { %v6515_v25 = vpop.f32.mrb[15].mxu1 }
 0x33c   : > { %v2011_v26 = vpop.f32.mrb[16].mxu1 }
 0x33d   : > { %v6520_v27 = vpop.f32.mrb[17].mxu1  ;;  %v2211_v28 = vsel %vm2201_vm3, %v2011_v26, -inf }
 0x33e   : > { %2212 = vmax.xlane.f32.xlu0 %v2211_v28  ;;  %v2014_v34 = vpop.f32.mrb[18].mxu1 }
 0x33f   : > { %v6521_v35 = vpop.f32.mrb[19].mxu1 }
 0x344   : > { %v2103_v36 = vpop.f32.mrb[20].mxu1  ;;  %1543 = vrot.lane.b32.xlu1 %v7706_v46, %s7265_s17 }
 0x345   : > { %v6532_v37 = vpop.f32.mrb[21].mxu1  ;;  %v2217_v60 = vsel %vm2201_vm3, %v2103_v36, -inf }
 0x346   : > { %2218 = vmax.xlane.f32.xlu0 %v2217_v60  ;;  %v2106_v61 = vpop.f32.mrb[22].mxu1  ;;  %v1826_v37 = vpack.c.bf16 %v7884_v9, %v7884_v9 }
 0x347   : > { %v6533_v29 = vpop.f32.mrb[23].mxu1 }
 0x348   : > { %v2395_v61 = vsel %vm2301_vm2, %v1826_v37, 0 }
 0x34c   : > { %v2195_v32 = vpop.f32.mrb[24].mxu1 }
 0x34d   : > { %v6544_v38 = vpop.f32.mrb[25].mxu1  ;;  %v2223_v39 = vsel %vm2201_vm3, %v2195_v32, -inf }
 0x34e   : > { %2224 = vmax.xlane.f32.xlu0 %v2223_v39  ;;  %v2198_v33 = vpop.f32.mrb[26].mxu1  ;;  %v1827_v39 = vpack.c.bf16 %v7886_v10, %v7886_v10 }
 0x34f   : > { %v6545_v40 = vpop.f32.mrb[27].mxu1 }
 0x350   : > { %v2441_v40 = vsel %vm2301_vm2, %v1827_v39, 0 }
 0x364   : > { %1540 = vrot.lane.b32.xlu0 %v7706_v46, %s7264_s26 }
 0x3b3   : > { %v2204_v41 = vpop.xlane.xlu0 %2203 }
 0x3b4   : > { %v2226_v42 = vsub.f32 %v1873_v55, %v2204_v41 }
 0x3b6   : > { %v2234_v43 = vmul.f32 1.442695, %v2226_v42 }
 0x3b8   : > { %6978 = vpow2.f32 %v2234_v43  ;;  %v2216_v44 = vpop.xlane.xlu1 %2215 }
 0x3b9   : > { %v2230_v45 = vsub.f32 %v2057_v5, %v2216_v44 }
 0x3bb   : > { %v2242_v47 = vmul.f32 1.442695, %v2230_v45 }
 0x3bc   : > { %v2207_v48 = vpop.xlane.xlu1 %2206 }
 0x3bd   : > { %6980 = vpow2.f32 %v2242_v47  ;;  %v2227_v49 = vsub.f32 %v1919_v8, %v2207_v48 }
 0x3bf   : > { %v2236_v52 = vmul.f32 1.442695, %v2227_v49 }
 0x3c0   : > { %v2222_v20 = vpop.xlane.xlu1 %2221 }
 0x3c1   : > { %6982 = vpow2.f32 %v2236_v52  ;;  %v2232_v21 = vsub.f32 %v7895_v16, %v2222_v20 }
 0x3c2   : > { %v6979_v62 = vpop.eup %6978 }
 0x3c3   : > { %v2210_v63 = vpop.xlane.xlu0 %2209  ;;  %v2250_v50 = vsel %vm2201_vm3, %v6979_v62, 0.0  ;;  %v2246_v22 = vmul.f32 1.442695, %v2232_v21 }
 0x3c4   : > { %v2228_v51 = vsub.f32 %v1965_v19, %v2210_v63  ;;  %2251 = vadd.xlane.f32.xlu1 %v2250_v50 }
 0x3c6   : > { %v2238_v53 = vmul.f32 1.442695, %v2228_v51 }
 0x3c7   : > { %v7908_v54 = vpop.eup %6980 }
 0x3c8   : > { %6984 = vpow2.f32 %v2238_v53  ;;  %v2262_v55 = vsel %vm2201_vm3, %v7908_v54, 0.0 }
 0x3c9   : > { %2263 = vadd.xlane.f32.xlu0 %v2262_v55 }
 0x3cb   : > { %v2213_v56 = vpop.xlane.xlu0 %2212  ;;  %v6983_v59 = vpop.eup %6982 }
 0x3cc   : > { %v2229_v0 = vsub.f32 %v2011_v26, %v2213_v56  ;;  %v2253_v2 = vsel %vm2201_vm3, %v6983_v59, 0.0  ;;  %v1544_v26 = vpop.permute.xlu1 %1543 }
 0x3cd   : > { %2254 = vadd.xlane.f32.xlu0 %v2253_v2 }
 0x3ce   : > { %v2240_v5 = vmul.f32 1.442695, %v2229_v0 }
 0x3d0   : > { %6986 = vpow2.f32 %v2240_v5 }
 0x3d2   : > { %v6985_v6 = vpop.eup %6984 }
 0x3d3   : > { %v2219_v7 = vpop.xlane.xlu0 %2218  ;;  %v2256_v8 = vsel %vm2201_vm3, %v6985_v6, 0.0 }
 0x3d4   : > { %v2231_v57 = vsub.f32 %v2103_v36, %v2219_v7  ;;  %2257 = vadd.xlane.f32.xlu1 %v2256_v8 }
 0x3d6   : > { %v2244_v11 = vmul.f32 1.442695, %v2231_v57 }
 0x3d8   : > { %6988 = vpow2.f32 %v2244_v11 }
 0x3da   : > { %v6987_v12 = vpop.eup %6986 }
 0x3db   : > { %v2259_v13 = vsel %vm2201_vm3, %v6987_v12, 0.0  ;;  %v2225_v17 = vpop.xlane.xlu0 %2224 }
 0x3dc   : > { %2260 = vadd.xlane.f32.xlu0 %v2259_v13  ;;  %v2233_v18 = vsub.f32 %v2195_v32, %v2225_v17 }
 0x3de   : > { %v2248_v19 = vmul.f32 1.442695, %v2233_v18 }
 0x3df   : > { %v1541_v28 = vpop.permute.xlu0 %1540 }
 0x3e0   : > { %6990 = vpow2.f32 %v2248_v19 }
 0x3e1   : > { %6992 = vpow2.f32 %v2246_v22 }
 0x3e2   : > { %v7915_v14 = vpop.eup %6988 }
 0x3e3   : > { %v2265_v15 = vsel %vm2201_vm3, %v7915_v14, 0.0 }
 0x3e4   : > { %2266 = vadd.xlane.f32.xlu1 %v2265_v15 }
 0x3ea   : > { %v7924_v23 = vpop.eup %6990 }
 0x3eb   : > { %v2271_v24 = vsel %vm2201_vm3, %v7924_v23, 0.0  ;;  %v7928_v25 = vpop.eup %6992 }
 0x3f2   : > { %1549 = vrot.lane.b32.xlu0 %v7706_v46, %s7267_s21 }
 0x3f5   : > { %1546 = vrot.lane.b32.xlu1 %v7706_v46, %s7266_s5  ;;  %v2268_v46 = vsel %vm2201_vm3, %v7928_v25, 0.0 }
 0x411   : > { %2272 = vadd.xlane.f32.xlu0 %v2271_v24 }
 0x419   : > { %2269 = vadd.xlane.f32.xlu1 %v2268_v46 }
 0x451   : > { %v2252_v27 = vpop.xlane.xlu1 %2251 }
 0x452   : > { %6994 = vrcp.f32 %v2252_v27 }
 0x456   : > { %v2264_v16 = vpop.xlane.xlu0 %2263 }
 0x45a   : > { %v2255_v34 = vpop.xlane.xlu0 %2254 }
 0x45b   : > { %6996 = vrcp.f32 %v2255_v34 }
 0x45c   : > { %v6995_v35 = vpop.eup %6994 }
 0x45d   : > { %v2282_v36 = vmul.f32 %v6995_v35, %v6979_v62 }
 0x45f   : > { %v2290_v60 = vpack.c.bf16 %v2282_v36, %v2282_v36 }
 0x461   : > { %6549 = vmatmul.mubr.msk.bf16.vlgmr.msra.gmra.mrb[12].mxu0 %vm2201_vm3, %v2290_v60  ;;  %v2258_v29 = vpop.xlane.xlu1 %2257 }
 0x462   : > { %6559 = vmatpush3.bf16.msra.mxu0 %v2395_v61  ;;  %6998 = vrcp.f32 %v2258_v29  ;;  %6560 = vmatprep.mubr.msk.bf16.mxu0 %vm7260_vm0, %v7259_v4 }
 0x463   : > { %6570 = vmatprep.subr.bf16.mxu0 %v7259_v4 }
 0x465   : > { %v6997_v32 = vpop.eup %6996 }
 0x466   : > { %v2283_v38 = vmul.f32 %v6997_v32, %v6983_v59 }
 0x468   : > { %v2291_v9 = vpack.c.bf16 %v2283_v38, %v2283_v38 }
 0x469   : > { %v2261_v33 = vpop.xlane.xlu0 %2260 }
 0x46a   : > { %7000 = vrcp.f32 %v2261_v33  ;;  %6555 = vmatmul.mubr.msk.bf16.vlgmr.msra.gmra.mrb[28].mxu1 %vm2201_vm3, %v2291_v9 }
 0x46b   : > { %6565 = vmatpush3.bf16.msra.mxu1 %v2441_v40  ;;  %6566 = vmatprep.mubr.msk.bf16.mxu1 %vm7260_vm0, %v7259_v4  ;;  %7002 = vrcp.f32 %v2264_v16 }
 0x46c   : > { %v6999_v41 = vpop.eup %6998  ;;  %6576 = vmatprep.subr.bf16.mxu1 %v7259_v4 }
 0x46d   : > { %v2284_v42 = vmul.f32 %v6999_v41, %v6985_v6  ;;  %v1550_v44 = vpop.permute.xlu0 %1549 }
 0x46e   : > { %v1600_v47 = vcombine.low %v1544_v26, %v1550_v44  ;;  %v1601_v48 = vcombine.high %v1544_v26, %v1550_v44 }
 0x46f   : > { %v2292_v43 = vpack.c.bf16 %v2284_v42, %v2284_v42 }
 0x470   : > { %v1608_v51 = vrot.slane %v1600_v47, %v7715_v58  ;;  %v1615_v53 = vrot.slane %v1601_v48, %v7715_v58 }
 0x471   : > { %6561 = vmatmul.mubr.msk.bf16.vlgmr.msra.gmra.mrb[16].mxu0 %vm2201_vm3, %v2292_v43  ;;  %v2267_v10 = vpop.xlane.xlu1 %2266 }
 0x472   : > { %6572 = vmatprep.mubr.msk.bf16.mxu0 %vm7260_vm0, %v7259_v4  ;;  %7004 = vrcp.f32 %v2267_v10 }
 0x474   : > { %v7001_v45 = vpop.eup %7000 }
 0x475   : > { %v2285_v49 = vmul.f32 %v7001_v45, %v6987_v12  ;;  %v1547_v52 = vpop.permute.xlu1 %1546  ;;  %v7003_v26 = vpop.eup %7002 }
 0x476   : > { %v1584_v62 = vcombine.low %v1541_v28, %v1547_v52  ;;  %v1585_v63 = vcombine.high %v1541_v28, %v1547_v52  ;;  %v2286_v29 = vmul.f32 %v7003_v26, %v7908_v54 }
 0x477   : > { %v2293_v50 = vpack.c.bf16 %v2285_v49, %v2285_v49 }
 0x478   : > { %v1592_v55 = vrot.slane %v1584_v62, %v7715_v58  ;;  %v1599_v56 = vrot.slane %v1585_v63, %v7715_v58  ;;  %v2294_v42 = vpack.c.bf16 %v2286_v29, %v2286_v29 }
 0x479   : > { %6567 = vmatmul.mubr.msk.bf16.vlgmr.msra.gmra.mrb[32].mxu1 %vm2201_vm3, %v2293_v50 }
 0x47a   : > { %v1648_v59 = vcombine.low %v1592_v55, %v1608_v51  ;;  %v1649_v0 = vcombine.high %v1592_v55, %v1608_v51  ;;  %v1664_v2 = vcombine.low %v1599_v56, %v1615_v53  ;;  %v1665_v5 = vcombine.high %v1599_v56, %v1615_v53  ;;  %6578 = vmatprep.mubr.msk.bf16.mxu1 %vm7260_vm0, %v7259_v4 }
 0x47c   : > { %v1656_v6 = vrot.slane %v1648_v59, %v7718_v1  ;;  %v1663_v7 = vrot.slane %v1649_v0, %v7718_v1  ;;  %v1672_v8 = vrot.slane %v1664_v2, %v7718_v1  ;;  %v1679_v57 = vrot.slane %v1665_v5, %v7718_v1  ;;  %v7005_v35 = vpop.eup %7004 }
 0x47d   : > { %v2287_v32 = vmul.f32 %v7005_v35, %v7915_v14 }
 0x47e   : > { %v6194_v11 = vcombine.low %v1656_v6, %v1663_v7  ;;  %v6196_v12 = vcombine.high %v1656_v6, %v1663_v7  ;;  %v6198_v13 = vcombine.low %v1672_v8, %v1679_v57  ;;  %v6200_v15 = vcombine.high %v1672_v8, %v1679_v57 }
 0x47f   : > { %v2295_v43 = vpack.c.bf16 %v2287_v32, %v2287_v32 }
 0x480   : > { %v1703_v17 = vrot.slane %v6194_v11, %v7715_v58  ;;  %v1719_v18 = vrot.slane %v6196_v12, %v7715_v58  ;;  %v1735_v19 = vrot.slane %v6198_v13, %v7715_v58  ;;  %v1751_v20 = vrot.slane %v6200_v15, %v7715_v58 }
 0x482   : > { %v1768_v21 = vcombine.low %v1703_v17, %v1719_v18  ;;  %v1800_v22 = vcombine.low %v1735_v19, %v1751_v20  ;;  %v1769_v24 = vcombine.high %v1703_v17, %v1719_v18  ;;  %v1801_v46 = vcombine.high %v1735_v19, %v1751_v20 }
 0x484   : > { %v1776_v27 = vrot.slane %v1768_v21, %v7718_v1  ;;  %v1808_v28 = vrot.slane %v1800_v22, %v7718_v1  ;;  %v1783_v16 = vrot.slane %v1769_v24, %v7718_v1  ;;  %v1815_v34 = vrot.slane %v1801_v46, %v7718_v1 }
 0x486   : > { %v1820_v36 = vcombine.low %v1776_v27, %v1808_v28  ;;  %v1821_v37 = vcombine.high %v1776_v27, %v1808_v28  ;;  %v1822_v60 = vcombine.low %v1783_v16, %v1815_v34  ;;  %v1823_v61 = vcombine.high %v1783_v16, %v1815_v34 }
 0x488   : > { %v1828_v38 = vpack.c.bf16 %v1820_v36, %v1820_v36  ;;  %v1829_v39 = vpack.c.bf16 %v1821_v37, %v1821_v37  ;;  %v1830_v40 = vpack.c.bf16 %v1822_v60, %v1822_v60  ;;  %v1831_v41 = vpack.c.bf16 %v1823_v61, %v1823_v61  ;;  %v6890_v60 = vld [vmem:[%s7600_s3] sm:$0xff]  }
 0x48a   : > { %v2487_v33 = vsel %vm2301_vm2, %v1828_v38, 0  ;;  %v2533_v9 = vsel %vm2301_vm2, %v1829_v39, 0  ;;  %v2579_v54 = vsel %vm2301_vm2, %v1830_v40, 0  ;;  %v2625_v14 = vsel %vm2301_vm2, %v1831_v41, 0  ;;  %v6891_v39 = vld [vmem:[%s7600_s3 + $0x8] sm:$0xff]  }
 0x48b   : > { %6571 = vmatpush3.bf16.msra.mxu0 %v2487_v33  ;;  %6577 = vmatpush3.bf16.msra.mxu1 %v2533_v9 }
 0x48c   : > { %6582 = vmatprep.subr.bf16.mxu0 %v7259_v4  ;;  %6588 = vmatprep.subr.bf16.mxu1 %v7259_v4 }
 0x48e   : > { %6573 = vmatmul.mubr.msk.bf16.vlgmr.msra.gmra.mrb[20].mxu0 %vm2201_vm3, %v2294_v42  ;;  %6579 = vmatmul.mubr.msk.bf16.vlgmr.msra.gmra.mrb[36].mxu1 %vm2201_vm3, %v2295_v43 }
 0x48f   : > { %6583 = vmatpush3.bf16.msra.mxu0 %v2579_v54  ;;  %6589 = vmatpush3.bf16.msra.mxu1 %v2625_v14 }
 0x490   : > { %6590 = vmatprep.mubr.msk.bf16.mxu1 %vm7260_vm0, %v7259_v4  ;;  %6584 = vmatprep.mubr.msk.bf16.mxu0 %vm7260_vm0, %v7259_v4 }
 0x491   : > { %6594 = vmatprep.subr.bf16.mxu0 %v7259_v4  ;;  %6614 = vmatprep.subr.bf16.mxu1 %v7259_v4 }
 0x49e   : > { %v2273_v44 = vpop.xlane.xlu0 %2272 }
 0x49f   : > { %7006 = vrcp.f32 %v2273_v44  ;;  %v6892_v44 = vld [vmem:[%s7600_s3 + $0x10] sm:$0xff]  }
 0x4a6   : > { %v2270_v10 = vpop.xlane.xlu1 %2269 }
 0x4a7   : > { %7008 = vrcp.f32 %v2270_v10 }
 0x4a9   : > { %v7007_v45 = vpop.eup %7006 }
 0x4aa   : > { %v2289_v47 = vmul.f32 %v7007_v45, %v7924_v23 }
 0x4ac   : > { %v2297_v48 = vpack.c.bf16 %v2289_v47, %v2289_v47 }
 0x4ae   : > { %6591 = vmatmul.mubr.msk.bf16.vlgmr.msra.gmra.mrb[40].mxu1 %vm2201_vm3, %v2297_v48 }
 0x4af   : > { %6630 = vmatprep.mubr.msk.bf16.mxu1 %vm7260_vm0, %v7259_v4 }
 0x4b1   : > { %v7009_v49 = vpop.eup %7008 }
 0x4b2   : > { %v2288_v52 = vmul.f32 %v7009_v49, %v7928_v25  ;;  %v6893_v49 = vld [vmem:[%s7600_s3 + $0x18] sm:$0xff]  }
 0x4b4   : > { %v2296_v62 = vpack.c.bf16 %v2288_v52, %v2288_v52 }
 0x4b6   : > { %6585 = vmatmul.mubr.msk.bf16.vlgmr.msra.gmra.mrb[24].mxu0 %vm2201_vm3, %v2296_v62 }
 0x4b7   : > { %6610 = vmatprep.mubr.msk.bf16.mxu0 %vm7260_vm0, %v7259_v4  ;;  %6595 = vmatpush3.bf16.msra.mxu0 %v6890_v60 }
 0x4b8   : > { %6596 = vmatprep.subr.bf16.mxu0 %v7259_v4 }
 0x4bb   : > { %6597 = vmatpush3.bf16.msra.mxu0 %v6891_v39  ;;  %v6897_v39 = vld [vmem:[%s7600_s3 + $0x38] sm:$0xff]  }
 0x4bc   : > { %6598 = vmatprep.subr.bf16.mxu0 %v7259_v4 }
 0x4bf   : > { %6599 = vmatpush3.bf16.msra.mxu0 %v6892_v44 }
 0x4c0   : > { %6600 = vmatprep.subr.bf16.mxu0 %v7259_v4 }
 0x4c3   : > { %6601 = vmatpush3.bf16.msra.mxu0 %v6893_v49 }
 0x4c4   : > { %6602 = vmatprep.subr.bf16.mxu0 %v7259_v4 }
 0x534   : > { %v2339_v63 = vpop.f32.mrb[12].mxu0 }
 0x535   : > { %v6550_v50 = vpop.f32.mrb[13].mxu0 }
 0x536   : > { %v2342_v51 = vpop.f32.mrb[14].mxu0 }
 0x537   : > { %v6551_v53 = vpop.f32.mrb[15].mxu0 }
 0x53d   : > { %v2385_v23 = vpop.f32.mrb[28].mxu1 }
 0x53e   : > { %v6556_v55 = vpop.f32.mrb[29].mxu1 }
 0x53f   : > { %v2388_v56 = vpop.f32.mrb[30].mxu1 }
 0x540   : > { %v6557_v59 = vpop.f32.mrb[31].mxu1  ;;  %v6894_v56 = vld [vmem:[%s7600_s3 + $0x20] sm:$0xff]  }
 0x541   : > { %6603 = vmatpush3.bf16.msra.mxu0 %v6894_v56  ;;  %v6895_v59 = vld [vmem:[%s7600_s3 + $0x28] sm:$0xff]  }
 0x542   : > { %6604 = vmatprep.subr.bf16.mxu0 %v7259_v4 }
 0x544   : > { %v2431_v0 = vpop.f32.mrb[16].mxu0 }
 0x545   : > { %v2667_v2 = vcombine.low %v2339_v63, %v2431_v0  ;;  %v2668_v5 = vcombine.high %v2339_v63, %v2431_v0  ;;  %v6562_v6 = vpop.f32.mrb[17].mxu0  ;;  %6605 = vmatpush3.bf16.msra.mxu0 %v6895_v59 }
 0x546   : > { %v2434_v7 = vpop.f32.mrb[18].mxu0  ;;  %6606 = vmatprep.subr.bf16.mxu0 %v7259_v4 }
 0x547   : > { %v6563_v25 = vpop.f32.mrb[19].mxu0  ;;  %v2675_v15 = vrot.slane %v2667_v2, %v7715_v58  ;;  %v2682_v17 = vrot.slane %v2668_v5, %v7715_v58 }
 0x54c   : > { %v2477_v8 = vpop.f32.mrb[32].mxu1 }
 0x54d   : > { %v2683_v57 = vcombine.low %v2385_v23, %v2477_v8  ;;  %v2684_v11 = vcombine.high %v2385_v23, %v2477_v8  ;;  %v6568_v12 = vpop.f32.mrb[33].mxu1 }
 0x54e   : > { %v2480_v13 = vpop.f32.mrb[34].mxu1 }
 0x54f   : > { %v2691_v18 = vrot.slane %v2683_v57, %v7715_v58  ;;  %v2698_v19 = vrot.slane %v2684_v11, %v7715_v58  ;;  %v6569_v20 = vpop.f32.mrb[35].mxu1 }
 0x551   : > { %v2731_v21 = vcombine.low %v2675_v15, %v2691_v18  ;;  %v2732_v22 = vcombine.high %v2675_v15, %v2691_v18  ;;  %v2747_v24 = vcombine.low %v2682_v17, %v2698_v19  ;;  %v2748_v46 = vcombine.high %v2682_v17, %v2698_v19 }
 0x553   : > { %v2739_v26 = vrot.slane %v2731_v21, %v7718_v1  ;;  %v2746_v27 = vrot.slane %v2732_v22, %v7718_v1  ;;  %v2755_v28 = vrot.slane %v2747_v24, %v7718_v1  ;;  %v2762_v16 = vrot.slane %v2748_v46, %v7718_v1 }
 0x555   : > { %v6217_v34 = vcombine.low %v2739_v26, %v2746_v27  ;;  %v6219_v35 = vcombine.high %v2739_v26, %v2746_v27  ;;  %v6221_v36 = vcombine.low %v2755_v28, %v2762_v16  ;;  %v6223_v37 = vcombine.high %v2755_v28, %v2762_v16 }
 0x557   : > { %v2811_v61 = vrot.slane %v6217_v34, %v7715_v58  ;;  %v2827_v29 = vrot.slane %v6219_v35, %v7715_v58  ;;  %v2843_v32 = vrot.slane %v6221_v36, %v7715_v58  ;;  %v2859_v38 = vrot.slane %v6223_v37, %v7715_v58  ;;  %v6896_v34 = vld [vmem:[%s7600_s3 + $0x30] sm:$0xff]  }
 0x558   : > { %6607 = vmatpush3.bf16.msra.mxu0 %v6896_v34  ;;  %v6910_v34 = vld [vmem:[%s7610_s4 + $0x40] ss:$8 sps:$4 sm:$0xff]  }
 0x559   : > { %v2868_v33 = vcombine.high %v2811_v61, %v2827_v29  ;;  %v2900_v9 = vcombine.high %v2843_v32, %v2859_v38  ;;  %v2867_v40 = vcombine.low %v2811_v61, %v2827_v29  ;;  %v2899_v41 = vcombine.low %v2843_v32, %v2859_v38  ;;  %6608 = vmatprep.subr.bf16.mxu0 %v7259_v4 }
 0x55b   : > { %v2882_v42 = vrot.slane %v2868_v33, %v7718_v1  ;;  %v2914_v43 = vrot.slane %v2900_v9, %v7718_v1  ;;  %v8010_v54 = vrot.slane %v2867_v40, %v7718_v1  ;;  %v8013_v14 = vrot.slane %v2899_v41, %v7718_v1 }
 0x55c   : > { %6609 = vmatpush3.bf16.msra.mxu0 %v6897_v39 }
 0x55d   : > { %v2933_v10 = vcombine.low %v2882_v42, %v2914_v43  ;;  %v2932_v45 = vcombine.high %v8010_v54, %v8013_v14  ;;  %v2934_v47 = vcombine.high %v2882_v42, %v2914_v43  ;;  %v2931_v48 = vcombine.low %v8010_v54, %v8013_v14 }
 0x55f   : > { %2944 = vrot.lane.b32.xlu1 %v2933_v10, %s7266_s5  ;;  %2940 = vrot.lane.b32.xlu0 %v2932_v45, %s7267_s21 }
 0x561   : > { %v2523_v52 = vpop.f32.mrb[20].mxu0  ;;  %v2569_v62 = vpop.f32.mrb[36].mxu1 }
 0x562   : > { %v6574_v63 = vpop.f32.mrb[21].mxu0  ;;  %v6580_v50 = vpop.f32.mrb[37].mxu1 }
 0x563   : > { %2948 = vrot.lane.b32.xlu1 %v2934_v47, %s7265_s17  ;;  %v2526_v51 = vpop.f32.mrb[22].mxu0  ;;  %v2572_v53 = vpop.f32.mrb[38].mxu1 }
 0x564   : > { %v6575_v23 = vpop.f32.mrb[23].mxu0  ;;  %v6581_v55 = vpop.f32.mrb[39].mxu1 }
 0x581   : > { %v2661_v0 = vpop.f32.mrb[40].mxu1 }
 0x582   : > { %v2715_v2 = vcombine.low %v2569_v62, %v2661_v0  ;;  %v2716_v5 = vcombine.high %v2569_v62, %v2661_v0  ;;  %v6592_v6 = vpop.f32.mrb[41].mxu1 }
 0x583   : > { %v2664_v7 = vpop.f32.mrb[42].mxu1  ;;  %v8066_v6 = vsub.s32 1, %v7672_v30 }
 0x584   : > { %v6593_v25 = vpop.f32.mrb[43].mxu1  ;;  %v2723_v15 = vrot.slane %v2715_v2, %v7715_v58  ;;  %v2730_v17 = vrot.slane %v2716_v5, %v7715_v58  ;;  %v8069_v7 = vld [vmem:[%s7626_s30] sm:$0xff] }
 0x585   : > { %v2984_v25 = vrot.slane %v8069_v7, %v8066_v6 }
 0x589   : > { %v2615_v8 = vpop.f32.mrb[24].mxu0 }
 0x58a   : > { %v2699_v57 = vcombine.low %v2523_v52, %v2615_v8  ;;  %v2700_v11 = vcombine.high %v2523_v52, %v2615_v8  ;;  %v6586_v12 = vpop.f32.mrb[25].mxu0 }
 0x58b   : > { %v2618_v13 = vpop.f32.mrb[26].mxu0 }
 0x58c   : > { %v2707_v18 = vrot.slane %v2699_v57, %v7715_v58  ;;  %v2714_v19 = vrot.slane %v2700_v11, %v7715_v58  ;;  %v6587_v20 = vpop.f32.mrb[27].mxu0 }
 0x58d   : > { %v6903_v20 = vld [vmem:[%s7610_s4 + $0x14] ss:$8 sps:$4 sm:$0xff]  }
 0x58e   : > { %v2763_v21 = vcombine.low %v2707_v18, %v2723_v15  ;;  %v2764_v22 = vcombine.high %v2707_v18, %v2723_v15  ;;  %v2779_v24 = vcombine.low %v2714_v19, %v2730_v17  ;;  %v2780_v46 = vcombine.high %v2714_v19, %v2730_v17  ;;  %v7053_v15 = vld [vmem:[%s7621_s25] sm:$0xff] }
 0x58f   : > { %v6898_v18 = vld [vmem:[%s7610_s4] ss:$8 sps:$4 sm:$0xff]   ;;  %v6900_v19 = vld [vmem:[%s7610_s4 + $0x4] ss:$8 sps:$4 sm:$0xff]  }
 0x590   : > { %v2771_v26 = vrot.slane %v2763_v21, %v7718_v1  ;;  %v2778_v27 = vrot.slane %v2764_v22, %v7718_v1  ;;  %v2787_v28 = vrot.slane %v2779_v24, %v7718_v1  ;;  %v2794_v16 = vrot.slane %v2780_v46, %v7718_v1  ;;  %3327 = vmatprep.subr.bf16.mxu0 %v6900_v19  ;;  %v6901_v21 = vld [vmem:[%s7610_s4 + $0x10] ss:$8 sps:$4 sm:$0xff]   ;;  %v6906_v22 = vld [vmem:[%s7610_s4 + $0x24] ss:$8 sps:$4 sm:$0xff]   ;;  %v6904_v46 = vld [vmem:[%s7610_s4 + $0x20] ss:$8 sps:$4 sm:$0xff]  }
 0x591   : > { %v6922_v24 = vld [vmem:[%s7563_s11] sm:$0xff]  }
 0x592   : > { %v6218_v35 = vcombine.low %v2771_v26, %v2778_v27  ;;  %v6220_v36 = vcombine.high %v2771_v26, %v2778_v27  ;;  %v6222_v37 = vcombine.low %v2787_v28, %v2794_v16  ;;  %v6224_v60 = vcombine.high %v2787_v28, %v2794_v16  ;;  %6615 = vmatpush3.bf16.msra.mxu1 %v6922_v24  ;;  %v6923_v26 = vld [vmem:[%s7563_s11 + $0x8] sm:$0xff]   ;;  %v6909_v27 = vld [vmem:[%s7610_s4 + $0x34] ss:$8 sps:$4 sm:$0xff]   ;;  %v6907_v28 = vld [vmem:[%s7610_s4 + $0x30] ss:$8 sps:$4 sm:$0xff]  }
 0x593   : > { %6616 = vmatprep.subr.bf16.mxu1 %v7259_v4  ;;  %v6912_v16 = vld [vmem:[%s7610_s4 + $0x44] ss:$8 sps:$4 sm:$0xff]  }
 0x594   : > { %v2818_v61 = vrot.slane %v6218_v35, %v7715_v58  ;;  %v2834_v29 = vrot.slane %v6220_v36, %v7715_v58  ;;  %v2850_v32 = vrot.slane %v6222_v37, %v7715_v58  ;;  %v2866_v38 = vrot.slane %v6224_v60, %v7715_v58  ;;  %v6915_v35 = vld [vmem:[%s7610_s4 + $0x54] ss:$8 sps:$4 sm:$0xff]   ;;  %v6913_v36 = vld [vmem:[%s7610_s4 + $0x50] ss:$8 sps:$4 sm:$0xff]   ;;  %v6918_v37 = vld [vmem:[%s7610_s4 + $0x64] ss:$8 sps:$4 sm:$0xff]  }
 0x595   : > { %v6916_v60 = vld [vmem:[%s7610_s4 + $0x60] ss:$8 sps:$4 sm:$0xff]  }
 0x596   : > { %v2883_v33 = vcombine.low %v2818_v61, %v2834_v29  ;;  %v2915_v9 = vcombine.low %v2850_v32, %v2866_v38  ;;  %v2884_v40 = vcombine.high %v2818_v61, %v2834_v29  ;;  %v2916_v41 = vcombine.high %v2850_v32, %v2866_v38  ;;  %6617 = vmatpush3.bf16.msra.mxu1 %v6923_v26  ;;  %v6921_v61 = vld [vmem:[%s7610_s4 + $0x74] ss:$8 sps:$4 sm:$0xff]   ;;  %v6919_v29 = vld [vmem:[%s7610_s4 + $0x70] ss:$8 sps:$4 sm:$0xff]   ;;  %v649_v32 = vld [vmem:[%s8707_s28] sm:$0xff] }
 0x597   : > { %6618 = vmatprep.subr.bf16.mxu1 %v7259_v4  ;;  %v3238_v38 = vpack.c.bf16 %v649_v32, %v649_v32 }
 0x598   : > { %v2891_v42 = vrot.slane %v2883_v33, %v7718_v1  ;;  %v2923_v43 = vrot.slane %v2915_v9, %v7718_v1  ;;  %v2898_v44 = vrot.slane %v2884_v40, %v7718_v1  ;;  %v2930_v10 = vrot.slane %v2916_v41, %v7718_v1  ;;  %v6924_v41 = vld [vmem:[%s7563_s11 + $0x10] sm:$0xff]  }
 0x59a   : > { %v2936_v45 = vcombine.high %v2891_v42, %v2923_v43  ;;  %v2935_v47 = vcombine.low %v2891_v42, %v2923_v43  ;;  %v2938_v49 = vcombine.high %v2898_v44, %v2930_v10  ;;  %v2937_v52 = vcombine.low %v2898_v44, %v2930_v10  ;;  %6619 = vmatpush3.bf16.msra.mxu1 %v6924_v41  ;;  %v6925_v42 = vld [vmem:[%s7563_s11 + $0x18] sm:$0xff]   ;;  %v6926_v43 = vld [vmem:[%s7563_s11 + $0x20] sm:$0xff]   ;;  %v6927_v44 = vld [vmem:[%s7563_s11 + $0x28] sm:$0xff]  }
 0x59b   : > { %6620 = vmatprep.subr.bf16.mxu1 %v7259_v4  ;;  %v6928_v10 = vld [vmem:[%s7563_s11 + $0x30] sm:$0xff]  }
 0x59c   : > { %2956 = vrot.lane.b32.xlu1 %v2936_v45, %s7261_s0  ;;  %2952 = vrot.lane.b32.xlu0 %v2935_v47, %s7264_s26  ;;  %v6929_v45 = vld [vmem:[%s7563_s11 + $0x38] sm:$0xff]   ;;  %v3241_v47 = vsub.s32 5, %v7672_v30 }
 0x59e   : > { %6621 = vmatpush3.bf16.msra.mxu1 %v6925_v42 }
 0x59f   : > { %6622 = vmatprep.subr.bf16.mxu1 %v7259_v4 }
 0x5a0   : > { %2964 = vrot.lane.b32.xlu1 %v2938_v49, %s7262_s10  ;;  %2960 = vrot.lane.b32.xlu0 %v2937_v52, %s7263_s22  ;;  %v3242_v49 = vrot.slane %v8069_v7, %v3241_v47  ;;  %v7054_v52 = vld [vmem:[%s7626_s30 + $0x8] sm:$0xff] }
 0x5a2   : > { %6623 = vmatpush3.bf16.msra.mxu1 %v6926_v43 }
 0x5a3   : > { %6624 = vmatprep.subr.bf16.mxu1 %v7259_v4 }
 0x5a6   : > { %6625 = vmatpush3.bf16.msra.mxu1 %v6927_v44 }
 0x5a7   : > { %6626 = vmatprep.subr.bf16.mxu1 %v7259_v4 }
 0x5aa   : > { %6627 = vmatpush3.bf16.msra.mxu1 %v6928_v10 }
 0x5ab   : > { %6628 = vmatprep.subr.bf16.mxu1 %v7259_v4 }
 0x5ae   : > { %6629 = vmatpush3.bf16.msra.mxu1 %v6929_v45 }
 0x5af   : > { %6634 = vmatprep.subr.bf16.mxu1 %v7259_v4 }
 0x5d1   : > { %v2945_v62 = vpop.permute.xlu1 %2944  ;;  %v2941_v63 = vpop.permute.xlu0 %2940 }
 0x5d2   : > { %v2967_v50 = vsel %vm1832_vm1, %v2931_v48, %v2941_v63 }
 0x5d3   : > { %v2969_v53 = vsel %vm2968_vm4, %v2967_v50, %v2945_v62  ;;  %v3246_v62 = vrot.slane %v7054_v52, %v3241_v47 }
 0x5d5   : > { %v2949_v51 = vpop.permute.xlu1 %2948 }
 0x5d6   : > { %v2971_v23 = vsel %vm2970_vm5, %v2969_v53, %v2949_v51 }
 0x60e   : > { %v2953_v55 = vpop.permute.xlu0 %2952  ;;  %v2957_v56 = vpop.permute.xlu1 %2956 }
 0x60f   : > { %v2973_v59 = vsel %vm2972_vm6, %v2971_v23, %v2953_v55 }
 0x610   : > { %v2975_v54 = vsel %vm2974_vm7, %v2973_v59, %v2957_v56 }
 0x612   : > { %v2961_v14 = vpop.permute.xlu0 %2960  ;;  %v2965_v48 = vpop.permute.xlu1 %2964 }
 0x613   : > { %v2977_v0 = vsel %vm2976_vm8, %v2975_v54, %v2961_v14  ;;  %v3088_v14 = vsub.s32 2, %v7672_v30 }
 0x614   : > { %v2979_v2 = vsel %vm2978_vm9, %v2977_v0, %v2965_v48  ;;  %v3093_v48 = vsub.s32 3, %v7672_v30 }
 0x615   : > { %v2980_v5 = vpack.c.bf16 %v2979_v2, %v2979_v2  ;;  %v3089_v0 = vrot.slane %v8069_v7, %v3088_v14 }
 0x617   : > { %6611 = vmatmul.mubr.bf16.vlgmr.msra.gmra.mrb[28].mxu0 %v2980_v5 }
 0x618   : > { %3359 = vmatprep.mubr.bf16.mxu0 %v7258_v3  ;;  %3328 = vmatpush1.bf16.msra.mxu0 %v6898_v18 }
 0x619   : > { %3329 = vmatprep.subr.bf16.mxu0 %v6903_v20 }
 0x61c   : > { %3330 = vmatpush1.bf16.msra.mxu0 %v6901_v21 }
 0x61d   : > { %3331 = vmatprep.subr.bf16.mxu0 %v6906_v22 }
 0x620   : > { %3332 = vmatpush1.bf16.msra.mxu0 %v6904_v46 }
 0x621   : > { %3333 = vmatprep.subr.bf16.mxu0 %v6909_v27 }
 0x624   : > { %3334 = vmatpush1.bf16.msra.mxu0 %v6907_v28 }
 0x625   : > { %3335 = vmatprep.subr.bf16.mxu0 %v6912_v16 }
 0x628   : > { %3336 = vmatpush1.bf16.msra.mxu0 %v6910_v34 }
 0x629   : > { %3337 = vmatprep.subr.bf16.mxu0 %v6915_v35 }
 0x62c   : > { %3338 = vmatpush1.bf16.msra.mxu0 %v6913_v36 }
 0x62d   : > { %3339 = vmatprep.subr.bf16.mxu0 %v6918_v37 }
 0x630   : > { %3340 = vmatpush1.bf16.msra.mxu0 %v6916_v60 }
 0x631   : > { %3341 = vmatprep.subr.bf16.mxu0 %v6921_v61 }
 0x634   : > { %3342 = vmatpush1.bf16.msra.mxu0 %v6919_v29 }
 0x635   : > { %6658 = vmatprep.subr.bf16.mxu0 %v7259_v4 }
 0x637   : > { %3360 = vmatmul.mubr.bf16.vlgmr.msra.gmra.mrb[32].mxu0 %v3238_v38 }
 0x638   : > { %6660 = vmatprep.mubr.msk.bf16.mxu0 %vm7260_vm0, %v7259_v4 }
 0x6ea   : > { %v3067_v8 = vpop.f32.mrb[28].mxu0 }
 0x6eb   : > { %v3068_v57 = vadd.f32 %v3067_v8, %v2984_v25  ;;  %v6612_v11 = vpop.f32.mrb[29].mxu0  ;;  %v3094_v25 = vrot.slane %v8069_v7, %v3093_v48 }
 0x6ec   : > { %v3070_v12 = vpop.f32.mrb[30].mxu0 }
 0x6ed   : > { %v6613_v13 = vpop.f32.mrb[31].mxu0  ;;  %v3073_v17 = vadd.f32 %v7053_v15, %v3068_v57 }
 0x6ef   : > { %3074 = vadd.xlane.f32.xlu0 %v3073_v17 }
 0x70a   : > { %v3361_v63 = vpop.f32.mrb[32].mxu0 }
 0x70b   : > { %v8117_v50 = vadd.f32 %v3361_v63, %v3242_v49  ;;  %v3363_v51 = vpop.f32.mrb[33].mxu0 }
 0x70c   : > { %v8119_v53 = vadd.f32 %v3363_v51, %v3246_v62  ;;  %v3365_v23 = vpop.f32.mrb[34].mxu0 }
 0x70d   : > { %3671 = vrot.lane.b32.xlu0 %v8117_v50, %s7262_s10  ;;  %v3366_v55 = vpop.f32.mrb[35].mxu0 }
 0x70e   : > { %v3147_v55 = vsub.s32 4, %v7672_v30 }
 0x711   : > { %3677 = vrot.lane.b32.xlu0 %v8117_v50, %s7261_s0 }
 0x77c   : > { %v3075_v39 = vpop.xlane.xlu0 %3074 }
 0x77d   : > { %v3077_v33 = vmul.f32 0.0078125, %v3075_v39 }
 0x77f   : > { %v3078_v9 = vsub.f32 %v3073_v17, %v3077_v33 }
 0x780   : > { %v3672_v12 = vpop.permute.xlu0 %3671 }
 0x781   : > { %v3079_v40 = vmul.f32 %v3078_v9, %v3078_v9 }
 0x783   : > { %3080 = vadd.xlane.f32.xlu1 %v3079_v40 }
 0x784   : > { %v3678_v15 = vpop.permute.xlu0 %3677 }
 0x785   : > { %v3708_v19 = vcombine.low %v3672_v12, %v3678_v15  ;;  %v3709_v20 = vcombine.high %v3672_v12, %v3678_v15 }
 0x787   : > { %v3716_v24 = vrot.slane %v3708_v19, %v7715_v58  ;;  %v3723_v46 = vrot.slane %v3709_v20, %v7715_v58 }
 0x794   : > { %3674 = vrot.lane.b32.xlu1 %v8117_v50, %s7263_s22 }
 0x810   : > { %v3081_v56 = vpop.xlane.xlu1 %3080 }
 0x811   : > { %v3082_v59 = vmul.f32 0.0078125, %v3081_v56  ;;  %v3148_v56 = vrot.slane %v8069_v7, %v3147_v55 }
 0x813   : > { %v3083_v54 = vadd.f32 1e-05, %v3082_v59 }
 0x814   : > { %v3675_v13 = vpop.permute.xlu1 %3674 }
 0x815   : > { %7010 = vrsqrt.f32 %v3083_v54  ;;  %v3692_v17 = vcombine.low %v8117_v50, %v3675_v13  ;;  %v3693_v18 = vcombine.high %v8117_v50, %v3675_v13 }
 0x817   : > { %v3700_v21 = vrot.slane %v3692_v17, %v7715_v58  ;;  %v3707_v22 = vrot.slane %v3693_v18, %v7715_v58 }
 0x819   : > { %v3756_v26 = vcombine.low %v3700_v21, %v3716_v24  ;;  %v3757_v27 = vcombine.high %v3700_v21, %v3716_v24  ;;  %v3772_v28 = vcombine.low %v3707_v22, %v3723_v46  ;;  %v3773_v16 = vcombine.high %v3707_v22, %v3723_v46 }
 0x81b   : > { %v3764_v34 = vrot.slane %v3756_v26, %v7718_v1  ;;  %v3771_v35 = vrot.slane %v3757_v27, %v7718_v1  ;;  %v3780_v36 = vrot.slane %v3772_v28, %v7718_v1  ;;  %v3787_v37 = vrot.slane %v3773_v16, %v7718_v1 }
 0x81d   : > { %v6265_v60 = vcombine.low %v3764_v34, %v3771_v35  ;;  %v6267_v61 = vcombine.high %v3764_v34, %v3771_v35  ;;  %v6269_v29 = vcombine.low %v3780_v36, %v3787_v37  ;;  %v6271_v32 = vcombine.high %v3780_v36, %v3787_v37 }
 0x81f   : > { %v7011_v2 = vpop.eup %7010  ;;  %v3836_v38 = vrot.slane %v6265_v60, %v7715_v58  ;;  %v3852_v39 = vrot.slane %v6267_v61, %v7715_v58  ;;  %v3868_v33 = vrot.slane %v6269_v29, %v7715_v58 }
 0x820   : > { %v3085_v5 = vmul.f32 %v7011_v2, %v3078_v9  ;;  %v3884_v9 = vrot.slane %v6271_v32, %v7715_v58 }
 0x821   : > { %v3892_v40 = vcombine.low %v3836_v38, %v3852_v39  ;;  %v3893_v44 = vcombine.high %v3836_v38, %v3852_v39 }
 0x822   : > { %v3090_v8 = vmul.f32 %v3089_v0, %v3085_v5  ;;  %v3924_v41 = vcombine.low %v3868_v33, %v3884_v9  ;;  %v3925_v10 = vcombine.high %v3868_v33, %v3884_v9 }
 0x823   : > { %v3900_v42 = vrot.slane %v3892_v40, %v7718_v1  ;;  %v3907_v47 = vrot.slane %v3893_v44, %v7718_v1 }
 0x824   : > { %v8135_v57 = vadd.f32 %v3094_v25, %v3090_v8  ;;  %v3932_v43 = vrot.slane %v3924_v41, %v7718_v1  ;;  %v3939_v49 = vrot.slane %v3925_v10, %v7718_v1 }
 0x826   : > { %v3144_v11 = vpack.c.bf16 %v8135_v57, %v8135_v57  ;;  %v3956_v45 = vcombine.low %v3900_v42, %v3932_v43  ;;  %v8159_v62 = vcombine.high %v3900_v42, %v3932_v43  ;;  %v8161_v63 = vcombine.low %v3907_v47, %v3939_v49 }
 0x827   : > { %v8165_v23 = vcombine.high %v3907_v47, %v3939_v49 }
 0x828   : > { %6631 = vmatmul.mubr.bf16.vlgmr.msra.gmra.mrb[44].mxu1 %v3144_v11  ;;  %v3964_v52 = vpack.c.bf16 %v3956_v45, %v3956_v45  ;;  %v3965_v32 = vpack.c.bf16 %v8159_v62, %v8159_v62 }
 0x829   : > { %6636 = vmatprep.mubr.msk.bf16.mxu1 %vm7260_vm0, %v7259_v4 }
 0x82a   : > { %v4278_v51 = vsel %vm1832_vm1, %v3964_v52, 0 }
 0x82b   : > { %6635 = vmatpush3.bf16.xpose.msra.mxu1 %v4278_v51 }
 0x82c   : > { %6640 = vmatprep.subr.bf16.mxu1 %v7259_v4 }
 0x8fb   : > { %v3231_v59 = vpop.f32.mrb[44].mxu1 }
 0x8fc   : > { %v3232_v54 = vadd.f32 %v3231_v59, %v3148_v56  ;;  %v6632_v0 = vpop.f32.mrb[45].mxu1 }
 0x8fd   : > { %v3234_v2 = vpop.f32.mrb[46].mxu1  ;;  %v4324_v0 = vsel %vm1832_vm1, %v3965_v32, 0 }
 0x8fe   : > { %v3237_v5 = vmul.f32 0.25, %v3232_v54  ;;  %v6633_v25 = vpop.f32.mrb[47].mxu1 }
 0x900   : > { %3369 = vrot.lane.b32.xlu1 %v3237_v5, %s7262_s10  ;;  %3372 = vrot.lane.b32.xlu0 %v3237_v5, %s7263_s22 }
 0x904   : > { %3375 = vrot.lane.b32.xlu1 %v3237_v5, %s7261_s0  ;;  %3680 = vrot.lane.b32.xlu0 %v8117_v50, %s7264_s26 }
 0x908   : > { %3683 = vrot.lane.b32.xlu1 %v8117_v50, %s7265_s17  ;;  %3686 = vrot.lane.b32.xlu0 %v8117_v50, %s7266_s5 }
 0x90c   : > { %3689 = vrot.lane.b32.xlu1 %v8117_v50, %s7267_s21  ;;  %3378 = vrot.lane.b32.xlu0 %v3237_v5, %s7264_s26 }
 0x910   : > { %3381 = vrot.lane.b32.xlu1 %v3237_v5, %s7265_s17  ;;  %3384 = vrot.lane.b32.xlu0 %v3237_v5, %s7266_s5 }
 0x914   : > { %3387 = vrot.lane.b32.xlu1 %v3237_v5, %s7267_s21  ;;  %3976 = vrot.lane.b32.xlu0 %v8119_v53, %s7263_s22 }
 0x918   : > { %3973 = vrot.lane.b32.xlu1 %v8119_v53, %s7262_s10 }
 0x91c   : > { %3979 = vrot.lane.b32.xlu1 %v8119_v53, %s7261_s0 }
 0x972   : > { %v3370_v7 = vpop.permute.xlu1 %3369  ;;  %v3373_v8 = vpop.permute.xlu0 %3372 }
 0x973   : > { %v3390_v50 = vcombine.low %v3237_v5, %v3373_v8  ;;  %v3391_v11 = vcombine.high %v3237_v5, %v3373_v8 }
 0x975   : > { %v3398_v18 = vrot.slane %v3390_v50, %v7715_v58  ;;  %v3405_v19 = vrot.slane %v3391_v11, %v7715_v58 }
 0x976   : > { %v3376_v12 = vpop.permute.xlu1 %3375  ;;  %v3681_v13 = vpop.permute.xlu0 %3680 }
 0x977   : > { %v3406_v15 = vcombine.low %v3370_v7, %v3376_v12  ;;  %v3407_v17 = vcombine.high %v3370_v7, %v3376_v12 }
 0x979   : > { %v3414_v20 = vrot.slane %v3406_v15, %v7715_v58  ;;  %v3421_v21 = vrot.slane %v3407_v17, %v7715_v58 }
 0x97a   : > { %v3684_v22 = vpop.permute.xlu1 %3683  ;;  %v3687_v24 = vpop.permute.xlu0 %3686 }
 0x97b   : > { %v3454_v46 = vcombine.low %v3398_v18, %v3414_v20  ;;  %v3455_v26 = vcombine.high %v3398_v18, %v3414_v20  ;;  %v3470_v27 = vcombine.low %v3405_v19, %v3421_v21  ;;  %v3471_v28 = vcombine.high %v3405_v19, %v3421_v21 }
 0x97c   : > { %v3724_v37 = vcombine.low %v3681_v13, %v3687_v24  ;;  %v3725_v60 = vcombine.high %v3681_v13, %v3687_v24 }
 0x97d   : > { %v3462_v16 = vrot.slane %v3454_v46, %v7718_v1  ;;  %v3469_v34 = vrot.slane %v3455_v26, %v7718_v1  ;;  %v3478_v35 = vrot.slane %v3470_v27, %v7718_v1  ;;  %v3485_v36 = vrot.slane %v3471_v28, %v7718_v1 }
 0x97e   : > { %v3690_v61 = vpop.permute.xlu1 %3689  ;;  %v3379_v29 = vpop.permute.xlu0 %3378  ;;  %v3732_v45 = vrot.slane %v3724_v37, %v7715_v58  ;;  %v3739_v47 = vrot.slane %v3725_v60, %v7715_v58 }
 0x97f   : > { %v6257_v38 = vcombine.low %v3462_v16, %v3469_v34  ;;  %v6259_v39 = vcombine.high %v3462_v16, %v3469_v34  ;;  %v6261_v33 = vcombine.low %v3478_v35, %v3485_v36  ;;  %v6263_v9 = vcombine.high %v3478_v35, %v3485_v36 }
 0x980   : > { %v3740_v40 = vcombine.low %v3684_v22, %v3690_v61  ;;  %v3741_v41 = vcombine.high %v3684_v22, %v3690_v61 }
 0x981   : > { %v8203_v42 = vrot.slane %v6257_v38, %v7715_v58  ;;  %v8206_v43 = vrot.slane %v6259_v39, %v7715_v58  ;;  %v8209_v44 = vrot.slane %v6261_v33, %v7715_v58  ;;  %v8212_v10 = vrot.slane %v6263_v9, %v7715_v58 }
 0x982   : > { %v3748_v49 = vrot.slane %v3740_v40, %v7715_v58  ;;  %v3755_v52 = vrot.slane %v3741_v41, %v7715_v58  ;;  %v3382_v62 = vpop.permute.xlu1 %3381  ;;  %v3385_v51 = vpop.permute.xlu0 %3384 }
 0x983   : > { %v3590_v56 = vcombine.low %v8203_v42, %v8206_v43  ;;  %v3591_v59 = vcombine.high %v8203_v42, %v8206_v43  ;;  %v3622_v54 = vcombine.low %v8209_v44, %v8212_v10  ;;  %v3422_v8 = vcombine.low %v3379_v29, %v3385_v51 }
 0x984   : > { %v3788_v2 = vcombine.low %v3732_v45, %v3748_v49  ;;  %v3789_v5 = vcombine.high %v3732_v45, %v3748_v49  ;;  %v3804_v25 = vcombine.low %v3739_v47, %v3755_v52  ;;  %v3805_v7 = vcombine.high %v3739_v47, %v3755_v52 }
 0x985   : > { %v3423_v50 = vcombine.high %v3379_v29, %v3385_v51  ;;  %v3598_v11 = vrot.slane %v3590_v56, %v7718_v1  ;;  %v3630_v12 = vrot.slane %v3622_v54, %v7718_v1  ;;  %v3430_v21 = vrot.slane %v3422_v8, %v7715_v58 }
 0x986   : > { %v3796_v13 = vrot.slane %v3788_v2, %v7718_v1  ;;  %v3803_v15 = vrot.slane %v3789_v5, %v7718_v1  ;;  %v3812_v17 = vrot.slane %v3804_v25, %v7718_v1  ;;  %v3819_v18 = vrot.slane %v3805_v7, %v7718_v1  ;;  %v3388_v19 = vpop.permute.xlu1 %3387  ;;  %v3977_v20 = vpop.permute.xlu0 %3976 }
 0x987   : > { %v3437_v22 = vrot.slane %v3423_v50, %v7715_v58  ;;  %v3438_v24 = vcombine.low %v3382_v62, %v3388_v19  ;;  %v3439_v46 = vcombine.high %v3382_v62, %v3388_v19  ;;  %v3994_v36 = vcombine.low %v8119_v53, %v3977_v20 }
 0x988   : > { %v6266_v26 = vcombine.low %v3796_v13, %v3803_v15  ;;  %v6268_v27 = vcombine.high %v3796_v13, %v3803_v15  ;;  %v6270_v28 = vcombine.low %v3812_v17, %v3819_v18  ;;  %v6272_v16 = vcombine.high %v3812_v17, %v3819_v18 }
 0x989   : > { %v3446_v34 = vrot.slane %v3438_v24, %v7715_v58  ;;  %v3453_v35 = vrot.slane %v3439_v46, %v7715_v58  ;;  %v3995_v37 = vcombine.high %v8119_v53, %v3977_v20  ;;  %v3623_v41 = vcombine.high %v8209_v44, %v8212_v10 }
 0x98a   : > { %v8238_v60 = vrot.slane %v6266_v26, %v7715_v58  ;;  %v8241_v61 = vrot.slane %v6268_v27, %v7715_v58  ;;  %v8244_v29 = vrot.slane %v6270_v28, %v7715_v58  ;;  %v8247_v32 = vrot.slane %v6272_v16, %v7715_v58  ;;  %v3974_v38 = vpop.permute.xlu1 %3973 }
 0x98b   : > { %v3486_v39 = vcombine.low %v3430_v21, %v3446_v34  ;;  %v3487_v33 = vcombine.high %v3430_v21, %v3446_v34  ;;  %v3502_v9 = vcombine.low %v3437_v22, %v3453_v35  ;;  %v3503_v40 = vcombine.high %v3437_v22, %v3453_v35 }
 0x98c   : > { %v4002_v45 = vrot.slane %v3994_v36, %v7715_v58  ;;  %v4009_v47 = vrot.slane %v3995_v37, %v7715_v58  ;;  %v3654_v49 = vcombine.low %v3598_v11, %v3630_v12  ;;  %v3655_v5 = vcombine.high %v3598_v11, %v3630_v12 }
 0x98d   : > { %v3494_v52 = vrot.slane %v3486_v39, %v7718_v1  ;;  %v3501_v62 = vrot.slane %v3487_v33, %v7718_v1  ;;  %v3510_v51 = vrot.slane %v3502_v9, %v7718_v1  ;;  %v3517_v56 = vrot.slane %v3503_v40, %v7718_v1 }
 0x98e   : > { %v3662_v54 = vpack.c.bf16 %v3654_v49, %v3654_v49  ;;  %v3980_v2 = vpop.permute.xlu1 %3979  ;;  %v3908_v25 = vcombine.low %v8238_v60, %v8241_v61  ;;  %v3940_v44 = vcombine.low %v8244_v29, %v8247_v32  ;;  %v3663_v27 = vpack.c.bf16 %v3655_v5, %v3655_v5 }
 0x98f   : > { %v6258_v10 = vcombine.low %v3494_v52, %v3501_v62  ;;  %v6260_v7 = vcombine.high %v3494_v52, %v3501_v62  ;;  %v6262_v8 = vcombine.low %v3510_v51, %v3517_v56  ;;  %v6264_v50 = vcombine.high %v3510_v51, %v3517_v56 }
 0x990   : > { %6637 = vmatmul.mubr.msk.bf16.vlgmr.msra.gmra.mrb[48].mxu1 %vm1832_vm1, %v3662_v54  ;;  %v4010_v13 = vcombine.low %v3974_v38, %v3980_v2  ;;  %v4011_v15 = vcombine.high %v3974_v38, %v3980_v2  ;;  %v8263_v17 = vrot.slane %v3908_v25, %v7718_v1  ;;  %v8266_v18 = vrot.slane %v3940_v44, %v7718_v1 }
 0x991   : > { %v8269_v11 = vrot.slane %v6258_v10, %v7715_v58  ;;  %v8272_v12 = vrot.slane %v6260_v7, %v7715_v58  ;;  %v8275_v19 = vrot.slane %v6262_v8, %v7715_v58  ;;  %v8278_v20 = vrot.slane %v6264_v50, %v7715_v58  ;;  %6641 = vmatpush3.bf16.xpose.msra.mxu1 %v4324_v0 }
 0x992   : > { %v4018_v21 = vrot.slane %v4010_v13, %v7715_v58  ;;  %v4025_v22 = vrot.slane %v4011_v15, %v7715_v58  ;;  %6642 = vmatprep.mubr.msk.bf16.mxu1 %vm7260_vm0, %v7259_v4  ;;  %6646 = vmatprep.subr.bf16.mxu1 %v7259_v4  ;;  %v3960_v24 = vcombine.low %v8263_v17, %v8266_v18 }
 0x993   : > { %v3606_v46 = vcombine.low %v8269_v11, %v8272_v12  ;;  %v3638_v26 = vcombine.low %v8275_v19, %v8278_v20  ;;  %v3966_v0 = vpack.c.bf16 %v8161_v63, %v8161_v63  ;;  %v3605_v37 = vrot.slane %v3591_v59, %v7718_v1 }
 0x994   : > { %v4058_v28 = vcombine.low %v4002_v45, %v4018_v21  ;;  %v4059_v16 = vcombine.high %v4002_v45, %v4018_v21  ;;  %v4074_v34 = vcombine.low %v4009_v47, %v4025_v22  ;;  %v4075_v35 = vcombine.high %v4009_v47, %v4025_v22 }
 0x995   : > { %v3968_v36 = vpack.c.bf16 %v3960_v24, %v3960_v24  ;;  %v3637_v38 = vrot.slane %v3623_v41, %v7718_v1  ;;  %v8299_v39 = vrot.slane %v3606_v46, %v7718_v1  ;;  %v4370_v45 = vsel %vm1832_vm1, %v3966_v0, 0 }
 0x996   : > { %v4066_v33 = vrot.slane %v4058_v28, %v7718_v1  ;;  %v4073_v9 = vrot.slane %v4059_v16, %v7718_v1  ;;  %v4082_v63 = vrot.slane %v4074_v34, %v7718_v1  ;;  %v4089_v40 = vrot.slane %v4075_v35, %v7718_v1 }
 0x997   : > { %v4462_v47 = vsel %vm1832_vm1, %v3968_v36, 0  ;;  %v8308_v42 = vrot.slane %v3638_v26, %v7718_v1  ;;  %v3909_v43 = vcombine.high %v8238_v60, %v8241_v61  ;;  %v3656_v62 = vcombine.low %v3605_v37, %v3637_v38 }
 0x998   : > { %v6273_v59 = vcombine.low %v4066_v33, %v4073_v9  ;;  %v6275_v41 = vcombine.high %v4066_v33, %v4073_v9  ;;  %v6277_v49 = vcombine.low %v4082_v63, %v4089_v40  ;;  %v6279_v52 = vcombine.high %v4082_v63, %v4089_v40  ;;  %6643 = vmatmul.mubr.msk.bf16.vlgmr.msra.gmra.mrb[52].mxu1 %vm1832_vm1, %v3663_v27 }
 0x999   : > { %6647 = vmatpush3.bf16.xpose.msra.mxu1 %v4370_v45  ;;  %6659 = vmatpush3.bf16.xpose.msra.mxu0 %v4462_v47  ;;  %v3658_v51 = vcombine.low %v8299_v39, %v8308_v42  ;;  %v3923_v61 = vrot.slane %v3909_v43, %v7718_v1  ;;  %v3941_v5 = vcombine.high %v8244_v29, %v8247_v32 }
 0x99a   : > { %v4138_v56 = vrot.slane %v6273_v59, %v7715_v58  ;;  %v4154_v54 = vrot.slane %v6275_v41, %v7715_v58  ;;  %v4170_v2 = vrot.slane %v6277_v49, %v7715_v58  ;;  %v4186_v60 = vrot.slane %v6279_v52, %v7715_v58  ;;  %6648 = vmatprep.mubr.msk.bf16.mxu1 %vm7260_vm0, %v7259_v4 }
 0x99b   : > { %6652 = vmatprep.subr.bf16.mxu1 %v7259_v4  ;;  %6670 = vmatprep.subr.bf16.mxu0 %v7259_v4  ;;  %v3607_v25 = vcombine.high %v8269_v11, %v8272_v12  ;;  %v3967_v44 = vpack.c.bf16 %v8165_v23, %v8165_v23  ;;  %v3666_v10 = vpack.c.bf16 %v3658_v51, %v3658_v51 }
 0x99c   : > { %v4194_v7 = vcombine.low %v4138_v56, %v4154_v54  ;;  %v3639_v8 = vcombine.high %v8275_v19, %v8278_v20  ;;  %v3955_v50 = vrot.slane %v3941_v5, %v7718_v1  ;;  %v4226_v13 = vcombine.low %v4170_v2, %v4186_v60 }
 0x99d   : > { %v3664_v15 = vpack.c.bf16 %v3656_v62, %v3656_v62  ;;  %v4416_v32 = vsel %vm1832_vm1, %v3967_v44, 0  ;;  %v3961_v23 = vcombine.high %v8263_v17, %v8266_v18  ;;  %v3621_v11 = vrot.slane %v3607_v25, %v7718_v1 }
 0x99e   : > { %v4202_v21 = vrot.slane %v4194_v7, %v7718_v1  ;;  %v3962_v22 = vcombine.low %v3923_v61, %v3955_v50  ;;  %v4234_v29 = vrot.slane %v4226_v13, %v7718_v1  ;;  %v4195_v12 = vcombine.high %v4138_v56, %v4154_v54 }
 0x99f   : > { %v3653_v20 = vrot.slane %v3639_v8, %v7718_v1  ;;  %v3657_v46 = vcombine.high %v3605_v37, %v3637_v38  ;;  %v4227_v17 = vcombine.high %v4170_v2, %v4186_v60  ;;  %v3969_v27 = vpack.c.bf16 %v3961_v23, %v3961_v23 }
 0x9a0   : > { %6649 = vmatmul.mubr.msk.bf16.vlgmr.msra.gmra.mrb[56].mxu1 %vm1832_vm1, %v3664_v15  ;;  %6661 = vmatmul.mubr.msk.bf16.vlgmr.msra.gmra.mrb[36].mxu0 %vm1832_vm1, %v3666_v10  ;;  %v3970_v19 = vpack.c.bf16 %v3962_v22, %v3962_v22  ;;  %v4258_v24 = vcombine.low %v4202_v21, %v4234_v29  ;;  %v4209_v26 = vrot.slane %v4195_v12, %v7718_v1 }
 0x9a1   : > { %6653 = vmatpush3.bf16.xpose.msra.mxu1 %v4416_v32  ;;  %6654 = vmatprep.mubr.msk.bf16.mxu1 %vm7260_vm0, %v7259_v4  ;;  %v4241_v0 = vrot.slane %v4227_v17, %v7718_v1  ;;  %v3660_v28 = vcombine.low %v3621_v11, %v3653_v20  ;;  %v3665_v34 = vpack.c.bf16 %v3657_v46, %v3657_v46  ;;  %v4508_v37 = vsel %vm1832_vm1, %v3969_v27, 0 }
 0x9a2   : > { %6664 = vmatprep.subr.bf16.mxu1 %v7259_v4  ;;  %6672 = vmatprep.mubr.msk.bf16.mxu0 %vm7260_vm0, %v7259_v4  ;;  %v4554_v18 = vsel %vm1832_vm1, %v3970_v19, 0  ;;  %v4266_v16 = vpack.c.bf16 %v4258_v24, %v4258_v24  ;;  %v3963_v38 = vcombine.high %v3923_v61, %v3955_v50  ;;  %v3659_v63 = vcombine.high %v8299_v39, %v8308_v42 }
 0x9a3   : > { %6671 = vmatpush3.bf16.xpose.msra.mxu0 %v4554_v18  ;;  %v8351_v35 = vcombine.low %v4209_v26, %v4241_v0  ;;  %v8353_v36 = vcombine.high %v4209_v26, %v4241_v0  ;;  %v3668_v33 = vpack.c.bf16 %v3660_v28, %v3660_v28  ;;  %v4259_v43 = vcombine.high %v4202_v21, %v4234_v29 }
 0x9a4   : > { %6682 = vmatprep.subr.bf16.mxu0 %v7259_v4  ;;  %v4742_v9 = vsel %vm2301_vm2, %v4266_v16, 0  ;;  %v3971_v40 = vpack.c.bf16 %v3963_v38, %v3963_v38  ;;  %v3667_v45 = vpack.c.bf16 %v3659_v63, %v3659_v63  ;;  %v3661_v39 = vcombine.high %v3621_v11, %v3653_v20 }
 0x9a5   : > { %v4267_v42 = vpack.c.bf16 %v4259_v43, %v4259_v43 }
 0x9a6   : > { %v4600_v47 = vsel %vm1832_vm1, %v3971_v40, 0  ;;  %v3669_v59 = vpack.c.bf16 %v3661_v39, %v3661_v39 }
 0x9a7   : > { %v4788_v41 = vsel %vm2301_vm2, %v4267_v42, 0 }
 0x9a8   : > { %6655 = vmatmul.mubr.msk.bf16.vlgmr.msra.gmra.mrb[60].mxu1 %vm1832_vm1, %v3665_v34 }
 0x9a9   : > { %6665 = vmatpush3.bf16.xpose.msra.mxu1 %v4508_v37  ;;  %6666 = vmatprep.mubr.msk.bf16.mxu1 %vm7260_vm0, %v7259_v4 }
 0x9aa   : > { %6676 = vmatprep.subr.bf16.mxu1 %v7259_v4  ;;  %6673 = vmatmul.mubr.msk.bf16.vlgmr.msra.gmra.mrb[40].mxu0 %vm1832_vm1, %v3668_v33 }
 0x9ab   : > { %6683 = vmatpush3.bf16.msra.mxu0 %v4742_v9  ;;  %6684 = vmatprep.mubr.msk.bf16.mxu0 %vm7260_vm0, %v7259_v4 }
 0x9ac   : > { %6694 = vmatprep.subr.bf16.mxu0 %v7259_v4 }
 0x9b0   : > { %6667 = vmatmul.mubr.msk.bf16.vlgmr.msra.gmra.mrb[64].mxu1 %vm1832_vm1, %v3667_v45 }
 0x9b1   : > { %6677 = vmatpush3.bf16.xpose.msra.mxu1 %v4600_v47  ;;  %6678 = vmatprep.mubr.msk.bf16.mxu1 %vm7260_vm0, %v7259_v4 }
 0x9b2   : > { %6688 = vmatprep.subr.bf16.mxu1 %v7259_v4 }
 0x9b8   : > { %6679 = vmatmul.mubr.msk.bf16.vlgmr.msra.gmra.mrb[68].mxu1 %vm1832_vm1, %v3669_v59 }
 0x9b9   : > { %6689 = vmatpush3.bf16.msra.mxu1 %v4788_v41  ;;  %6690 = vmatprep.mubr.msk.bf16.mxu1 %vm7260_vm0, %v7259_v4 }
 0x9ba   : > { %6700 = vmatprep.subr.bf16.mxu1 %v7259_v4 }
 0xa63   : > { %v4314_v49 = vpop.f32.mrb[48].mxu1 }
 0xa64   : > { %v6638_v52 = vpop.f32.mrb[49].mxu1  ;;  %v4642_v62 = vsel %vm2201_vm3, %v4314_v49, -inf }
 0xa65   : > { %4643 = vmax.xlane.f32.xlu0 %v4642_v62  ;;  %v4317_v51 = vpop.f32.mrb[50].mxu1 }
 0xa66   : > { %v6639_v56 = vpop.f32.mrb[51].mxu1 }
 0xa6b   : > { %v4360_v54 = vpop.f32.mrb[52].mxu1 }
 0xa6c   : > { %v6644_v2 = vpop.f32.mrb[53].mxu1  ;;  %v4645_v22 = vsel %vm2201_vm3, %v4360_v54, -inf }
 0xa6d   : > { %v4363_v60 = vpop.f32.mrb[54].mxu1 }
 0xa6e   : > { %v6645_v61 = vpop.f32.mrb[55].mxu1 }
 0xa73   : > { %v4406_v5 = vpop.f32.mrb[56].mxu1  ;;  %v4498_v25 = vpop.f32.mrb[36].mxu0 }
 0xa74   : > { %v6650_v44 = vpop.f32.mrb[57].mxu1  ;;  %v6662_v10 = vpop.f32.mrb[37].mxu0  ;;  %v4648_v7 = vsel %vm2201_vm3, %v4406_v5, -inf  ;;  %v4654_v8 = vsel %vm2201_vm3, %v4498_v25, -inf }
 0xa75   : > { %4649 = vmax.xlane.f32.xlu0 %v4648_v7  ;;  %v4409_v50 = vpop.f32.mrb[58].mxu1  ;;  %4655 = vmax.xlane.f32.xlu1 %v4654_v8  ;;  %v4501_v13 = vpop.f32.mrb[38].mxu0 }
 0xa76   : > { %v6651_v15 = vpop.f32.mrb[59].mxu1  ;;  %v6663_v21 = vpop.f32.mrb[39].mxu0 }
 0xa79   : > { %4646 = vmax.xlane.f32.xlu1 %v4645_v22 }
 0xa7b   : > { %v4452_v29 = vpop.f32.mrb[60].mxu1 }
 0xa7c   : > { %v6656_v32 = vpop.f32.mrb[61].mxu1  ;;  %v4651_v23 = vsel %vm2201_vm3, %v4452_v29, -inf }
 0xa7d   : > { %4652 = vmax.xlane.f32.xlu0 %v4651_v23  ;;  %v4455_v11 = vpop.f32.mrb[62].mxu1  ;;  %v8382_v12 = vpop.f32.mrb[40].mxu0 }
 0xa7e   : > { %v6657_v19 = vpop.f32.mrb[63].mxu1  ;;  %v6674_v20 = vpop.f32.mrb[41].mxu0  ;;  %v4660_v24 = vsel %vm2201_vm3, %v8382_v12, -inf }
 0xa7f   : > { %4661 = vmax.xlane.f32.xlu1 %v4660_v24  ;;  %v4593_v46 = vpop.f32.mrb[42].mxu0 }
 0xa80   : > { %v6675_v26 = vpop.f32.mrb[43].mxu0 }
 0xa83   : > { %v4544_v17 = vpop.f32.mrb[64].mxu1 }
 0xa84   : > { %v6668_v18 = vpop.f32.mrb[65].mxu1  ;;  %v4657_v27 = vsel %vm2201_vm3, %v4544_v17, -inf }
 0xa85   : > { %4658 = vmax.xlane.f32.xlu0 %v4657_v27  ;;  %v4547_v0 = vpop.f32.mrb[66].mxu1 }
 0xa86   : > { %v6669_v28 = vpop.f32.mrb[67].mxu1 }
 0xa87   : > { %v4268_v28 = vpack.c.bf16 %v8351_v35, %v8351_v35 }
 0xa8b   : > { %v4636_v16 = vpop.f32.mrb[68].mxu1 }
 0xa8c   : > { %v6680_v34 = vpop.f32.mrb[69].mxu1  ;;  %v4663_v37 = vsel %vm2201_vm3, %v4636_v16, -inf }
 0xa8d   : > { %4664 = vmax.xlane.f32.xlu0 %v4663_v37  ;;  %v4639_v38 = vpop.f32.mrb[70].mxu1  ;;  %v4834_v34 = vsel %vm2301_vm2, %v4268_v28, 0 }
 0xa8e   : > { %v6681_v33 = vpop.f32.mrb[71].mxu1 }
 0xa90   : > { %3985 = vrot.lane.b32.xlu1 %v8119_v53, %s7265_s17 }
 0xaa3   : > { %3982 = vrot.lane.b32.xlu0 %v8119_v53, %s7264_s26 }
 0xaf2   : > { %v4644_v9 = vpop.xlane.xlu0 %4643 }
 0xaf3   : > { %v4666_v63 = vsub.f32 %v4314_v49, %v4644_v9 }
 0xaf5   : > { %v4674_v40 = vmul.f32 1.442695, %v4666_v63 }
 0xaf7   : > { %7012 = vpow2.f32 %v4674_v40 }
 0xb01   : > { %v7013_v45 = vpop.eup %7012 }
 0xb02   : > { %v4656_v47 = vpop.xlane.xlu1 %4655  ;;  %v4650_v43 = vpop.xlane.xlu0 %4649  ;;  %v4690_v39 = vsel %vm2201_vm3, %v7013_v45, 0.0 }
 0xb03   : > { %v4670_v42 = vsub.f32 %v4498_v25, %v4656_v47  ;;  %v4668_v59 = vsub.f32 %v4406_v5, %v4650_v43  ;;  %4691 = vadd.xlane.f32.xlu1 %v4690_v39 }
 0xb05   : > { %v4682_v41 = vmul.f32 1.442695, %v4670_v42  ;;  %v4678_v52 = vmul.f32 1.442695, %v4668_v59  ;;  %v4269_v42 = vpack.c.bf16 %v8353_v36, %v8353_v36 }
 0xb06   : > { %v4647_v62 = vpop.xlane.xlu1 %4646 }
 0xb07   : > { %7014 = vpow2.f32 %v4682_v41  ;;  %v4667_v51 = vsub.f32 %v4360_v54, %v4647_v62 }
 0xb08   : > { %7016 = vpow2.f32 %v4678_v52 }
 0xb09   : > { %v4676_v56 = vmul.f32 1.442695, %v4667_v51 }
 0xb0a   : > { %v4653_v2 = vpop.xlane.xlu0 %4652 }
 0xb0b   : > { %7018 = vpow2.f32 %v4676_v56  ;;  %v4669_v49 = vsub.f32 %v4452_v29, %v4653_v2  ;;  %v4880_v56 = vsel %vm2301_vm2, %v4269_v42, 0 }
 0xb0c   : > { %v4662_v11 = vpop.xlane.xlu1 %4661 }
 0xb0d   : > { %v4680_v60 = vmul.f32 1.442695, %v4669_v49  ;;  %v4672_v19 = vsub.f32 %v8382_v12, %v4662_v11 }
 0xb0f   : > { %7020 = vpow2.f32 %v4680_v60  ;;  %v4686_v20 = vmul.f32 1.442695, %v4672_v19 }
 0xb11   : > { %v8393_v61 = vpop.eup %7014 }
 0xb12   : > { %v7017_v44 = vpop.eup %7016  ;;  %v4659_v10 = vpop.xlane.xlu0 %4658  ;;  %v4702_v5 = vsel %vm2201_vm3, %v8393_v61, 0.0 }
 0xb13   : > { %v4671_v25 = vsub.f32 %v4544_v17, %v4659_v10  ;;  %4703 = vadd.xlane.f32.xlu0 %v4702_v5  ;;  %v4696_v7 = vsel %vm2201_vm3, %v7017_v44, 0.0  ;;  %v3986_v17 = vpop.permute.xlu1 %3985 }
 0xb14   : > { %4697 = vadd.xlane.f32.xlu1 %v4696_v7 }
 0xb15   : > { %v7019_v54 = vpop.eup %7018  ;;  %v4684_v8 = vmul.f32 1.442695, %v4671_v25 }
 0xb16   : > { %v4693_v50 = vsel %vm2201_vm3, %v7019_v54, 0.0 }
 0xb17   : > { %7022 = vpow2.f32 %v4684_v8  ;;  %4694 = vadd.xlane.f32.xlu0 %v4693_v50 }
 0xb19   : > { %v8399_v13 = vpop.eup %7020 }
 0xb1a   : > { %v4699_v15 = vsel %vm2201_vm3, %v8399_v13, 0.0  ;;  %v4665_v29 = vpop.xlane.xlu0 %4664 }
 0xb1b   : > { %4700 = vadd.xlane.f32.xlu0 %v4699_v15  ;;  %v4673_v32 = vsub.f32 %v4636_v16, %v4665_v29 }
 0xb1d   : > { %v4688_v23 = vmul.f32 1.442695, %v4673_v32 }
 0xb1e   : > { %v3983_v12 = vpop.permute.xlu0 %3982 }
 0xb1f   : > { %7024 = vpow2.f32 %v4688_v23 }
 0xb20   : > { %7026 = vpow2.f32 %v4686_v20 }
 0xb21   : > { %v8403_v21 = vpop.eup %7022 }
 0xb22   : > { %v4705_v22 = vsel %vm2201_vm3, %v8403_v21, 0.0 }
 0xb23   : > { %4706 = vadd.xlane.f32.xlu1 %v4705_v22 }
 0xb29   : > { %v8412_v24 = vpop.eup %7024 }
 0xb2a   : > { %v4711_v46 = vsel %vm2201_vm3, %v8412_v24, 0.0  ;;  %v8416_v26 = vpop.eup %7026 }
 0xb31   : > { %3991 = vrot.lane.b32.xlu0 %v8119_v53, %s7267_s21 }
 0xb34   : > { %3988 = vrot.lane.b32.xlu1 %v8119_v53, %s7266_s5  ;;  %v4708_v53 = vsel %vm2201_vm3, %v8416_v26, 0.0 }
 0xb50   : > { %4712 = vadd.xlane.f32.xlu0 %v4711_v46 }
 0xb58   : > { %4709 = vadd.xlane.f32.xlu1 %v4708_v53 }
 0xb90   : > { %v4692_v18 = vpop.xlane.xlu1 %4691 }
 0xb91   : > { %7028 = vrcp.f32 %v4692_v18 }
 0xb9b   : > { %v7029_v27 = vpop.eup %7028 }
 0xb9c   : > { %v4722_v0 = vmul.f32 %v7029_v27, %v7013_v45 }
 0xb9e   : > { %v4730_v16 = vpack.c.bf16 %v4722_v0, %v4722_v0 }
 0xba0   : > { %6685 = vmatmul.mubr.msk.bf16.vlgmr.msra.gmra.mrb[44].mxu0 %vm2201_vm3, %v4730_v16  ;;  %v4704_v37 = vpop.xlane.xlu0 %4703 }
 0xba1   : > { %6695 = vmatpush3.bf16.msra.mxu0 %v4834_v34  ;;  %v4698_v38 = vpop.xlane.xlu1 %4697  ;;  %6696 = vmatprep.mubr.msk.bf16.mxu0 %vm7260_vm0, %v7259_v4 }
 0xba2   : > { %7030 = vrcp.f32 %v4698_v38  ;;  %6706 = vmatprep.subr.bf16.mxu0 %v7259_v4 }
 0xba4   : > { %v4695_v33 = vpop.xlane.xlu0 %4694 }
 0xba5   : > { %7032 = vrcp.f32 %v4695_v33 }
 0xba8   : > { %v4701_v9 = vpop.xlane.xlu0 %4700 }
 0xba9   : > { %7034 = vrcp.f32 %v4701_v9 }
 0xbaa   : > { %7036 = vrcp.f32 %v4704_v37 }
 0xbac   : > { %v7031_v63 = vpop.eup %7030  ;;  %v3992_v43 = vpop.permute.xlu0 %3991 }
 0xbad   : > { %v4724_v35 = vmul.f32 %v7031_v63, %v7017_v44  ;;  %v4042_v52 = vcombine.low %v3986_v17, %v3992_v43  ;;  %v4043_v62 = vcombine.high %v3986_v17, %v3992_v43 }
 0xbaf   : > { %v7033_v40 = vpop.eup %7032  ;;  %v4732_v45 = vpack.c.bf16 %v4724_v35, %v4724_v35  ;;  %v4050_v60 = vrot.slane %v4042_v52, %v7715_v58  ;;  %v4057_v44 = vrot.slane %v4043_v62, %v7715_v58 }
 0xbb0   : > { %v4723_v47 = vmul.f32 %v7033_v40, %v7019_v54  ;;  %v4707_v39 = vpop.xlane.xlu1 %4706 }
 0xbb1   : > { %6697 = vmatmul.mubr.msk.bf16.vlgmr.msra.gmra.mrb[48].mxu0 %vm2201_vm3, %v4732_v45  ;;  %7038 = vrcp.f32 %v4707_v39 }
 0xbb2   : > { %v4731_v59 = vpack.c.bf16 %v4723_v47, %v4723_v47  ;;  %6708 = vmatprep.mubr.msk.bf16.mxu0 %vm7260_vm0, %v7259_v4 }
 0xbb3   : > { %v7035_v41 = vpop.eup %7034 }
 0xbb4   : > { %v3989_v51 = vpop.permute.xlu1 %3988  ;;  %6691 = vmatmul.mubr.msk.bf16.vlgmr.msra.gmra.mrb[72].mxu1 %vm2201_vm3, %v4731_v59  ;;  %v4725_v36 = vmul.f32 %v7035_v41, %v8399_v13  ;;  %v7037_v28 = vpop.eup %7036 }
 0xbb5   : > { %v4026_v2 = vcombine.low %v3983_v12, %v3989_v51  ;;  %v4027_v49 = vcombine.high %v3983_v12, %v3989_v51  ;;  %6701 = vmatpush3.bf16.msra.mxu1 %v4880_v56  ;;  %6702 = vmatprep.mubr.msk.bf16.mxu1 %vm7260_vm0, %v7259_v4  ;;  %v4726_v45 = vmul.f32 %v7037_v28, %v8393_v61 }
 0xbb6   : > { %6712 = vmatprep.subr.bf16.mxu1 %v7259_v4  ;;  %v4733_v50 = vpack.c.bf16 %v4725_v36, %v4725_v36 }
 0xbb7   : > { %v4034_v10 = vrot.slane %v4026_v2, %v7715_v58  ;;  %v4041_v5 = vrot.slane %v4027_v49, %v7715_v58  ;;  %v4734_v62 = vpack.c.bf16 %v4726_v45, %v4726_v45 }
 0xbb9   : > { %v4090_v25 = vcombine.low %v4034_v10, %v4050_v60  ;;  %v4091_v7 = vcombine.high %v4034_v10, %v4050_v60  ;;  %v4106_v54 = vcombine.low %v4041_v5, %v4057_v44  ;;  %v4107_v8 = vcombine.high %v4041_v5, %v4057_v44 }
 0xbbb   : > { %v4098_v15 = vrot.slane %v4090_v25, %v7718_v1  ;;  %v4105_v13 = vrot.slane %v4091_v7, %v7718_v1  ;;  %v4114_v22 = vrot.slane %v4106_v54, %v7718_v1  ;;  %v4121_v29 = vrot.slane %v4107_v8, %v7718_v1  ;;  %v7039_v33 = vpop.eup %7038 }
 0xbbc   : > { %6703 = vmatmul.mubr.msk.bf16.vlgmr.msra.gmra.mrb[76].mxu1 %vm2201_vm3, %v4733_v50  ;;  %v4727_v47 = vmul.f32 %v7039_v33, %v8403_v21 }
 0xbbd   : > { %v6274_v32 = vcombine.low %v4098_v15, %v4105_v13  ;;  %v6276_v23 = vcombine.high %v4098_v15, %v4105_v13  ;;  %v6278_v11 = vcombine.low %v4114_v22, %v4121_v29  ;;  %v6280_v19 = vcombine.high %v4114_v22, %v4121_v29  ;;  %6714 = vmatprep.mubr.msk.bf16.mxu1 %vm7260_vm0, %v7259_v4 }
 0xbbe   : > { %v4735_v51 = vpack.c.bf16 %v4727_v47, %v4727_v47 }
 0xbbf   : > { %v4145_v20 = vrot.slane %v6274_v32, %v7715_v58  ;;  %v4161_v46 = vrot.slane %v6276_v23, %v7715_v58  ;;  %v4177_v53 = vrot.slane %v6278_v11, %v7715_v58  ;;  %v4193_v17 = vrot.slane %v6280_v19, %v7715_v58 }
 0xbc1   : > { %v4210_v18 = vcombine.low %v4145_v20, %v4161_v46  ;;  %v4242_v27 = vcombine.low %v4177_v53, %v4193_v17  ;;  %v4211_v12 = vcombine.high %v4145_v20, %v4161_v46  ;;  %v4243_v0 = vcombine.high %v4177_v53, %v4193_v17 }
 0xbc3   : > { %v4218_v16 = vrot.slane %v4210_v18, %v7718_v1  ;;  %v4250_v34 = vrot.slane %v4242_v27, %v7718_v1  ;;  %v4225_v37 = vrot.slane %v4211_v12, %v7718_v1  ;;  %v4257_v38 = vrot.slane %v4243_v0, %v7718_v1 }
 0xbc5   : > { %v4262_v9 = vcombine.low %v4218_v16, %v4250_v34  ;;  %v4263_v63 = vcombine.high %v4218_v16, %v4250_v34  ;;  %v4264_v35 = vcombine.low %v4225_v37, %v4257_v38  ;;  %v4265_v40 = vcombine.high %v4225_v37, %v4257_v38 }
 0xbc7   : > { %v4270_v43 = vpack.c.bf16 %v4262_v9, %v4262_v9  ;;  %v4271_v39 = vpack.c.bf16 %v4263_v63, %v4263_v63  ;;  %v4272_v41 = vpack.c.bf16 %v4264_v35, %v4264_v35  ;;  %v4273_v52 = vpack.c.bf16 %v4265_v40, %v4265_v40 }
 0xbc9   : > { %v4926_v42 = vsel %vm2301_vm2, %v4270_v43, 0  ;;  %v4972_v59 = vsel %vm2301_vm2, %v4271_v39, 0  ;;  %v5018_v61 = vsel %vm2301_vm2, %v4272_v41, 0  ;;  %v5064_v21 = vsel %vm2301_vm2, %v4273_v52, 0  ;;  %v6930_v43 = vld [vmem:[%s7571_s7] sm:$0xff]   ;;  %v6931_v52 = vld [vmem:[%s7571_s7 + $0x8] sm:$0xff]  }
 0xbca   : > { %6707 = vmatpush3.bf16.msra.mxu0 %v4926_v42  ;;  %6713 = vmatpush3.bf16.msra.mxu1 %v4972_v59 }
 0xbcb   : > { %6718 = vmatprep.subr.bf16.mxu0 %v7259_v4  ;;  %6724 = vmatprep.subr.bf16.mxu1 %v7259_v4 }
 0xbcd   : > { %6709 = vmatmul.mubr.msk.bf16.vlgmr.msra.gmra.mrb[52].mxu0 %vm2201_vm3, %v4734_v62  ;;  %6715 = vmatmul.mubr.msk.bf16.vlgmr.msra.gmra.mrb[80].mxu1 %vm2201_vm3, %v4735_v51 }
 0xbce   : > { %6719 = vmatpush3.bf16.msra.mxu0 %v5018_v61  ;;  %6725 = vmatpush3.bf16.msra.mxu1 %v5064_v21 }
 0xbcf   : > { %6726 = vmatprep.mubr.msk.bf16.mxu1 %vm7260_vm0, %v7259_v4  ;;  %6720 = vmatprep.mubr.msk.bf16.mxu0 %vm7260_vm0, %v7259_v4 }
 0xbd0   : > { %6730 = vmatprep.subr.bf16.mxu0 %v7259_v4 }
 0xbdd   : > { %v4713_v56 = vpop.xlane.xlu0 %4712 }
 0xbde   : > { %7040 = vrcp.f32 %v4713_v56 }
 0xbe5   : > { %v4710_v2 = vpop.xlane.xlu1 %4709 }
 0xbe6   : > { %7042 = vrcp.f32 %v4710_v2 }
 0xbe8   : > { %v7041_v49 = vpop.eup %7040 }
 0xbe9   : > { %v4729_v36 = vmul.f32 %v7041_v49, %v8412_v24 }
 0xbeb   : > { %v4737_v60 = vpack.c.bf16 %v4729_v36, %v4729_v36 }
 0xbed   : > { %6727 = vmatmul.mubr.msk.bf16.vlgmr.msra.gmra.mrb[84].mxu1 %vm2201_vm3, %v4737_v60  ;;  %v6932_v60 = vld [vmem:[%s7571_s7 + $0x10] sm:$0xff]  }
 0xbee   : > { %5665 = vmatprep.mubr.bf16.mxu1 %v7258_v3 }
 0xbf0   : > { %v7043_v44 = vpop.eup %7042 }
 0xbf1   : > { %v4728_v10 = vmul.f32 %v7043_v44, %v8416_v26 }
 0xbf3   : > { %v4736_v5 = vpack.c.bf16 %v4728_v10, %v4728_v10 }
 0xbf5   : > { %6721 = vmatmul.mubr.msk.bf16.vlgmr.msra.gmra.mrb[56].mxu0 %vm2201_vm3, %v4736_v5 }
 0xbf6   : > { %6746 = vmatprep.mubr.msk.bf16.mxu0 %vm7260_vm0, %v7259_v4  ;;  %6731 = vmatpush3.bf16.msra.mxu0 %v6930_v43 }
 0xbf7   : > { %6732 = vmatprep.subr.bf16.mxu0 %v7259_v4 }
 0xbfa   : > { %6733 = vmatpush3.bf16.msra.mxu0 %v6931_v52 }
 0xbfb   : > { %6734 = vmatprep.subr.bf16.mxu0 %v7259_v4 }
 0xbfe   : > { %6735 = vmatpush3.bf16.msra.mxu0 %v6932_v60 }
 0xbff   : > { %6736 = vmatprep.subr.bf16.mxu0 %v7259_v4 }
 0xc73   : > { %v4778_v25 = vpop.f32.mrb[44].mxu0 }
 0xc74   : > { %v6686_v7 = vpop.f32.mrb[45].mxu0 }
 0xc75   : > { %v4781_v54 = vpop.f32.mrb[46].mxu0 }
 0xc76   : > { %v6687_v8 = vpop.f32.mrb[47].mxu0 }
 0xc84   : > { %v4870_v50 = vpop.f32.mrb[48].mxu0 }
 0xc85   : > { %v5106_v24 = vcombine.low %v4778_v25, %v4870_v50  ;;  %v5107_v15 = vcombine.high %v4778_v25, %v4870_v50  ;;  %v6698_v13 = vpop.f32.mrb[49].mxu0 }
 0xc86   : > { %v4873_v22 = vpop.f32.mrb[50].mxu0 }
 0xc87   : > { %v6699_v29 = vpop.f32.mrb[51].mxu0  ;;  %v4824_v3 = vpop.f32.mrb[72].mxu1  ;;  %v5114_v17 = vrot.slane %v5106_v24, %v7715_v58  ;;  %v5121_v18 = vrot.slane %v5107_v15, %v7715_v58 }
 0xc88   : > { %v6692_v32 = vpop.f32.mrb[73].mxu1  ;;  %v6933_v29 = vld [vmem:[%s7571_s7 + $0x18] sm:$0xff]  }
 0xc89   : > { %v4827_v23 = vpop.f32.mrb[74].mxu1  ;;  %6737 = vmatpush3.bf16.msra.mxu0 %v6933_v29  ;;  %v6935_v32 = vld [vmem:[%s7571_s7 + $0x28] sm:$0xff]  }
 0xc8a   : > { %v6693_v26 = vpop.f32.mrb[75].mxu1  ;;  %6738 = vmatprep.subr.bf16.mxu0 %v7259_v4 }
 0xc8f   : > { %v4916_v11 = vpop.f32.mrb[76].mxu1 }
 0xc90   : > { %v5122_v19 = vcombine.low %v4824_v3, %v4916_v11  ;;  %v5123_v20 = vcombine.high %v4824_v3, %v4916_v11  ;;  %v6704_v46 = vpop.f32.mrb[77].mxu1  ;;  %v6934_v3 = vld [vmem:[%s7571_s7 + $0x20] sm:$0xff]  }
 0xc91   : > { %v4919_v53 = vpop.f32.mrb[78].mxu1  ;;  %6739 = vmatpush3.bf16.msra.mxu0 %v6934_v3 }
 0xc92   : > { %v5130_v27 = vrot.slane %v5122_v19, %v7715_v58  ;;  %v5137_v12 = vrot.slane %v5123_v20, %v7715_v58  ;;  %v6705_v0 = vpop.f32.mrb[79].mxu1  ;;  %6740 = vmatprep.subr.bf16.mxu0 %v7259_v4 }
 0xc94   : > { %v5170_v28 = vcombine.low %v5114_v17, %v5130_v27  ;;  %v5171_v16 = vcombine.high %v5114_v17, %v5130_v27  ;;  %v5186_v34 = vcombine.low %v5121_v18, %v5137_v12  ;;  %v5187_v37 = vcombine.high %v5121_v18, %v5137_v12 }
 0xc95   : > { %6741 = vmatpush3.bf16.msra.mxu0 %v6935_v32 }
 0xc96   : > { %v5178_v38 = vrot.slane %v5170_v28, %v7718_v1  ;;  %v5185_v33 = vrot.slane %v5171_v16, %v7718_v1  ;;  %v5194_v9 = vrot.slane %v5186_v34, %v7718_v1  ;;  %v5201_v63 = vrot.slane %v5187_v37, %v7718_v1  ;;  %6742 = vmatprep.subr.bf16.mxu0 %v7259_v4 }
 0xc98   : > { %v6297_v35 = vcombine.low %v5178_v38, %v5185_v33  ;;  %v6299_v40 = vcombine.high %v5178_v38, %v5185_v33  ;;  %v6301_v45 = vcombine.low %v5194_v9, %v5201_v63  ;;  %v6303_v47 = vcombine.high %v5194_v9, %v5201_v63 }
 0xc9a   : > { %v5250_v39 = vrot.slane %v6297_v35, %v7715_v58  ;;  %v5266_v42 = vrot.slane %v6299_v40, %v7715_v58  ;;  %v5282_v59 = vrot.slane %v6301_v45, %v7715_v58  ;;  %v5298_v41 = vrot.slane %v6303_v47, %v7715_v58  ;;  %v6936_v35 = vld [vmem:[%s7571_s7 + $0x30] sm:$0xff]  }
 0xc9b   : > { %6743 = vmatpush3.bf16.msra.mxu0 %v6936_v35 }
 0xc9c   : > { %v5307_v62 = vcombine.high %v5250_v39, %v5266_v42  ;;  %v5339_v51 = vcombine.high %v5282_v59, %v5298_v41  ;;  %v5306_v61 = vcombine.low %v5250_v39, %v5266_v42  ;;  %v5338_v21 = vcombine.low %v5282_v59, %v5298_v41  ;;  %6744 = vmatprep.subr.bf16.mxu0 %v7259_v4 }
 0xc9e   : > { %v5321_v56 = vrot.slane %v5307_v62, %v7718_v1  ;;  %v5353_v2 = vrot.slane %v5339_v51, %v7718_v1  ;;  %v8497_v49 = vrot.slane %v5306_v61, %v7718_v1  ;;  %v8500_v36 = vrot.slane %v5338_v21, %v7718_v1  ;;  %v6937_v21 = vld [vmem:[%s7571_s7 + $0x38] sm:$0xff]  }
 0xc9f   : > { %6745 = vmatpush3.bf16.msra.mxu0 %v6937_v21  ;;  %v6965_v21 = vld [vmem:[%s7577_s9 + $0x8] sm:$0xff]  }
 0xca0   : > { %v4962_v44 = vpop.f32.mrb[52].mxu0  ;;  %v5008_v10 = vpop.f32.mrb[80].mxu1  ;;  %v5372_v5 = vcombine.low %v5321_v56, %v5353_v2  ;;  %v5371_v25 = vcombine.high %v8497_v49, %v8500_v36  ;;  %v5373_v7 = vcombine.high %v5321_v56, %v5353_v2  ;;  %v5370_v54 = vcombine.low %v8497_v49, %v8500_v36 }
 0xca1   : > { %v6710_v8 = vpop.f32.mrb[53].mxu0  ;;  %v6716_v50 = vpop.f32.mrb[81].mxu1 }
 0xca2   : > { %5383 = vrot.lane.b32.xlu1 %v5372_v5, %s7266_s5  ;;  %5379 = vrot.lane.b32.xlu0 %v5371_v25, %s7267_s21  ;;  %v4965_v24 = vpop.f32.mrb[54].mxu0  ;;  %v5011_v15 = vpop.f32.mrb[82].mxu1 }
 0xca3   : > { %v6711_v13 = vpop.f32.mrb[55].mxu0  ;;  %v6717_v22 = vpop.f32.mrb[83].mxu1 }
 0xca6   : > { %5387 = vrot.lane.b32.xlu1 %v5373_v7, %s7265_s17 }
 0xcc0   : > { %v5100_v23 = vpop.f32.mrb[84].mxu1 }
 0xcc1   : > { %v5154_v26 = vcombine.low %v5008_v10, %v5100_v23  ;;  %v5155_v11 = vcombine.high %v5008_v10, %v5100_v23  ;;  %v6728_v19 = vpop.f32.mrb[85].mxu1 }
 0xcc2   : > { %v5103_v20 = vpop.f32.mrb[86].mxu1 }
 0xcc3   : > { %v6729_v46 = vpop.f32.mrb[87].mxu1  ;;  %v5162_v0 = vrot.slane %v5154_v26, %v7715_v58  ;;  %v5169_v28 = vrot.slane %v5155_v11, %v7715_v58  ;;  %v5416_v20 = vsub.s32 6, %v7672_v30 }
 0xcc4   : > { %v7055_v46 = vld [vmem:[%s7626_s30] sm:$0xff] }
 0xcc8   : > { %v5054_v53 = vpop.f32.mrb[56].mxu0 }
 0xcc9   : > { %v5138_v17 = vcombine.low %v4962_v44, %v5054_v53  ;;  %v5139_v18 = vcombine.high %v4962_v44, %v5054_v53  ;;  %v6722_v27 = vpop.f32.mrb[57].mxu0  ;;  %v5417_v53 = vrot.slane %v7055_v46, %v5416_v20 }
 0xcca   : > { %v5057_v12 = vpop.f32.mrb[58].mxu0 }
 0xccb   : > { %v5146_v16 = vrot.slane %v5138_v17, %v7715_v58  ;;  %v5153_v34 = vrot.slane %v5139_v18, %v7715_v58  ;;  %v6723_v37 = vpop.f32.mrb[59].mxu0 }
 0xccc   : > { %v6943_v37 = vld [vmem:[%s7615_s8 + $0x14] ss:$8 sps:$4 sm:$0xff]  }
 0xccd   : > { %v5202_v38 = vcombine.low %v5146_v16, %v5162_v0  ;;  %v5203_v33 = vcombine.high %v5146_v16, %v5162_v0  ;;  %v5218_v9 = vcombine.low %v5153_v34, %v5169_v28  ;;  %v5219_v63 = vcombine.high %v5153_v34, %v5169_v28  ;;  %v6938_v16 = vld [vmem:[%s7615_s8] ss:$8 sps:$4 sm:$0xff]   ;;  %v6940_v34 = vld [vmem:[%s7615_s8 + $0x4] ss:$8 sps:$4 sm:$0xff]  }
 0xcce   : > { %5633 = vmatprep.subr.bf16.mxu1 %v6940_v34 }
 0xccf   : > { %v5210_v40 = vrot.slane %v5202_v38, %v7718_v1  ;;  %v5217_v45 = vrot.slane %v5203_v33, %v7718_v1  ;;  %v5226_v47 = vrot.slane %v5218_v9, %v7718_v1  ;;  %v5233_v43 = vrot.slane %v5219_v63, %v7718_v1  ;;  %5634 = vmatpush1.bf16.msra.mxu1 %v6938_v16  ;;  %v6941_v38 = vld [vmem:[%s7615_s8 + $0x10] ss:$8 sps:$4 sm:$0xff]   ;;  %v6946_v33 = vld [vmem:[%s7615_s8 + $0x24] ss:$8 sps:$4 sm:$0xff]   ;;  %v6944_v9 = vld [vmem:[%s7615_s8 + $0x20] ss:$8 sps:$4 sm:$0xff]  }
 0xcd0   : > { %5635 = vmatprep.subr.bf16.mxu1 %v6943_v37 }
 0xcd1   : > { %v6298_v39 = vcombine.low %v5210_v40, %v5217_v45  ;;  %v6300_v42 = vcombine.high %v5210_v40, %v5217_v45  ;;  %v6302_v59 = vcombine.low %v5226_v47, %v5233_v43  ;;  %v6304_v41 = vcombine.high %v5226_v47, %v5233_v43  ;;  %v6947_v45 = vld [vmem:[%s7615_s8 + $0x30] ss:$8 sps:$4 sm:$0xff]   ;;  %v6949_v47 = vld [vmem:[%s7615_s8 + $0x34] ss:$8 sps:$4 sm:$0xff]   ;;  %v6952_v43 = vld [vmem:[%s7615_s8 + $0x44] ss:$8 sps:$4 sm:$0xff]  }
 0xcd3   : > { %v5257_v52 = vrot.slane %v6298_v39, %v7715_v58  ;;  %v5273_v62 = vrot.slane %v6300_v42, %v7715_v58  ;;  %v5289_v51 = vrot.slane %v6302_v59, %v7715_v58  ;;  %v5305_v61 = vrot.slane %v6304_v41, %v7715_v58  ;;  %5636 = vmatpush1.bf16.msra.mxu1 %v6941_v38  ;;  %v6950_v39 = vld [vmem:[%s7615_s8 + $0x40] ss:$8 sps:$4 sm:$0xff]   ;;  %v6955_v42 = vld [vmem:[%s7615_s8 + $0x54] ss:$8 sps:$4 sm:$0xff]   ;;  %v6953_v59 = vld [vmem:[%s7615_s8 + $0x50] ss:$8 sps:$4 sm:$0xff]  }
 0xcd4   : > { %5637 = vmatprep.subr.bf16.mxu1 %v6946_v33  ;;  %v6958_v41 = vld [vmem:[%s7615_s8 + $0x64] ss:$8 sps:$4 sm:$0xff]  }
 0xcd5   : > { %v5322_v56 = vcombine.low %v5257_v52, %v5273_v62  ;;  %v5354_v2 = vcombine.low %v5289_v51, %v5305_v61  ;;  %v5323_v60 = vcombine.high %v5257_v52, %v5273_v62  ;;  %v5355_v44 = vcombine.high %v5289_v51, %v5305_v61  ;;  %v6962_v52 = vld [vmem:[%s7577_s9 + $0x40] sm:$0xff]   ;;  %v6964_v51 = vld [vmem:[%s7577_s9 + $0x48] sm:$0xff]  }
 0xcd6   : > { %v6963_v62 = vld [vmem:[%s7577_s9] sm:$0xff]   ;;  %6456 = vmatprep.subr.bf16.mxu0 %v6962_v52 }
 0xcd7   : > { %v5330_v10 = vrot.slane %v5322_v56, %v7718_v1  ;;  %v5362_v5 = vrot.slane %v5354_v2, %v7718_v1  ;;  %v5337_v4 = vrot.slane %v5323_v60, %v7718_v1  ;;  %v5369_v25 = vrot.slane %v5355_v44, %v7718_v1  ;;  %5638 = vmatpush1.bf16.msra.mxu1 %v6944_v9  ;;  %v6956_v61 = vld [vmem:[%s7615_s8 + $0x60] ss:$8 sps:$4 sm:$0xff]   ;;  %v6961_v56 = vld [vmem:[%s7615_s8 + $0x74] ss:$8 sps:$4 sm:$0xff]   ;;  %v6959_v2 = vld [vmem:[%s7615_s8 + $0x70] ss:$8 sps:$4 sm:$0xff]  }
 0xcd8   : > { %5639 = vmatprep.subr.bf16.mxu1 %v6949_v47 }
 0xcd9   : > { %v5375_v7 = vcombine.high %v5330_v10, %v5362_v5  ;;  %v5374_v8 = vcombine.low %v5330_v10, %v5362_v5  ;;  %v5377_v50 = vcombine.high %v5337_v4, %v5369_v25  ;;  %v5376_v24 = vcombine.low %v5337_v4, %v5369_v25  ;;  %v8576_v4 = vld [vmem:[%s7626_s30 + $0x18] sm:$0xff] }
 0xcda   : > { %v5520_v5 = vsub.s32 7, %v7672_v30 }
 0xcdb   : > { %5395 = vrot.lane.b32.xlu1 %v5375_v7, %s7261_s0  ;;  %5391 = vrot.lane.b32.xlu0 %v5374_v8, %s7264_s26 }
 0xcdc   : > { %5640 = vmatpush1.bf16.msra.mxu1 %v6947_v45  ;;  %v5521_v25 = vrot.slane %v7055_v46, %v5520_v5  ;;  %v5721_v45 = vrot.slane %v8576_v4, %v3088_v14  ;;  %v5873_v14 = vrot.slane %v8576_v4, %v3093_v48 }
 0xcdd   : > { %5641 = vmatprep.subr.bf16.mxu1 %v6952_v43 }
 0xcdf   : > { %5403 = vrot.lane.b32.xlu1 %v5377_v50, %s7262_s10  ;;  %5399 = vrot.lane.b32.xlu0 %v5376_v24, %s7263_s22  ;;  %v5526_v50 = vrot.slane %v8576_v4, %v7675_v31  ;;  %v6971_v31 = vld [vmem:[%s7577_s9 + $0x20] sm:$0xff]  }
 0xce0   : > { %5642 = vmatpush1.bf16.msra.mxu1 %v6950_v39 }
 0xce1   : > { %5643 = vmatprep.subr.bf16.mxu1 %v6955_v42 }
 0xce4   : > { %5644 = vmatpush1.bf16.msra.mxu1 %v6953_v59 }
 0xce5   : > { %5645 = vmatprep.subr.bf16.mxu1 %v6958_v41 }
 0xce8   : > { %5646 = vmatpush1.bf16.msra.mxu1 %v6956_v61 }
 0xce9   : > { %5647 = vmatprep.subr.bf16.mxu1 %v6961_v56 }
 0xcec   : > { %5648 = vmatpush1.bf16.msra.mxu1 %v6959_v2 }
 0xd14   : > { %v5384_v58 = vpop.permute.xlu1 %5383  ;;  %v5380_v15 = vpop.permute.xlu0 %5379 }
 0xd15   : > { %v5406_v1 = vsel %vm1832_vm1, %v5370_v54, %v5380_v15 }
 0xd16   : > { %v5407_v22 = vsel %vm2968_vm4, %v5406_v1, %v5384_v58  ;;  %v6966_v1 = vld [vmem:[%s7577_s9 + $0x50] sm:$0xff]  }
 0xd18   : > { %v5388_v13 = vpop.permute.xlu1 %5387 }
 0xd19   : > { %v5408_v29 = vsel %vm2970_vm5, %v5407_v22, %v5388_v13  ;;  %v6967_v13 = vld [vmem:[%s7577_s9 + $0x10] sm:$0xff]   ;;  %v6968_v22 = vld [vmem:[%s7577_s9 + $0x58] sm:$0xff]  }
 0xd4d   : > { %v5396_v3 = vpop.permute.xlu1 %5395  ;;  %v5392_v32 = vpop.permute.xlu0 %5391 }
 0xd4e   : > { %v5409_v23 = vsel %vm2972_vm6, %v5408_v29, %v5392_v32  ;;  %v6969_v29 = vld [vmem:[%s7577_s9 + $0x18] sm:$0xff]   ;;  %v6972_v32 = vld [vmem:[%s7577_s9 + $0x68] sm:$0xff]  }
 0xd4f   : > { %v5410_v11 = vsel %vm2974_vm7, %v5409_v23, %v5396_v3  ;;  %v6970_v3 = vld [vmem:[%s7577_s9 + $0x60] sm:$0xff]   ;;  %v6973_v23 = vld [vmem:[%s7577_s9 + $0x28] sm:$0xff]  }
 0xd51   : > { %v5404_v26 = vpop.permute.xlu1 %5403  ;;  %v5400_v19 = vpop.permute.xlu0 %5399 }
 0xd52   : > { %v5411_v49 = vsel %vm2976_vm8, %v5410_v11, %v5400_v19  ;;  %v6975_v11 = vld [vmem:[%s7577_s9 + $0x30] sm:$0xff]   ;;  %v6976_v19 = vld [vmem:[%s7577_s9 + $0x78] sm:$0xff]  }
 0xd53   : > { %v5412_v36 = vsel %vm2978_vm9, %v5411_v49, %v5404_v26  ;;  %v6974_v26 = vld [vmem:[%s7577_s9 + $0x70] sm:$0xff]   ;;  %v6977_v49 = vld [vmem:[%s7577_s9 + $0x38] sm:$0xff]  }
 0xd54   : > { %v5413_v54 = vpack.c.bf16 %v5412_v36, %v5412_v36  ;;  %v654_v36 = vld [vmem:[%s7626_s30 + $0x20] sm:$0xff] }
 0xd55   : > { %v5552_v20 = vrot.slane %v654_v36, %v8066_v6 }
 0xd56   : > { %6747 = vmatmul.mubr.bf16.vlgmr.msra.gmra.mrb[60].mxu0 %v5413_v54  ;;  %v5548_v54 = vrot.slane %v8576_v4, %v8066_v6 }
 0xd57   : > { %6457 = vmatpush3.bf16.msra.mxu0 %v6963_v62 }
 0xd58   : > { %6458 = vmatprep.subr.bf16.mxu0 %v6964_v51 }
 0xd5b   : > { %6459 = vmatpush3.bf16.msra.mxu0 %v6965_v21 }
 0xd5c   : > { %6460 = vmatprep.subr.bf16.mxu0 %v6966_v1  ;;  %v6347_v1 = vld [vmem:[#allocation7 + $0x1] ss:$0 sm:$0xff] (!%p6345_p5) }
 0xd5f   : > { %6461 = vmatpush3.bf16.msra.mxu0 %v6967_v13 }
 0xd60   : > { %6462 = vmatprep.subr.bf16.mxu0 %v6968_v22 }
 0xd63   : > { %6463 = vmatpush3.bf16.msra.mxu0 %v6969_v29 }
 0xd64   : > { %6464 = vmatprep.subr.bf16.mxu0 %v6970_v3 }
 0xd67   : > { %6465 = vmatpush3.bf16.msra.mxu0 %v6971_v31 }
 0xd68   : > { %6466 = vmatprep.subr.bf16.mxu0 %v6972_v32 }
 0xd6b   : > { %6467 = vmatpush3.bf16.msra.mxu0 %v6973_v23 }
 0xd6c   : > { %6468 = vmatprep.subr.bf16.mxu0 %v6974_v26 }
 0xd6f   : > { %6469 = vmatpush3.bf16.msra.mxu0 %v6975_v11 }
 0xd70   : > { %6470 = vmatprep.subr.bf16.mxu0 %v6976_v19 }
 0xd73   : > { %6471 = vmatpush3.bf16.msra.mxu0 %v6977_v49 }
 0xe29   : > { %v5500_v17 = vpop.f32.mrb[60].mxu0 }
 0xe2a   : > { %v5501_v18 = vadd.f32 %v5500_v17, %v5417_v53  ;;  %v6748_v27 = vpop.f32.mrb[61].mxu0 }
 0xe2b   : > { %v5503_v12 = vpop.f32.mrb[62].mxu0 }
 0xe2c   : > { %v6749_v0 = vpop.f32.mrb[63].mxu0  ;;  %v5506_v28 = vadd.f32 %v5501_v18, %v8135_v57 }
 0xe2e   : > { %5507 = vadd.xlane.f32.xlu0 %v5506_v28 }
 0xebb   : > { %v5508_v57 = vpop.xlane.xlu0 %5507 }
 0xebc   : > { %v5509_v63 = vmul.f32 0.0078125, %v5508_v57 }
 0xebe   : > { %v5510_v35 = vsub.f32 %v5506_v28, %v5509_v63 }
 0xec0   : > { %v5511_v40 = vmul.f32 %v5510_v35, %v5510_v35 }
 0xec2   : > { %5512 = vadd.xlane.f32.xlu1 %v5511_v40 }
 0xf4f   : > { %v5513_v60 = vpop.xlane.xlu1 %5512 }
 0xf50   : > { %v5514_v44 = vmul.f32 0.0078125, %v5513_v60 }
 0xf52   : > { %v5515_v10 = vadd.f32 1e-05, %v5514_v44  ;;  %v5878_v44 = vrot.slane %v8576_v4, %v3147_v55  ;;  %v6346_v55 = vld [vmem:[#allocation7] ss:$0 sm:$0xff] (!%p6345_p5) }
 0xf54   : > { %7044 = vrsqrt.f32 %v5515_v10 }
 0xf5e   : > { %v7045_v7 = vpop.eup %7044 }
 0xf5f   : > { %v5517_v8 = vmul.f32 %v7045_v7, %v5510_v35 }
 0xf61   : > { %v5522_v24 = vmul.f32 %v5521_v25, %v5517_v8 }
 0xf63   : > { %v5527_v58 = vadd.f32 %v5526_v50, %v5522_v24 }
 0xf65   : > { %v5544_v15 = vpack.c.bf16 %v5527_v58, %v5527_v58 }
 0xf67   : > { %5666 = vmatmul.mubr.bf16.vlgmr.msra.gmra.mrb[88].mxu1 %v5544_v15 }
0x103a   : > { %v5667_v46 = vpop.f32.mrb[88].mxu1 }
0x103b   : > { %v5668_v53 = vadd.f32 %v5667_v46, %v5548_v54  ;;  %v5669_v17 = vpop.f32.mrb[89].mxu1 }
0x103c   : > { %v5670_v18 = vadd.f32 %v5669_v17, %v5552_v20  ;;  %v5671_v27 = vpop.f32.mrb[90].mxu1 }
0x103d   : > { %v5676_v12 = vmul.f32 0.70710677, %v5668_v53  ;;  %v5672_v0 = vpop.f32.mrb[91].mxu1  ;;  %v5674_v37 = vmul.f32 0.5, %v5668_v53 }
0x103e   : > { %v5677_v28 = vmul.f32 0.70710677, %v5670_v18  ;;  %v5675_v33 = vmul.f32 0.5, %v5670_v18 }
0x103f   : > { %7046 = verf.f32 %v5676_v12 }
0x1040   : > { %7048 = verf.f32 %v5677_v28 }
0x1049   : > { %v7047_v16 = vpop.eup %7046 }
0x104a   : > { %v7049_v34 = vpop.eup %7048  ;;  %v5680_v38 = vadd.f32 1.0, %v7047_v16 }
0x104b   : > { %v5681_v9 = vadd.f32 1.0, %v7049_v34 }
0x104c   : > { %v5682_v57 = vmul.f32 %v5680_v38, %v5674_v37 }
0x104d   : > { %v5683_v63 = vmul.f32 %v5681_v9, %v5675_v33 }
0x104e   : > { %v5716_v6 = vpack.c.bf16 %v5682_v57, %v5682_v57 }
0x104f   : > { %v5717_v35 = vpack.c.bf16 %v5683_v63, %v5683_v63 }
0x1051   : > { %5850 = vmatprep.mubr.bf16.mxu0 %v5717_v35 }
0x1052   : > { %5851 = vmatmul.mubr.bf16.vlgmr.msra.gmra.mrb[64].mxu0 %v5716_v6 }
0x1125   : > { %v6472_v40 = vpop.f32.mrb[64].mxu0 }
0x1126   : > { %v6473_v47 = vpop.f32.mrb[65].mxu0 }
0x1127   : > { %v6474_v43 = vadd.f32 %v6473_v47, %v6472_v40  ;;  %v6475_v39 = vpop.f32.mrb[66].mxu0 }
0x1128   : > { %v6476_v42 = vpop.f32.mrb[67].mxu0 }
0x1129   : > { %v5853_v59 = vadd.f32 %v6474_v43, %v5721_v45 }
0x112b   : > { %v5858_v41 = vadd.f32 %v5853_v59, %v5527_v58 }
0x112d   : > { %5859 = vadd.xlane.f32.xlu0 %v5858_v41 }
0x11ba   : > { %v5860_v52 = vpop.xlane.xlu0 %5859 }
0x11bb   : > { %v5861_v62 = vmul.f32 0.0078125, %v5860_v52 }
0x11bd   : > { %v5862_v51 = vsub.f32 %v5858_v41, %v5861_v62 }
0x11bf   : > { %v5863_v61 = vmul.f32 %v5862_v51, %v5862_v51 }
0x11c1   : > { %5864 = vadd.xlane.f32.xlu0 %v5863_v61 }
0x124e   : > { %v5865_v21 = vpop.xlane.xlu0 %5864 }
0x124f   : > { %v5866_v56 = vmul.f32 0.0078125, %v5865_v21 }
0x1251   : > { %v5867_v2 = vadd.f32 1e-05, %v5866_v56 }
0x1253   : > { %7050 = vrsqrt.f32 %v5867_v2 }
0x125d   : > { %v7051_v60 = vpop.eup %7050 }
0x125e   : > { %v5869_v10 = vmul.f32 %v7051_v60, %v5862_v51  ;;  %5884 = sbr.rel (%p6345_p5) target bundleno = 5020 (0x139c), region = 88 }
0x1260   : > { %v5874_v5 = vmul.f32 %v5873_v14, %v5869_v10 }
0x1262   : > { %v5879_v25 = vadd.f32 %v5878_v44, %v5874_v5 }
0x1264   : > { %5880 = vst [vmem:[%s7621_s25] sm:$0xff] %v5879_v25  ;;  %5887 = vadd.xlane.f32.xlu0 (!%p6345_p5), %v5879_v25 }
0x12f1   : > { %v5888_v7 = vpop.xlane.xlu0 %5887 }
0x12f2   : > { %v5889_v8 = vmul.f32 0.0078125, %v5888_v7 }
0x12f4   : > { %v5890_v50 = vsub.f32 %v5879_v25, %v5889_v8 }
0x12f6   : > { %v5891_v24 = vmul.f32 %v5890_v50, %v5890_v50 }
0x12f8   : > { %5892 = vadd.xlane.f32.xlu0 %v5891_v24 }
0x1385   : > { %v5893_v48 = vpop.xlane.xlu0 %5892 }
0x1386   : > { %v5894_v58 = vmul.f32 0.0078125, %v5893_v48 }
0x1388   : > { %v5895_v15 = vadd.f32 1e-05, %v5894_v58 }
0x138a   : > { %7056 = vrsqrt.f32 %v5895_v15 }
0x1394   : > { %v7057_v30 = vpop.eup %7056 }
0x1395   : > { %v5897_v4 = vmul.f32 %v7057_v30, %v5890_v50 }
0x1397   : > { %v5902_v13 = vmul.f32 %v6346_v55, %v5897_v4 }
0x1399   : > { %v5907_v22 = vadd.f32 %v6347_v1, %v5902_v13 }
0x139b   : > { %5908 = vst [vmem:[%s7621_s25] sm:$0xff] %v5907_v22 }
0x139c PF: > { %s28_s24 = sadd.s32 1, %s7250_s24   ;;  %s8708_s4 = sld [smem:[#allocation12_spill]] }
0x139d   : > { %p25_p8 = scmp.ge.s32.totalorder %s28_s24, 10   ;;  %s8709_s19 = sld [smem:[#allocation17_spill]] }
0x139e   : > { %s8710_s20 = sld [smem:[#allocation13_spill]]  ;;  %s8711_s21 = sld [smem:[#allocation14_spill]] }
0x139f   : > { %s8712_s22 = sld [smem:[#allocation15_spill]]  ;;  %s8713_s23 = sld [smem:[#allocation16_spill]] }
0x13a0   : > { %s8714_s17 = smov %s7226_s18  ;;  %27 = sbr.rel (!%p25_p8) target bundleno = 20 (0x14), region = 161 }
0x13a2   : > { %s8715_s18 = smov %s8708_s4 }
0x13a7   :  { %5928 = vsyncpa [#allocation3], 1 }
0x13a8   :  { %5930 = vsyncpa [#allocation3 + $0x1], 1 }
0x13a9   :  { %5931 = vsyncpa [#allocation5], 1 }
0x13aa   :  { %5933 = vsyncpa [#allocation5 + $0x1], 1 }
0x13ab   :  { %5934 = vsyncpa [#allocation8], 1 }

</bundles_post_ra>
